<compile_context>
chip_gen: v6e
topology: v6e:2x2x1
jax: 0.10.0
libtpu: 0.0.40
codegen_flags: <defaults>
</compile_context>

<pallas_src>
import functools
import math

import jax
import jax.numpy as jnp
from jax import lax
from jax.experimental import pallas as pl
from jax.experimental.pallas import tpu as pltpu


# ----------------------------------------------------------------------------
# Fused kernel: direct conv (fused im2col) + bias + full bilinear upsample
# ----------------------------------------------------------------------------
def _fused_conv_upsample_kernel(xp_ref, w_ref, b_ref, m_ref, o_ref, *,
                                Ho, Wo, Cin, Cp, kh, kw, dh, dw):
    # xp_ref: (1, Hp, Wp, Cin)   padded NHWC input for one image
    # w_ref : (kh*kw, Cin, Cp)   per-tap weights, Cout zero-padded to Cp
    # b_ref : (1, Cp)            bias (zero-padded)
    # m_ref : (Hup*Wup, Ho*Wo)   kron(Ah, Aw) bilinear interpolation matrix
    # o_ref : (1, Hup*Wup, Cp)   lane-dense output (Cp = multiple of 128)
    xp = xp_ref[0]                                    # (Hp, Wp, Cin)
    acc = jnp.zeros((Ho * Wo, Cp), jnp.float32)
    # Fused im2col: unrolled kh*kw taps, each a (Ho*Wo, Cin) @ (Cin, Cp) matmul.
    for r in range(kh * kw):
        ih, iw = r // kw, r % kw
        xs = xp[ih * dh: ih * dh + Ho, iw * dw: iw * dw + Wo, :]   # (Ho, Wo, Cin)
        acc = acc + jnp.dot(xs.reshape(Ho * Wo, Cin), w_ref[r],
                            preferred_element_type=jnp.float32)
    acc = acc + b_ref[...]                            # broadcast (1, Cp)
    # Bilinear upsample over both spatial axes as a single MXU matmul.
    o_ref[0] = jnp.dot(m_ref[...], acc,
                       preferred_element_type=jnp.float32).astype(o_ref.dtype)


# ----------------------------------------------------------------------------
# Host-side glue: bilinear matrices, parameter handling, layout plumbing
# ----------------------------------------------------------------------------
def _pair(v):
    return (v, v) if isinstance(v, int) else tuple(v)


def _bilinear_matrix(out_size, in_size):
    # align_corners=False, recompute_scale_factor semantics (scale = in/out).
    if out_size == in_size:
        return jnp.eye(out_size, dtype=jnp.float32)
    scale = in_size / out_size
    dst = jnp.arange(out_size, dtype=jnp.float32)
    src = jnp.maximum((dst + 0.5) * scale - 0.5, 0.0)
    i0 = jnp.clip(jnp.floor(src).astype(jnp.int32), 0, in_size - 1)
    i1 = jnp.clip(i0 + 1, 0, in_size - 1)
    w1 = jnp.clip(src - i0.astype(jnp.float32), 0.0, 1.0)
    w0 = 1.0 - w1
    A = jnp.zeros((out_size, in_size), jnp.float32)
    rows = jnp.arange(out_size)
    A = A.at[rows, i0].add(w0)
    A = A.at[rows, i1].add(w1)
    return A


class ConvUpsample2dPallas:
    """Pallas equivalent of cap ConvUpsample2d (groups=1, zeros padding,
    norm_layer=None, act_layer=None)."""

    def __init__(self, in_channels, out_channels, kernel_size, stride=1,
                 padding=0, dilation=1, groups=1, bias=True, key=None):
        assert groups == 1, "only groups=1 implemented"
        # TODO(synk): norm_layer / act_layer default to None in the module and
        # are identity here; groups>1 / non-'zeros' padding_mode not implemented.
        self.kh, self.kw = _pair(kernel_size)
        self.ph, self.pw = _pair(padding)
        self.dh, self.dw = _pair(dilation)
        self.sh, self.sw = _pair(stride)          # upsample scale factor
        self.cin, self.cout = in_channels, out_channels

        if key is None:
            key = jax.random.PRNGKey(0)
        kw_, kb_ = jax.random.split(key)
        fan_in = in_channels * self.kh * self.kw
        bound = 1.0 / jnp.sqrt(fan_in)
        self.weight = jax.random.uniform(
            kw_, (out_channels, in_channels, self.kh, self.kw),
            jnp.float32, -bound, bound)
        if bias:
            self.bias = jax.random.uniform(kb_, (out_channels,),
                                           jnp.float32, -bound, bound)
        else:
            self.bias = jnp.zeros((out_channels,), jnp.float32)

    @functools.partial(jax.jit, static_argnums=0)
    def __call__(self, x):
        N, Cin, H, W = x.shape
        kh, kw, ph, pw = self.kh, self.kw, self.ph, self.pw
        dh, dw = self.dh, self.dw
        Cout = self.cout
        Ho = H + 2 * ph - dh * (kh - 1)
        Wo = W + 2 * pw - dw * (kw - 1)
        Hp, Wp = H + 2 * ph, W + 2 * pw
        Hup = int(math.floor(Ho * self.sh))
        Wup = int(math.floor(Wo * self.sw))
        Cp = ((Cout + 127) // 128) * 128          # lane-dense channel padding

        # NHWC + spatial zero padding, done once in XLA (no im2col in HBM).
        xp = jnp.pad(jnp.transpose(x, (0, 2, 3, 1)),
                     ((0, 0), (ph, ph), (pw, pw), (0, 0)))
        # Per-tap weights: (kh*kw, Cin, Cp), Cout zero-padded to Cp.
        w3 = jnp.transpose(self.weight, (2, 3, 1, 0)).reshape(kh * kw, Cin, Cout)
        w3 = jnp.pad(w3, ((0, 0), (0, 0), (0, Cp - Cout)))
        b2 = jnp.pad(self.bias, (0, Cp - Cout)).reshape(1, Cp)
        # Fused bilinear interpolation matrix (trace-time constant).
        Ah = _bilinear_matrix(Hup, Ho)
        Aw = _bilinear_matrix(Wup, Wo)
        M = jnp.kron(Ah, Aw)                       # (Hup*Wup, Ho*Wo)

        kern = functools.partial(
            _fused_conv_upsample_kernel,
            Ho=Ho, Wo=Wo, Cin=Cin, Cp=Cp, kh=kh, kw=kw, dh=dh, dw=dw)

        out = pl.pallas_call(
            kern,
            out_shape=jax.ShapeDtypeStruct((N, Hup * Wup, Cp), jnp.float32),
            grid_spec=pltpu.PrefetchScalarGridSpec(
                num_scalar_prefetch=0,
                grid=(N,),
                in_specs=[
                    pl.BlockSpec((1, Hp, Wp, Cin), lambda n: (n, 0, 0, 0)),
                    pl.BlockSpec((kh * kw, Cin, Cp), lambda n: (0, 0, 0)),
                    pl.BlockSpec((1, Cp), lambda n: (0, 0)),
                    pl.BlockSpec((Hup * Wup, Ho * Wo), lambda n: (0, 0)),
                ],
                out_specs=pl.BlockSpec((1, Hup * Wup, Cp),
                                       lambda n: (n, 0, 0)),
            ),
            compiler_params=pltpu.CompilerParams(
                dimension_semantics=("parallel",)),
        )(xp, w3, b2, M)

        # (N, Hup*Wup, Cp) -> (N, Hup, Wup, Cout) -> NCHW (one small XLA pass).
        out = out.reshape(N, Hup, Wup, Cp)[..., :Cout]
        return jnp.transpose(out, (0, 3, 1, 2))


# ----------------------------------------------------------------------------
# main
# ----------------------------------------------------------------------------
if __name__ == "__main__":
    key = jax.random.PRNGKey(0)
    kx, kp = jax.random.split(key)

    N, Cin, H, W = 2, 4, 16, 16
    Cout, ksz, up_stride, pad = 8, 3, 2, 1

    x = jax.random.normal(kx, (N, Cin, H, W), jnp.float32)

    mod = ConvUpsample2dPallas(Cin, Cout, ksz, stride=up_stride,
                               padding=pad, bias=True, key=kp)
    out = jax.block_until_ready(mod(x))

    # reference check: XLA conv + same bilinear matrices
    ref_conv = lax.conv_general_dilated(
        x, mod.weight, window_strides=(1, 1), padding=[(pad, pad), (pad, pad)],
        dimension_numbers=("NCHW", "OIHW", "NCHW"))
    ref_conv = ref_conv + mod.bias.reshape(1, Cout, 1, 1)
    Ah = _bilinear_matrix(H * up_stride, H)
    Aw = _bilinear_matrix(W * up_stride, W)
    ref = jnp.einsum("ph,nchw,qw->ncpq", Ah, ref_conv, Aw)

    assert out.shape == (N, Cout, H * up_stride, W * up_stride), out.shape
    err = float(jnp.max(jnp.abs(out - ref)))
    assert err < 1e-4, err
    print("KERNEL_OK")
</pallas_src>

<mosaic_0001>
module attributes {stable_mosaic.version = 11 : i64} {
  func.func private @main(%arg0: i32) attributes {dimension_semantics = [#tpu.dimension_semantics<core_parallel>], iteration_bounds = array<i64: 2>, tpu.core_type = #tpu.core_type<sc_scalar_subcore>, window_params = []} {
    return
  }
}

module attributes {stable_mosaic.version = 11 : i64} {
  func.func private @main(%arg0: i32) attributes {dimension_semantics = [#tpu.dimension_semantics<core_parallel>], iteration_bounds = array<i64: 2>, tpu.core_type = #tpu.core_type<sc_scalar_subcore>, window_params = []} {
    return
  }
}

module attributes {stable_mosaic.version = 11 : i64} {
  func.func @_fused_conv_upsample_kernel(%arg0: i32, %arg1: memref<1x18x18x4xf32, #tpu.memory_space<vmem>>, %arg2: memref<9x4x128xf32, #tpu.memory_space<vmem>>, %arg3: memref<1x128xf32, #tpu.memory_space<vmem>>, %arg4: memref<1024x256xf32, #tpu.memory_space<vmem>>, %arg5: memref<1x1024x128xf32, #tpu.memory_space<vmem>>) attributes {dimension_semantics = [#tpu.dimension_semantics<parallel>], iteration_bounds = array<i64: 2>, scalar_prefetch = 0 : i64, scratch_operands = 0 : i64, tpu.core_type = #tpu.core_type<tc>, window_params = [{transform_indices = @transform_0, window_bounds = array<i64: 1, 18, 18, 4>}, {pipeline_mode = #tpu.pipeline_mode<synchronous>, transform_indices = @transform_1, window_bounds = array<i64: 9, 4, 128>}, {pipeline_mode = #tpu.pipeline_mode<synchronous>, transform_indices = @transform_2, window_bounds = array<i64: 1, 128>}, {pipeline_mode = #tpu.pipeline_mode<synchronous>, transform_indices = @transform_3, window_bounds = array<i64: 1024, 256>}, {transform_indices = @transform_4, window_bounds = array<i64: 1, 1024, 128>}]} {
    %c0 = arith.constant 0 : index
    %c0_0 = arith.constant 0 : index
    %c0_1 = arith.constant 0 : index
    %c0_2 = arith.constant 0 : index
    %0 = vector.load %arg1[%c0, %c0_0, %c0_1, %c0_2] : memref<1x18x18x4xf32, #tpu.memory_space<vmem>>, vector<1x18x18x4xf32>
    %1 = vector.shape_cast %0 : vector<1x18x18x4xf32> to vector<18x18x4xf32>
    %cst = arith.constant 0.000000e+00 : f32
    %2 = vector.broadcast %cst : f32 to vector<256x128xf32>
    %3 = vector.extract_strided_slice %1 {offsets = [0, 0, 0], sizes = [16, 16, 4], strides = [1, 1, 1]} : vector<18x18x4xf32> to vector<16x16x4xf32>
    %4 = vector.shape_cast %3 : vector<16x16x4xf32> to vector<256x4xf32>
    %c0_3 = arith.constant 0 : index
    %c0_4 = arith.constant 0 : index
    %c0_5 = arith.constant 0 : index
    %5 = vector.load %arg2[%c0_3, %c0_4, %c0_5] : memref<9x4x128xf32, #tpu.memory_space<vmem>>, vector<1x4x128xf32>
    %6 = vector.shape_cast %5 : vector<1x4x128xf32> to vector<4x128xf32>
    %cst_6 = arith.constant dense<0.000000e+00> : vector<256x128xf32>
    %7 = tpu.matmul %4, %6, %cst_6 {dimension_numbers = #tpu.dot_dimension_numbers<[1], [0], [0], [1], [0, 0, 1, 1], [], []>} : vector<256x4xf32>, vector<4x128xf32>, vector<256x128xf32> -> vector<256x128xf32>
    %8 = arith.addf %2, %7 : vector<256x128xf32>
    %9 = vector.extract_strided_slice %1 {offsets = [0, 1, 0], sizes = [16, 16, 4], strides = [1, 1, 1]} : vector<18x18x4xf32> to vector<16x16x4xf32>
    %10 = vector.shape_cast %9 : vector<16x16x4xf32> to vector<256x4xf32>
    %c1 = arith.constant 1 : index
    %c0_7 = arith.constant 0 : index
    %c0_8 = arith.constant 0 : index
    %11 = vector.load %arg2[%c1, %c0_7, %c0_8] : memref<9x4x128xf32, #tpu.memory_space<vmem>>, vector<1x4x128xf32>
    %12 = vector.shape_cast %11 : vector<1x4x128xf32> to vector<4x128xf32>
    %cst_9 = arith.constant dense<0.000000e+00> : vector<256x128xf32>
    %13 = tpu.matmul %10, %12, %cst_9 {dimension_numbers = #tpu.dot_dimension_numbers<[1], [0], [0], [1], [0, 0, 1, 1], [], []>} : vector<256x4xf32>, vector<4x128xf32>, vector<256x128xf32> -> vector<256x128xf32>
    %14 = arith.addf %8, %13 : vector<256x128xf32>
    %15 = vector.extract_strided_slice %1 {offsets = [0, 2, 0], sizes = [16, 16, 4], strides = [1, 1, 1]} : vector<18x18x4xf32> to vector<16x16x4xf32>
    %16 = vector.shape_cast %15 : vector<16x16x4xf32> to vector<256x4xf32>
    %c2 = arith.constant 2 : index
    %c0_10 = arith.constant 0 : index
    %c0_11 = arith.constant 0 : index
    %17 = vector.load %arg2[%c2, %c0_10, %c0_11] : memref<9x4x128xf32, #tpu.memory_space<vmem>>, vector<1x4x128xf32>
    %18 = vector.shape_cast %17 : vector<1x4x128xf32> to vector<4x128xf32>
    %cst_12 = arith.constant dense<0.000000e+00> : vector<256x128xf32>
    %19 = tpu.matmul %16, %18, %cst_12 {dimension_numbers = #tpu.dot_dimension_numbers<[1], [0], [0], [1], [0, 0, 1, 1], [], []>} : vector<256x4xf32>, vector<4x128xf32>, vector<256x128xf32> -> vector<256x128xf32>
    %20 = arith.addf %14, %19 : vector<256x128xf32>
    %21 = vector.extract_strided_slice %1 {offsets = [1, 0, 0], sizes = [16, 16, 4], strides = [1, 1, 1]} : vector<18x18x4xf32> to vector<16x16x4xf32>
    %22 = vector.shape_cast %21 : vector<16x16x4xf32> to vector<256x4xf32>
    %c3 = arith.constant 3 : index
    %c0_13 = arith.constant 0 : index
    %c0_14 = arith.constant 0 : index
    %23 = vector.load %arg2[%c3, %c0_13, %c0_14] : memref<9x4x128xf32, #tpu.memory_space<vmem>>, vector<1x4x128xf32>
    %24 = vector.shape_cast %23 : vector<1x4x128xf32> to vector<4x128xf32>
    %cst_15 = arith.constant dense<0.000000e+00> : vector<256x128xf32>
    %25 = tpu.matmul %22, %24, %cst_15 {dimension_numbers = #tpu.dot_dimension_numbers<[1], [0], [0], [1], [0, 0, 1, 1], [], []>} : vector<256x4xf32>, vector<4x128xf32>, vector<256x128xf32> -> vector<256x128xf32>
    %26 = arith.addf %20, %25 : vector<256x128xf32>
    %27 = vector.extract_strided_slice %1 {offsets = [1, 1, 0], sizes = [16, 16, 4], strides = [1, 1, 1]} : vector<18x18x4xf32> to vector<16x16x4xf32>
    %28 = vector.shape_cast %27 : vector<16x16x4xf32> to vector<256x4xf32>
    %c4 = arith.constant 4 : index
    %c0_16 = arith.constant 0 : index
    %c0_17 = arith.constant 0 : index
    %29 = vector.load %arg2[%c4, %c0_16, %c0_17] : memref<9x4x128xf32, #tpu.memory_space<vmem>>, vector<1x4x128xf32>
    %30 = vector.shape_cast %29 : vector<1x4x128xf32> to vector<4x128xf32>
    %cst_18 = arith.constant dense<0.000000e+00> : vector<256x128xf32>
    %31 = tpu.matmul %28, %30, %cst_18 {dimension_numbers = #tpu.dot_dimension_numbers<[1], [0], [0], [1], [0, 0, 1, 1], [], []>} : vector<256x4xf32>, vector<4x128xf32>, vector<256x128xf32> -> vector<256x128xf32>
    %32 = arith.addf %26, %31 : vector<256x128xf32>
    %33 = vector.extract_strided_slice %1 {offsets = [1, 2, 0], sizes = [16, 16, 4], strides = [1, 1, 1]} : vector<18x18x4xf32> to vector<16x16x4xf32>
    %34 = vector.shape_cast %33 : vector<16x16x4xf32> to vector<256x4xf32>
    %c5 = arith.constant 5 : index
    %c0_19 = arith.constant 0 : index
    %c0_20 = arith.constant 0 : index
    %35 = vector.load %arg2[%c5, %c0_19, %c0_20] : memref<9x4x128xf32, #tpu.memory_space<vmem>>, vector<1x4x128xf32>
    %36 = vector.shape_cast %35 : vector<1x4x128xf32> to vector<4x128xf32>
    %cst_21 = arith.constant dense<0.000000e+00> : vector<256x128xf32>
    %37 = tpu.matmul %34, %36, %cst_21 {dimension_numbers = #tpu.dot_dimension_numbers<[1], [0], [0], [1], [0, 0, 1, 1], [], []>} : vector<256x4xf32>, vector<4x128xf32>, vector<256x128xf32> -> vector<256x128xf32>
    %38 = arith.addf %32, %37 : vector<256x128xf32>
    %39 = vector.extract_strided_slice %1 {offsets = [2, 0, 0], sizes = [16, 16, 4], strides = [1, 1, 1]} : vector<18x18x4xf32> to vector<16x16x4xf32>
    %40 = vector.shape_cast %39 : vector<16x16x4xf32> to vector<256x4xf32>
    %c6 = arith.constant 6 : index
    %c0_22 = arith.constant 0 : index
    %c0_23 = arith.constant 0 : index
    %41 = vector.load %arg2[%c6, %c0_22, %c0_23] : memref<9x4x128xf32, #tpu.memory_space<vmem>>, vector<1x4x128xf32>
    %42 = vector.shape_cast %41 : vector<1x4x128xf32> to vector<4x128xf32>
    %cst_24 = arith.constant dense<0.000000e+00> : vector<256x128xf32>
    %43 = tpu.matmul %40, %42, %cst_24 {dimension_numbers = #tpu.dot_dimension_numbers<[1], [0], [0], [1], [0, 0, 1, 1], [], []>} : vector<256x4xf32>, vector<4x128xf32>, vector<256x128xf32> -> vector<256x128xf32>
    %44 = arith.addf %38, %43 : vector<256x128xf32>
    %45 = vector.extract_strided_slice %1 {offsets = [2, 1, 0], sizes = [16, 16, 4], strides = [1, 1, 1]} : vector<18x18x4xf32> to vector<16x16x4xf32>
    %46 = vector.shape_cast %45 : vector<16x16x4xf32> to vector<256x4xf32>
    %c7 = arith.constant 7 : index
    %c0_25 = arith.constant 0 : index
    %c0_26 = arith.constant 0 : index
    %47 = vector.load %arg2[%c7, %c0_25, %c0_26] : memref<9x4x128xf32, #tpu.memory_space<vmem>>, vector<1x4x128xf32>
    %48 = vector.shape_cast %47 : vector<1x4x128xf32> to vector<4x128xf32>
    %cst_27 = arith.constant dense<0.000000e+00> : vector<256x128xf32>
    %49 = tpu.matmul %46, %48, %cst_27 {dimension_numbers = #tpu.dot_dimension_numbers<[1], [0], [0], [1], [0, 0, 1, 1], [], []>} : vector<256x4xf32>, vector<4x128xf32>, vector<256x128xf32> -> vector<256x128xf32>
    %50 = arith.addf %44, %49 : vector<256x128xf32>
    %51 = vector.extract_strided_slice %1 {offsets = [2, 2, 0], sizes = [16, 16, 4], strides = [1, 1, 1]} : vector<18x18x4xf32> to vector<16x16x4xf32>
    %52 = vector.shape_cast %51 : vector<16x16x4xf32> to vector<256x4xf32>
    %c8 = arith.constant 8 : index
    %c0_28 = arith.constant 0 : index
    %c0_29 = arith.constant 0 : index
    %53 = vector.load %arg2[%c8, %c0_28, %c0_29] : memref<9x4x128xf32, #tpu.memory_space<vmem>>, vector<1x4x128xf32>
    %54 = vector.shape_cast %53 : vector<1x4x128xf32> to vector<4x128xf32>
    %cst_30 = arith.constant dense<0.000000e+00> : vector<256x128xf32>
    %55 = tpu.matmul %52, %54, %cst_30 {dimension_numbers = #tpu.dot_dimension_numbers<[1], [0], [0], [1], [0, 0, 1, 1], [], []>} : vector<256x4xf32>, vector<4x128xf32>, vector<256x128xf32> -> vector<256x128xf32>
    %56 = arith.addf %50, %55 : vector<256x128xf32>
    %c0_31 = arith.constant 0 : index
    %c0_32 = arith.constant 0 : index
    %57 = vector.load %arg3[%c0_31, %c0_32] : memref<1x128xf32, #tpu.memory_space<vmem>>, vector<1x128xf32>
    %58 = vector.broadcast %57 : vector<1x128xf32> to vector<256x128xf32>
    %59 = arith.addf %56, %58 : vector<256x128xf32>
    %c0_33 = arith.constant 0 : index
    %c0_34 = arith.constant 0 : index
    %60 = vector.load %arg4[%c0_33, %c0_34] : memref<1024x256xf32, #tpu.memory_space<vmem>>, vector<1024x256xf32>
    %cst_35 = arith.constant dense<0.000000e+00> : vector<1024x128xf32>
    %61 = tpu.matmul %60, %59, %cst_35 {dimension_numbers = #tpu.dot_dimension_numbers<[1], [0], [0], [1], [0, 0, 1, 1], [], []>} : vector<1024x256xf32>, vector<256x128xf32>, vector<1024x128xf32> -> vector<1024x128xf32>
    %c0_36 = arith.constant 0 : index
    %c0_37 = arith.constant 0 : index
    %c0_38 = arith.constant 0 : index
    %62 = vector.load %arg5[%c0_36, %c0_37, %c0_38] : memref<1x1024x128xf32, #tpu.memory_space<vmem>>, vector<1x1024x128xf32>
    %63 = vector.shape_cast %62 : vector<1x1024x128xf32> to vector<1024x128xf32>
    %64 = vector.shape_cast %61 : vector<1024x128xf32> to vector<1x1024x128xf32>
    tpu.vector_store %arg5[%c0_36, %c0_37, %c0_38], %64 {strides = array<i32>} : memref<1x1024x128xf32, #tpu.memory_space<vmem>>, vector<1x1024x128xf32>,
    return
  }
  func.func @transform_0(%arg0: i32) -> (i32, i32, i32, i32) {
    %c0_i32 = arith.constant 0 : i32
    %c0_i32_0 = arith.constant 0 : i32
    %c0_i32_1 = arith.constant 0 : i32
    %c0_i32_2 = arith.constant 0 : i32
    return %arg0, %c0_i32, %c0_i32_0, %c0_i32_1 : i32, i32, i32, i32
  }
  func.func @transform_1(%arg0: i32) -> (i32, i32, i32) {
    %c0_i32 = arith.constant 0 : i32
    %c0_i32_0 = arith.constant 0 : i32
    %c0_i32_1 = arith.constant 0 : i32
    %c0_i32_2 = arith.constant 0 : i32
    return %c0_i32, %c0_i32_0, %c0_i32_1 : i32, i32, i32
  }
  func.func @transform_2(%arg0: i32) -> (i32, i32) {
    %c0_i32 = arith.constant 0 : i32
    %c0_i32_0 = arith.constant 0 : i32
    %c0_i32_1 = arith.constant 0 : i32
    return %c0_i32, %c0_i32_0 : i32, i32
  }
  func.func @transform_3(%arg0: i32) -> (i32, i32) {
    %c0_i32 = arith.constant 0 : i32
    %c0_i32_0 = arith.constant 0 : i32
    %c0_i32_1 = arith.constant 0 : i32
    return %c0_i32, %c0_i32_0 : i32, i32
  }
  func.func @transform_4(%arg0: i32) -> (i32, i32, i32) {
    %c0_i32 = arith.constant 0 : i32
    %c0_i32_0 = arith.constant 0 : i32
    %c0_i32_1 = arith.constant 0 : i32
    return %arg0, %c0_i32, %c0_i32_0 : i32, i32, i32
  }
}

</mosaic_0001>

<bundles_post_ra>
// kernel: a_call__.1
= control target key start
LH: loop header
LB: loop body
LE: loop exit
PB: predicated region body
PF: predicated region fallthrough
CT: control target
= control target key end

     0   :  { %s5354_s15 = smov 0   ;;  %s8132_s0 = inlined_call_operand.vmem [shape: f32[2,18,18,4], index: 0, kind: input, shape index: {}]   ;;  %s8133_s1 = inlined_call_operand.vmem [shape: f32[9,4,128], index: 1, kind: input, shape index: {}]   ;;  %s8134_s2 = inlined_call_operand.vmem [shape: f32[1,128], index: 2, kind: input, shape index: {}]   ;;  %s8135_s3 = inlined_call_operand.vmem [shape: f32[1024,256], index: 3, kind: input, shape index: {}]   ;;  %s8136_s4 = inlined_call_operand.vmem [shape: f32[2,1024,128], index: 4, kind: output, shape index: {}]  }
   0x1 LB: > { %s4182_s16 = sadd.s32 4294967295, %s5326_s15   ;;  %p4186_p0 = scmp.ge.s32.totalorder %s5326_s15, 1  ;;  %s5326_s15 = sphi %s5354_s15, %s14_s15  }
   0x2   : > { %p162_p1 = scmp.lt.s32.totalorder %s5326_s15, 3 }
   0x4   : > { %p163_p2 = pnand %p4186_p0, %p162_p1 }
   0x6   : > { %166 = sbr.rel (%p163_p2) target bundleno = 1045 (0x415), region = 36 }
   0xb   : > { %v4190_v0 = vld [vmem:[%s8133_s1 + $0x4] sm:$0xf]  ;;  %vm449_vm0 = vcmask 1043456   ;;  %v252_v1 = vld [vmem:[%s8133_s1] sm:$0xf]  ;;  %p188_p3 = scmp.lt.s32.totalorder %s4182_s16, 1 }
   0xc   : > { %4796 = vmatprep.subr.msk.mxu0 %vm449_vm0, %v4190_v0  ;;  %4846 = vmatprep.subr.msk.mxu1 %vm449_vm0, %v252_v1  ;;  %v4257_v2 = vld [vmem:[%s8133_s1 + $0x8] sm:$0xf]  ;;  %v4291_v3 = vld [vmem:[%s8133_s1 + $0xc] sm:$0xf]  ;;  %vm384_vm1 = vcmask 31744   ;;  %vm301_vm2 = vcmask 1046528  }
   0xd   : > { %4797 = vmatpush3.msk.msra.mxu0 %vm449_vm0, %v4190_v0  ;;  %s8520_s16 = smov (!%p188_p3, %s4182_s16), 1  ;;  %4847 = vmatpush3.msk.msra.mxu1 %vm449_vm0, %v252_v1  ;;  %v5445_v26 = vld [vmem:[%s8133_s1 + $0x10] sm:$0xf]  ;;  %v5538_v53 = vld [vmem:[%s8133_s1 + $0x14] sm:$0xf]  ;;  %vm970_vm3 = vcmask 1045504  }
   0xe   : > { %4896 = vmatprep.subr.msk.mxu0 %vm449_vm0, %v4257_v2  ;;  %4946 = vmatprep.subr.msk.mxu1 %vm449_vm0, %v4291_v3  ;;  %s5310_s25 = smul.u32 432, %s8520_s16  ;;  %s4498_s21 = sshll.u32 %s8520_s16, 10 }
  0x10   : > { %s5386_s28 = scalar_lea.vmem %s8132_s0, %s5310_s25 }
  0x11   : > { %v5389_v4 = vld [vmem:[%s5386_s28] sm:$0xff]  ;;  %v5392_v5 = vld [vmem:[%s5386_s28 + $0x8] sm:$0xff]  ;;  %v5395_v6 = vld [vmem:[%s5386_s28 + $0x10] sm:$0x3] }
  0x12   : > { %v302_v7 = vrot.slane %v5389_v4, 1  ;;  %v303_v8 = vrot.slane %v5392_v5, 1  ;;  %4848 = vmatprep.mubr.msk.f32.mxu1 %vm384_vm1, %v5389_v4  ;;  %v305_v9 = vrot.slane %v5395_v6, 1  ;;  %v5403_v10 = vld [vmem:[%s5386_s28 + $0x18] sm:$0xff]  ;;  %v5406_v11 = vld [vmem:[%s5386_s28 + $0x20] sm:$0xff]  ;;  %v5416_v15 = vld [vmem:[%s5386_s28 + $0x30] sm:$0xff] }
  0x13   : > { %4849 = vmatmul.mubr.msk.f32.vlgmr.msra.gmra.mxu1 %vm384_vm1, %v5392_v5  ;;  %v307_v12 = vrot.slane %v5403_v10, 1  ;;  %v308_v13 = vrot.slane %v5406_v11, 1  ;;  %v5413_v14 = vld [vmem:[%s5386_s28 + $0x28] sm:$0x3]  ;;  %v5419_v16 = vld [vmem:[%s5386_s28 + $0x38] sm:$0xff]  ;;  %v312_v20 = vrot.slane %v5416_v15, 1 }
  0x14   : > { %v304_v17 = vsel %vm301_vm2, %v302_v7, %v303_v8  ;;  %v306_v18 = vsel %vm301_vm2, %v303_v8, %v305_v9  ;;  %4851 = vmatprep.mubr.msk.f32.mxu1 %vm384_vm1, %v5403_v10  ;;  %v310_v19 = vrot.slane %v5413_v14, 1  ;;  %v5428_v21 = vld [vmem:[%s5386_s28 + $0x40] sm:$0x3]  ;;  %4947 = vmatpush3.msk.msra.mxu1 %vm449_vm0, %v4291_v3  ;;  %v313_v23 = vrot.slane %v5419_v16, 1  ;;  %v5437_v24 = vld [vmem:[%s5386_s28 + $0x48] sm:$0xff]  ;;  %v5440_v25 = vld [vmem:[%s5386_s28 + $0x50] sm:$0xff] }
  0x15   : > { %4798 = vmatprep.mubr.msk.f32.mxu0 %vm384_vm1, %v304_v17  ;;  %v5433_v22 = vsel %vm301_vm2, %v307_v12, %v308_v13  ;;  %v315_v28 = vrot.slane %v5428_v21, 1  ;;  %v317_v30 = vrot.slane %v5437_v24, 1  ;;  %v318_v31 = vrot.slane %v5440_v25, 1  ;;  %v5463_v32 = vld [vmem:[%s5386_s28 + $0x58] sm:$0x3]  ;;  %v5470_v33 = vld [vmem:[%s5386_s28 + $0x60] sm:$0xff]  ;;  %5046 = vmatprep.subr.msk.mxu1 %vm449_vm0, %v5538_v53 }
  0x16   : > { %4799 = vmatmul.mubr.msk.f32.vlgmr.msra.gmra.mxu0 %vm384_vm1, %v306_v18  ;;  %v5452_v27 = vsel %vm301_vm2, %v308_v13, %v310_v19  ;;  %v5458_v29 = vsel %vm301_vm2, %v312_v20, %v313_v23  ;;  %v5473_v34 = vld [vmem:[%s5386_s28 + $0x68] sm:$0xff]  ;;  %v320_v36 = vrot.slane %v5463_v32, 1  ;;  %v322_v38 = vrot.slane %v5470_v33, 1  ;;  %v5491_v40 = vld [vmem:[%s5386_s28 + $0x70] sm:$0x3]  ;;  %v5496_v41 = vld [vmem:[%s5386_s28 + $0x78] sm:$0xff] }
  0x17   : > { %4897 = vmatpush3.msk.msra.mxu0 %vm449_vm0, %v4257_v2  ;;  %4801 = vmatprep.mubr.msk.f32.mxu0 %vm384_vm1, %v5433_v22  ;;  %8218 = vst [vmem:[#allocation2_spill] sm:$0xff] %v5458_v29  ;;  %v5480_v35 = vsel %vm301_vm2, %v313_v23, %v315_v28  ;;  %v5486_v37 = vsel %vm301_vm2, %v317_v30, %v318_v31  ;;  %v323_v39 = vrot.slane %v5473_v34, 1  ;;  %v5499_v42 = vld [vmem:[%s5386_s28 + $0x80] sm:$0xff]  ;;  %v325_v44 = vrot.slane %v5491_v40, 1  ;;  %v5517_v48 = vld [vmem:[%s5386_s28 + $0x88] sm:$0x3] }
  0x18   : > { %4852 = vmatmul.mubr.msk.f32.gmra.mxu1 %vm384_vm1, %v5406_v11  ;;  %4996 = vmatprep.subr.msk.mxu0 %vm449_vm0, %v5445_v26  ;;  %8219 = vst [vmem:[#allocation3_spill] sm:$0xff] %v5480_v35  ;;  %8220 = vst [vmem:[#allocation4_spill] sm:$0xff] %v5486_v37  ;;  %v5506_v43 = vsel %vm301_vm2, %v318_v31, %v320_v36  ;;  %v327_v46 = vrot.slane %v5496_v41, 1  ;;  %v328_v47 = vrot.slane %v5499_v42, 1  ;;  %v5522_v49 = vld [vmem:[%s5386_s28 + $0x90] sm:$0xff]  ;;  %v5525_v50 = vld [vmem:[%s5386_s28 + $0x98] sm:$0xff] }
  0x19   : > { %4854 = vmatprep.mubr.msk.f32.mxu1 %vm384_vm1, %v5416_v15  ;;  %8221 = vst [vmem:[#allocation5_spill] sm:$0xff] %v5506_v43  ;;  %v5512_v45 = vsel %vm301_vm2, %v322_v38, %v323_v39  ;;  %8223 = vst [vmem:[#allocation7_spill] sm:$0xff] %v5522_v49  ;;  %v5532_v51 = vsel %vm301_vm2, %v323_v39, %v325_v44  ;;  %v330_v52 = vrot.slane %v5517_v48, 1  ;;  %v332_v55 = vrot.slane %v5522_v49, 1  ;;  %v5548_v57 = vld [vmem:[%s5386_s28 + $0xa0] sm:$0x3] }
  0x1a   : > { %4802 = vmatmul.mubr.msk.f32.gmra.mxu0 %vm384_vm1, %v5452_v27  ;;  %8222 = vst [vmem:[#allocation6_spill] sm:$0xff] %v5512_v45  ;;  %8224 = vst [vmem:[#allocation8_spill] sm:$0xff] %v5532_v51  ;;  %v5543_v54 = vsel %vm301_vm2, %v327_v46, %v328_v47  ;;  %v333_v56 = vrot.slane %v5525_v50, 1  ;;  %v5555_v58 = vld [vmem:[%s5386_s28 + $0xa8] sm:$0xff]  ;;  %v5558_v59 = vld [vmem:[%s5386_s28 + $0xb0] sm:$0xff]  ;;  %v976_v60 = vrot.slane %v5403_v10, 2 }
  0x1b   : > { %4804 = vmatprep.mubr.msk.f32.mxu0 %vm384_vm1, %v5458_v29  ;;  %8225 = vst [vmem:[#allocation9_spill] sm:$0xff] %v5543_v54  ;;  %8226 = vst [vmem:[#allocation10_spill] sm:$0xff] %v5555_v58  ;;  %v5566_v61 = vsel %vm301_vm2, %v328_v47, %v330_v52  ;;  %v335_v62 = vrot.slane %v5548_v57, 1  ;;  %v977_v63 = vrot.slane %v5406_v11, 2  ;;  %v979_v0 = vrot.slane %v5413_v14, 2  ;;  %v5584_v8 = vld [vmem:[%s5386_s28 + $0xc0] sm:$0xff] }
  0x1c   : > { %4855 = vmatmul.mubr.msk.f32.gmra.mxu1 %vm384_vm1, %v5419_v16  ;;  %8227 = vst [vmem:[#allocation11_spill] sm:$0xff] %v5566_v61  ;;  %v5574_v1 = vsel %vm301_vm2, %v332_v55, %v333_v56  ;;  %v337_v2 = vrot.slane %v5555_v58, 1  ;;  %v338_v3 = vrot.slane %v5558_v59, 1  ;;  %v5579_v7 = vld [vmem:[%s5386_s28 + $0xb8] sm:$0x3]  ;;  %8229 = vst [vmem:[#allocation13_spill] sm:$0xff] %v5584_v8 }
  0x1d   : > { %4857 = vmatprep.mubr.msk.f32.mxu1 %vm384_vm1, %v5437_v24  ;;  %8228 = vst [vmem:[#allocation12_spill] sm:$0xff] %v5574_v1  ;;  %v5587_v9 = vld [vmem:[%s5386_s28 + $0xc8] sm:$0xff]  ;;  %v5590_v12 = vsel %vm970_vm3, %v976_v60, %v977_v63  ;;  %v5593_v13 = vsel %vm970_vm3, %v977_v63, %v979_v0  ;;  %v5600_v14 = vsel %vm301_vm2, %v333_v56, %v335_v62  ;;  %v340_v17 = vrot.slane %v5579_v7, 1  ;;  %v5611_v23 = vld [vmem:[%s5386_s28 + $0xd0] sm:$0x3]  ;;  %v5616_v28 = vld [vmem:[%s5386_s28 + $0xd8] sm:$0xff] }
  0x1e   : > { %4805 = vmatmul.mubr.msk.f32.gmra.mxu0 %vm384_vm1, %v5480_v35  ;;  %8230 = vst [vmem:[#allocation14_spill] sm:$0xff] %v5600_v14  ;;  %v5606_v18 = vsel %vm301_vm2, %v337_v2, %v338_v3  ;;  %v342_v19 = vrot.slane %v5584_v8, 1  ;;  %v343_v20 = vrot.slane %v5587_v9, 1  ;;  %8232 = vst [vmem:[#allocation16_spill] sm:$0xff] %v5616_v28  ;;  %v5619_v30 = vld [vmem:[%s5386_s28 + $0xe0] sm:$0xff]  ;;  %v345_v36 = vrot.slane %v5611_v23, 1 }
  0x1f   : > { %4807 = vmatprep.mubr.msk.f32.mxu0 %vm384_vm1, %v5486_v37  ;;  %8231 = vst [vmem:[#allocation15_spill] sm:$0xff] %v5606_v18  ;;  %v5626_v31 = vsel %vm301_vm2, %v338_v3, %v340_v17  ;;  %v347_v39 = vrot.slane %v5616_v28, 1  ;;  %v348_v44 = vrot.slane %v5619_v30, 1  ;;  %v5637_v46 = vld [vmem:[%s5386_s28 + $0xe8] sm:$0x3]  ;;  %v5642_v47 = vld [vmem:[%s5386_s28 + $0xf0] sm:$0xff] }
  0x20   : > { %4858 = vmatmul.mubr.msk.f32.gmra.mxu1 %vm384_vm1, %v5440_v25  ;;  %8233 = vst [vmem:[#allocation17_spill] sm:$0xff] %v5626_v31  ;;  %v5632_v38 = vsel %vm301_vm2, %v342_v19, %v343_v20  ;;  %8235 = vst [vmem:[#allocation19_spill] sm:$0xff] %v5642_v47  ;;  %v5645_v52 = vld [vmem:[%s5386_s28 + $0xf8] sm:$0xff]  ;;  %v5652_v55 = vsel %vm301_vm2, %v343_v20, %v345_v36  ;;  %v350_v56 = vrot.slane %v5637_v46, 1  ;;  %v352_v62 = vrot.slane %v5642_v47, 1  ;;  %v5668_v2 = vld [vmem:[%s5386_s28 + $0x108] sm:$0xff] }
  0x21   : > { %4860 = vmatprep.mubr.msk.f32.mxu1 %vm384_vm1, %v5470_v33  ;;  %8234 = vst [vmem:[#allocation18_spill] sm:$0xff] %v5632_v38  ;;  %8236 = vst [vmem:[#allocation20_spill] sm:$0xff] %v5652_v55  ;;  %v5658_v60 = vsel %vm301_vm2, %v347_v39, %v348_v44  ;;  %v353_v63 = vrot.slane %v5645_v52, 1  ;;  %v5663_v0 = vld [vmem:[%s5386_s28 + $0x100] sm:$0x3]  ;;  %v5671_v3 = vld [vmem:[%s5386_s28 + $0x110] sm:$0xff] }
  0x22   : > { %4808 = vmatmul.mubr.msk.f32.gmra.mxu0 %vm384_vm1, %v5506_v43  ;;  %8237 = vst [vmem:[#allocation21_spill] sm:$0xff] %v5658_v60  ;;  %8238 = vst [vmem:[#allocation22_spill] sm:$0xff] %v5668_v2  ;;  %v5678_v17 = vsel %vm301_vm2, %v348_v44, %v350_v56  ;;  %v355_v19 = vrot.slane %v5663_v0, 1  ;;  %v357_v36 = vrot.slane %v5668_v2, 1  ;;  %v358_v39 = vrot.slane %v5671_v3, 1  ;;  %v5694_v44 = vld [vmem:[%s5386_s28 + $0x120] sm:$0xff] }
  0x23   : > { %4810 = vmatprep.mubr.msk.f32.mxu0 %vm384_vm1, %v5512_v45  ;;  %8239 = vst [vmem:[#allocation23_spill] sm:$0xff] %v5678_v17  ;;  %v5684_v20 = vsel %vm301_vm2, %v352_v62, %v353_v63  ;;  %8241 = vst [vmem:[#allocation25_spill] sm:$0xff] %v5694_v44  ;;  %v5697_v56 = vld [vmem:[%s5386_s28 + $0x128] sm:$0xff]  ;;  %v5793_v29 = vld [vmem:[%s5386_s28 + $0x178] sm:$0x3] }
  0x24   : > { %4861 = vmatmul.mubr.msk.f32.gmra.mxu1 %vm384_vm1, %v5473_v34  ;;  %8240 = vst [vmem:[#allocation24_spill] sm:$0xff] %v5684_v20  ;;  %v5704_v62 = vsel %vm301_vm2, %v353_v63, %v355_v19  ;;  %v5720_v63 = vld [vmem:[%s5386_s28 + $0x138] sm:$0xff]  ;;  %v5723_v19 = vld [vmem:[%s5386_s28 + $0x140] sm:$0xff] }
  0x25   : > { %4863 = vmatprep.mubr.msk.f32.mxu1 %vm384_vm1, %v5496_v41  ;;  %8242 = vst [vmem:[#allocation26_spill] sm:$0xff] %v5704_v62  ;;  %8244 = vst [vmem:[#allocation28_spill] sm:$0xff] %v5720_v63 }
  0x26   : > { %4811 = vmatmul.mubr.msk.f32.gmra.mxu0 %vm384_vm1, %v5532_v51 }
  0x27   : > { %4813 = vmatprep.mubr.msk.f32.mxu0 %vm384_vm1, %v5543_v54 }
  0x28   : > { %4864 = vmatmul.mubr.msk.f32.gmra.mxu1 %vm384_vm1, %v5499_v42 }
  0x29   : > { %4866 = vmatprep.mubr.msk.f32.mxu1 %vm384_vm1, %v5522_v49 }
  0x2a   : > { %4814 = vmatmul.mubr.msk.f32.gmra.mxu0 %vm384_vm1, %v5566_v61  ;;  %v5741_v61 = vld [vmem:[%s5386_s28 + $0x148] sm:$0x3] }
  0x2b   : > { %4816 = vmatprep.mubr.msk.f32.mxu0 %vm384_vm1, %v5574_v1  ;;  %v367_v1 = vrot.slane %v5720_v63, 1 }
  0x2c   : > { %4867 = vmatmul.mubr.msk.f32.gmra.mxu1 %vm384_vm1, %v5525_v50 }
  0x2d   : > { %4869 = vmatprep.mubr.msk.f32.mxu1 %vm384_vm1, %v5555_v58 }
  0x2e   : > { %4817 = vmatmul.mubr.msk.f32.gmra.mxu0 %vm384_vm1, %v5600_v14 }
  0x2f   : > { %4819 = vmatprep.mubr.msk.f32.mxu0 %vm384_vm1, %v5606_v18  ;;  %v5715_v18 = vld [vmem:[%s5386_s28 + $0x130] sm:$0x3] }
  0x30   : > { %4870 = vmatmul.mubr.msk.f32.gmra.mxu1 %vm384_vm1, %v5558_v59 }
  0x31   : > { %4872 = vmatprep.mubr.msk.f32.mxu1 %vm384_vm1, %v5584_v8 }
  0x32   : > { %4820 = vmatmul.mubr.msk.f32.gmra.mxu0 %vm384_vm1, %v5626_v31  ;;  %v362_v31 = vrot.slane %v5694_v44, 1 }
  0x33   : > { %4822 = vmatprep.mubr.msk.f32.mxu0 %vm384_vm1, %v5632_v38  ;;  %v5710_v38 = vsel %vm301_vm2, %v357_v36, %v358_v39 }
  0x34   : > { %4873 = vmatmul.mubr.msk.f32.gmra.mxu1 %vm384_vm1, %v5587_v9  ;;  %8243 = vst [vmem:[#allocation27_spill] sm:$0xff] %v5710_v38 }
  0x35   : > { %4875 = vmatprep.mubr.msk.f32.mxu1 %vm384_vm1, %v5616_v28 }
  0x36   : > { %4823 = vmatmul.mubr.msk.f32.gmra.mxu0 %vm384_vm1, %v5652_v55  ;;  %v5689_v55 = vld [vmem:[%s5386_s28 + $0x118] sm:$0x3] }
  0x37   : > { %4825 = vmatprep.mubr.msk.f32.mxu0 %vm384_vm1, %v5658_v60  ;;  %v360_v60 = vrot.slane %v5689_v55, 1 }
  0x38   : > { %4876 = vmatmul.mubr.msk.f32.gmra.mxu1 %vm384_vm1, %v5619_v30 }
  0x39   : > { %4878 = vmatprep.mubr.msk.f32.mxu1 %vm384_vm1, %v5642_v47  ;;  %v5730_v36 = vsel %vm301_vm2, %v358_v39, %v360_v60  ;;  %v5746_v60 = vld [vmem:[%s5386_s28 + $0x150] sm:$0xff]  ;;  %v5749_v39 = vld [vmem:[%s5386_s28 + $0x158] sm:$0xff] }
  0x3a   : > { %4826 = vmatmul.mubr.msk.f32.gmra.mxu0 %vm384_vm1, %v5678_v17  ;;  %v363_v17 = vrot.slane %v5697_v56, 1  ;;  %8245 = vst [vmem:[#allocation29_spill] sm:$0xff] %v5730_v36  ;;  %8247 = vst [vmem:[#allocation31_spill] sm:$0xff] %v5746_v60  ;;  %v372_v51 = vrot.slane %v5746_v60, 1  ;;  %v373_v45 = vrot.slane %v5749_v39, 1 }
  0x3b   : > { %4828 = vmatprep.mubr.msk.f32.mxu0 %vm384_vm1, %v5684_v20  ;;  %v365_v20 = vrot.slane %v5715_v18, 1 }
  0x3c   : > { %4879 = vmatmul.mubr.msk.f32.gmra.mxu1 %vm384_vm1, %v5645_v52  ;;  %v5736_v14 = vsel %vm301_vm2, %v362_v31, %v363_v17  ;;  %v5788_v43 = vsel %vm301_vm2, %v372_v51, %v373_v45  ;;  %v380_v51 = vrot.slane %v5793_v29, 1 }
  0x3d   : > { %4881 = vmatprep.mubr.msk.f32.mxu1 %vm384_vm1, %v5668_v2  ;;  %8246 = vst [vmem:[#allocation30_spill] sm:$0xff] %v5736_v14  ;;  %v5756_v31 = vsel %vm301_vm2, %v363_v17, %v365_v20  ;;  %v5772_v17 = vld [vmem:[%s5386_s28 + $0x168] sm:$0xff]  ;;  %v5775_v20 = vld [vmem:[%s5386_s28 + $0x170] sm:$0xff] }
  0x3e   : > { %4829 = vmatmul.mubr.msk.f32.gmra.mxu0 %vm384_vm1, %v5704_v62  ;;  %v368_v62 = vrot.slane %v5723_v19, 1  ;;  %8248 = vst [vmem:[#allocation32_spill] sm:$0xff] %v5756_v31  ;;  %8250 = vst [vmem:[#allocation34_spill] sm:$0xff] %v5772_v17  ;;  %v377_v37 = vrot.slane %v5772_v17, 1  ;;  %v378_v35 = vrot.slane %v5775_v20, 1 }
  0x3f   : > { %4831 = vmatprep.mubr.msk.f32.mxu0 %vm384_vm1, %v5710_v38  ;;  %v370_v38 = vrot.slane %v5741_v61, 1 }
  0x40   : > { %4882 = vmatmul.mubr.msk.f32.gmra.mxu1 %vm384_vm1, %v5671_v3  ;;  %v5762_v54 = vsel %vm301_vm2, %v367_v1, %v368_v62 }
  0x41   : > { %4884 = vmatprep.mubr.msk.f32.mxu1 %vm384_vm1, %v5694_v44  ;;  %8249 = vst [vmem:[#allocation33_spill] sm:$0xff] %v5762_v54  ;;  %v5782_v1 = vsel %vm301_vm2, %v368_v62, %v370_v38  ;;  %v5808_v62 = vsel %vm301_vm2, %v377_v37, %v378_v35  ;;  %v982_v37 = vrot.slane %v5419_v16, 2 }
  0x42   : > { %4832 = vmatmul.mubr.msk.f32.gmra.mxu0 %vm384_vm1, %v5730_v36  ;;  %v5767_v36 = vld [vmem:[%s5386_s28 + $0x160] sm:$0x3] }
  0x43   : > { %4834 = vmatprep.mubr.msk.f32.mxu0 %vm384_vm1, %v5736_v14  ;;  %v375_v14 = vrot.slane %v5767_v36, 1 }
  0x44   : > { %4885 = vmatmul.mubr.msk.f32.gmra.mxu1 %vm384_vm1, %v5697_v56 }
  0x45   : > { %4887 = vmatprep.mubr.msk.f32.mxu1 %vm384_vm1, %v5720_v63  ;;  %v5802_v38 = vsel %vm301_vm2, %v373_v45, %v375_v14  ;;  %v974_v45 = vrot.slane %v5395_v6, 2  ;;  %v5820_v14 = vsel %vm301_vm2, %v378_v35, %v380_v51  ;;  %v5834_v6 = vld [vmem:[%s8133_s1 + $0x1c] sm:$0xf]  ;;  %v981_v35 = vrot.slane %v5416_v15, 2 }
  0x46   : > { %4835 = vmatmul.mubr.msk.f32.gmra.mxu0 %vm384_vm1, %v5756_v31  ;;  %v972_v31 = vrot.slane %v5392_v5, 2 }
  0x47   : > { %4837 = vmatprep.mubr.msk.f32.mxu0 %vm384_vm1, %v5762_v54  ;;  %v971_v54 = vrot.slane %v5389_v4, 2 }
  0x48   : > { %4888 = vmatmul.mubr.msk.f32.gmra.mxu1 %vm384_vm1, %v5723_v19  ;;  %v975_v5 = vsel %vm970_vm3, %v972_v31, %v974_v45  ;;  %v991_v45 = vrot.slane %v5470_v33, 2 }
  0x49   : > { %4890 = vmatprep.mubr.msk.f32.mxu1 %vm384_vm1, %v5746_v60  ;;  %v973_v4 = vsel %vm970_vm3, %v971_v54, %v972_v31  ;;  %v986_v54 = vrot.slane %v5437_v24, 2  ;;  %v987_v31 = vrot.slane %v5440_v25, 2 }
  0x4a   : > { %4838 = vmatmul.mubr.msk.f32.gmra.mxu0 %vm384_vm1, %v5782_v1 }
  0x4b   : > { %4840 = vmatprep.mubr.msk.f32.mxu0 %vm384_vm1, %v5788_v43  ;;  %v5879_v51 = vsel %vm970_vm3, %v986_v54, %v987_v31  ;;  %v999_v54 = vrot.slane %v5517_v48, 2 }
  0x4c   : > { %4891 = vmatmul.mubr.msk.f32.gmra.mxu1 %vm384_vm1, %v5749_v39 }
  0x4d   : > { %4893 = vmatprep.mubr.msk.f32.mxu1 %vm384_vm1, %v5772_v17 }
  0x4e   : > { %4841 = vmatmul.mubr.msk.f32.gmra.mxu0 %vm384_vm1, %v5802_v38 }
  0x4f   : > { %4843 = vmatprep.mubr.msk.f32.mxu0 %vm384_vm1, %v5808_v62 }
  0x50   : > { %4894 = vmatmul.mubr.msk.f32.gmra.mxu1 %vm384_vm1, %v5775_v20 }
  0x51   : > { %4948 = vmatprep.mubr.msk.f32.mxu1 %vm384_vm1, %v5403_v10  ;;  %v5847_v10 = vld [vmem:[%s8133_s1 + $0x18] sm:$0xf] }
  0x52   : > { %4844 = vmatmul.mubr.msk.f32.gmra.mxu0 %vm384_vm1, %v5820_v14 }
  0x53   : > { %4898 = vmatprep.mubr.msk.f32.mxu0 %vm384_vm1, %v973_v4  ;;  %v992_v4 = vrot.slane %v5473_v34, 2 }
  0x54   : > { %4949 = vmatmul.mubr.msk.f32.vlgmr.msra.gmra.mxu1 %vm384_vm1, %v5406_v11  ;;  %v984_v11 = vrot.slane %v5428_v21, 2 }
  0x55   : > { %4951 = vmatprep.mubr.msk.f32.mxu1 %vm384_vm1, %v5416_v15  ;;  %5047 = vmatpush3.msk.msra.mxu1 %vm449_vm0, %v5538_v53  ;;  %v5860_v53 = vsel %vm970_vm3, %v981_v35, %v982_v37  ;;  %v5896_v35 = vsel %vm970_vm3, %v991_v45, %v992_v4  ;;  %v1002_v45 = vrot.slane %v5525_v50, 2 }
  0x56   : > { %4899 = vmatmul.mubr.msk.f32.vlgmr.msra.gmra.mxu0 %vm384_vm1, %v975_v5  ;;  %5146 = vmatprep.subr.msk.mxu1 %vm449_vm0, %v5834_v6  ;;  %v5873_v21 = vsel %vm970_vm3, %v982_v37, %v984_v11  ;;  %v994_v5 = vrot.slane %v5491_v40, 2  ;;  %8251 = vst [vmem:[#allocation35_spill] sm:$0xff] %v5896_v35  ;;  %v996_v37 = vrot.slane %v5496_v41, 2  ;;  %v997_v11 = vrot.slane %v5499_v42, 2 }
  0x57   : > { %4997 = vmatpush3.msk.msra.mxu0 %vm449_vm0, %v5445_v26  ;;  %4901 = vmatprep.mubr.msk.f32.mxu0 %vm384_vm1, %v5590_v12  ;;  %v989_v26 = vrot.slane %v5463_v32, 2 }
  0x58   : > { %4952 = vmatmul.mubr.msk.f32.gmra.mxu1 %vm384_vm1, %v5419_v16  ;;  %5096 = vmatprep.subr.msk.mxu0 %vm449_vm0, %v5847_v10  ;;  %v5907_v40 = vsel %vm970_vm3, %v992_v4, %v994_v5  ;;  %v5924_v48 = vsel %vm970_vm3, %v997_v11, %v999_v54  ;;  %v1004_v4 = vrot.slane %v5548_v57, 2 }
  0x59   : > { %4954 = vmatprep.mubr.msk.f32.mxu1 %vm384_vm1, %v5437_v24  ;;  %v5890_v32 = vsel %vm970_vm3, %v987_v31, %v989_v26  ;;  %8252 = vst [vmem:[#allocation36_spill] sm:$0xff] %v5907_v40  ;;  %v5913_v31 = vsel %vm970_vm3, %v996_v37, %v997_v11  ;;  %v1001_v26 = vrot.slane %v5522_v49, 2  ;;  %8254 = vst [vmem:[#allocation38_spill] sm:$0xff] %v5924_v48  ;;  %v1006_v37 = vrot.slane %v5555_v58, 2 }
  0x5a   : > { %4902 = vmatmul.mubr.msk.f32.gmra.mxu0 %vm384_vm1, %v5593_v13  ;;  %8253 = vst [vmem:[#allocation37_spill] sm:$0xff] %v5913_v31  ;;  %v5941_v57 = vsel %vm970_vm3, %v1002_v45, %v1004_v4  ;;  %v1009_v11 = vrot.slane %v5579_v7, 2 }
  0x5b   : > { %4904 = vmatprep.mubr.msk.f32.mxu0 %vm384_vm1, %v5860_v53  ;;  %v5930_v5 = vsel %vm970_vm3, %v1001_v26, %v1002_v45  ;;  %8256 = vst [vmem:[#allocation40_spill] sm:$0xff] %v5941_v57  ;;  %v1011_v26 = vrot.slane %v5584_v8, 2  ;;  %v1014_v45 = vrot.slane %v5611_v23, 2  ;;  %v1019_v23 = vrot.slane %v5637_v46, 2 }
  0x5c   : > { %4955 = vmatmul.mubr.msk.f32.gmra.mxu1 %vm384_vm1, %v5440_v25  ;;  %8255 = vst [vmem:[#allocation39_spill] sm:$0xff] %v5930_v5  ;;  %v1024_v46 = vrot.slane %v5663_v0, 2  ;;  %v1029_v0 = vrot.slane %v5689_v55, 2  ;;  %v1034_v55 = vrot.slane %v5715_v18, 2 }
  0x5d   : > { %4957 = vmatprep.mubr.msk.f32.mxu1 %vm384_vm1, %v5470_v33 }
  0x5e   : > { %4905 = vmatmul.mubr.msk.f32.gmra.mxu0 %vm384_vm1, %v5873_v21 }
  0x5f   : > { %4907 = vmatprep.mubr.msk.f32.mxu0 %vm384_vm1, %v5879_v51 }
  0x60   : > { %4958 = vmatmul.mubr.msk.f32.gmra.mxu1 %vm384_vm1, %v5473_v34 }
  0x61   : > { %4960 = vmatprep.mubr.msk.f32.mxu1 %vm384_vm1, %v5496_v41 }
  0x62   : > { %4908 = vmatmul.mubr.msk.f32.gmra.mxu0 %vm384_vm1, %v5890_v32 }
  0x63   : > { %4910 = vmatprep.mubr.msk.f32.mxu0 %vm384_vm1, %v5896_v35 }
  0x64   : > { %4961 = vmatmul.mubr.msk.f32.gmra.mxu1 %vm384_vm1, %v5499_v42 }
  0x65   : > { %4963 = vmatprep.mubr.msk.f32.mxu1 %vm384_vm1, %v5522_v49  ;;  %v1007_v49 = vrot.slane %v5558_v59, 2 }
  0x66   : > { %4911 = vmatmul.mubr.msk.f32.gmra.mxu0 %vm384_vm1, %v5907_v40 }
  0x67   : > { %4913 = vmatprep.mubr.msk.f32.mxu0 %vm384_vm1, %v5913_v31  ;;  %v5947_v54 = vsel %vm970_vm3, %v1006_v37, %v1007_v49  ;;  %v5958_v7 = vsel %vm970_vm3, %v1007_v49, %v1009_v11  ;;  %v1016_v37 = vrot.slane %v5616_v28, 2 }
  0x68   : > { %4964 = vmatmul.mubr.msk.f32.gmra.mxu1 %vm384_vm1, %v5525_v50  ;;  %8257 = vst [vmem:[#allocation41_spill] sm:$0xff] %v5947_v54  ;;  %8258 = vst [vmem:[#allocation42_spill] sm:$0xff] %v5958_v7 }
  0x69   : > { %4966 = vmatprep.mubr.msk.f32.mxu1 %vm384_vm1, %v5555_v58  ;;  %v1012_v58 = vrot.slane %v5587_v9, 2 }
  0x6a   : > { %4914 = vmatmul.mubr.msk.f32.gmra.mxu0 %vm384_vm1, %v5924_v48 }
  0x6b   : > { %4916 = vmatprep.mubr.msk.f32.mxu0 %vm384_vm1, %v5930_v5  ;;  %v5964_v4 = vsel %vm970_vm3, %v1011_v26, %v1012_v58  ;;  %v5975_v49 = vsel %vm970_vm3, %v1012_v58, %v1014_v45  ;;  %v1021_v26 = vrot.slane %v5642_v47, 2 }
  0x6c   : > { %4967 = vmatmul.mubr.msk.f32.gmra.mxu1 %vm384_vm1, %v5558_v59  ;;  %8259 = vst [vmem:[#allocation43_spill] sm:$0xff] %v5964_v4  ;;  %8260 = vst [vmem:[#allocation44_spill] sm:$0xff] %v5975_v49 }
  0x6d   : > { %4969 = vmatprep.mubr.msk.f32.mxu1 %vm384_vm1, %v5584_v8  ;;  %v1017_v8 = vrot.slane %v5619_v30, 2 }
  0x6e   : > { %4917 = vmatmul.mubr.msk.f32.gmra.mxu0 %vm384_vm1, %v5941_v57 }
  0x6f   : > { %4919 = vmatprep.mubr.msk.f32.mxu0 %vm384_vm1, %v5947_v54  ;;  %v5981_v11 = vsel %vm970_vm3, %v1016_v37, %v1017_v8  ;;  %v5992_v58 = vsel %vm970_vm3, %v1017_v8, %v1019_v23  ;;  %v1026_v37 = vrot.slane %v5668_v2, 2 }
  0x70   : > { %4970 = vmatmul.mubr.msk.f32.gmra.mxu1 %vm384_vm1, %v5587_v9  ;;  %8261 = vst [vmem:[#allocation45_spill] sm:$0xff] %v5981_v11  ;;  %8262 = vst [vmem:[#allocation46_spill] sm:$0xff] %v5992_v58 }
  0x71   : > { %4972 = vmatprep.mubr.msk.f32.mxu1 %vm384_vm1, %v5616_v28  ;;  %v1022_v28 = vrot.slane %v5645_v52, 2 }
  0x72   : > { %4920 = vmatmul.mubr.msk.f32.gmra.mxu0 %vm384_vm1, %v5958_v7 }
  0x73   : > { %4922 = vmatprep.mubr.msk.f32.mxu0 %vm384_vm1, %v5964_v4  ;;  %v5998_v45 = vsel %vm970_vm3, %v1021_v26, %v1022_v28  ;;  %v6009_v8 = vsel %vm970_vm3, %v1022_v28, %v1024_v46  ;;  %v1031_v26 = vrot.slane %v5694_v44, 2 }
  0x74   : > { %4973 = vmatmul.mubr.msk.f32.gmra.mxu1 %vm384_vm1, %v5619_v30  ;;  %8263 = vst [vmem:[#allocation47_spill] sm:$0xff] %v5998_v45  ;;  %8264 = vst [vmem:[#allocation48_spill] sm:$0xff] %v6009_v8 }
  0x75   : > { %4975 = vmatprep.mubr.msk.f32.mxu1 %vm384_vm1, %v5642_v47  ;;  %v1027_v47 = vrot.slane %v5671_v3, 2 }
  0x76   : > { %4923 = vmatmul.mubr.msk.f32.gmra.mxu0 %vm384_vm1, %v5975_v49 }
  0x77   : > { %4925 = vmatprep.mubr.msk.f32.mxu0 %vm384_vm1, %v5981_v11  ;;  %v6015_v23 = vsel %vm970_vm3, %v1026_v37, %v1027_v47  ;;  %v6026_v28 = vsel %vm970_vm3, %v1027_v47, %v1029_v0  ;;  %v1036_v37 = vrot.slane %v5720_v63, 2  ;;  %v1039_v47 = vrot.slane %v5741_v61, 2 }
  0x78   : > { %4976 = vmatmul.mubr.msk.f32.gmra.mxu1 %vm384_vm1, %v5645_v52  ;;  %8265 = vst [vmem:[#allocation49_spill] sm:$0xff] %v6015_v23  ;;  %8266 = vst [vmem:[#allocation50_spill] sm:$0xff] %v6026_v28 }
  0x79   : > { %4978 = vmatprep.mubr.msk.f32.mxu1 %vm384_vm1, %v5668_v2  ;;  %v1032_v2 = vrot.slane %v5697_v56, 2 }
  0x7a   : > { %4926 = vmatmul.mubr.msk.f32.gmra.mxu0 %vm384_vm1, %v5992_v58 }
  0x7b   : > { %4928 = vmatprep.mubr.msk.f32.mxu0 %vm384_vm1, %v5998_v45  ;;  %v6032_v46 = vsel %vm970_vm3, %v1031_v26, %v1032_v2  ;;  %v6043_v18 = vsel %vm970_vm3, %v1032_v2, %v1034_v55  ;;  %v1041_v26 = vrot.slane %v5746_v60, 2  ;;  %v1044_v2 = vrot.slane %v5767_v36, 2 }
  0x7c   : > { %4979 = vmatmul.mubr.msk.f32.gmra.mxu1 %vm384_vm1, %v5671_v3  ;;  %8267 = vst [vmem:[#allocation51_spill] sm:$0xff] %v6032_v46  ;;  %8268 = vst [vmem:[#allocation52_spill] sm:$0xff] %v6043_v18 }
  0x7d   : > { %4981 = vmatprep.mubr.msk.f32.mxu1 %vm384_vm1, %v5694_v44  ;;  %v1037_v44 = vrot.slane %v5723_v19, 2 }
  0x7e   : > { %4929 = vmatmul.mubr.msk.f32.gmra.mxu0 %vm384_vm1, %v6009_v8 }
  0x7f   : > { %4931 = vmatprep.mubr.msk.f32.mxu0 %vm384_vm1, %v6015_v23  ;;  %v6049_v0 = vsel %vm970_vm3, %v1036_v37, %v1037_v44  ;;  %v6060_v61 = vsel %vm970_vm3, %v1037_v44, %v1039_v47  ;;  %v1046_v37 = vrot.slane %v5772_v17, 2  ;;  %v6075_v44 = vld [vmem:[%s5386_s28 + $0x180] sm:$0xff]  ;;  %v1049_v47 = vrot.slane %v5793_v29, 2 }
  0x80   : > { %4982 = vmatmul.mubr.msk.f32.gmra.mxu1 %vm384_vm1, %v5697_v56  ;;  %8269 = vst [vmem:[#allocation53_spill] sm:$0xff] %v6049_v0  ;;  %8270 = vst [vmem:[#allocation54_spill] sm:$0xff] %v6060_v61  ;;  %v6117_v29 = vld [vmem:[%s8133_s1 + $0x20] sm:$0xf] }
  0x81   : > { %4984 = vmatprep.mubr.msk.f32.mxu1 %vm384_vm1, %v5720_v63  ;;  %v1042_v63 = vrot.slane %v5749_v39, 2 }
  0x82   : > { %4932 = vmatmul.mubr.msk.f32.gmra.mxu0 %vm384_vm1, %v6026_v28 }
  0x83   : > { %4934 = vmatprep.mubr.msk.f32.mxu0 %vm384_vm1, %v6032_v46  ;;  %v6066_v55 = vsel %vm970_vm3, %v1041_v26, %v1042_v63  ;;  %v6080_v36 = vsel %vm970_vm3, %v1042_v63, %v1044_v2  ;;  %v8281_v2 = vld [vmem:[#allocation11_spill] sm:$0xff] }
  0x84   : > { %4985 = vmatmul.mubr.msk.f32.gmra.mxu1 %vm384_vm1, %v5723_v19  ;;  %8271 = vst [vmem:[#allocation55_spill] sm:$0xff] %v6066_v55  ;;  %8272 = vst [vmem:[#allocation56_spill] sm:$0xff] %v6080_v36 }
  0x85   : > { %4987 = vmatprep.mubr.msk.f32.mxu1 %vm384_vm1, %v5746_v60  ;;  %v1047_v60 = vrot.slane %v5775_v20, 2 }
  0x86   : > { %4935 = vmatmul.mubr.msk.f32.gmra.mxu0 %vm384_vm1, %v6043_v18 }
  0x87   : > { %4937 = vmatprep.mubr.msk.f32.mxu0 %vm384_vm1, %v6049_v0  ;;  %v6086_v26 = vsel %vm970_vm3, %v1046_v37, %v1047_v60  ;;  %v6098_v63 = vsel %vm970_vm3, %v1047_v60, %v1049_v47  ;;  %v8278_v60 = vld [vmem:[#allocation6_spill] sm:$0xff]  ;;  %v8282_v37 = vld [vmem:[#allocation12_spill] sm:$0xff] }
  0x88   : > { %4988 = vmatmul.mubr.msk.f32.gmra.mxu1 %vm384_vm1, %v5749_v39  ;;  %8273 = vst [vmem:[#allocation57_spill] sm:$0xff] %v6086_v26  ;;  %v8283_v47 = vld [vmem:[#allocation14_spill] sm:$0xff] }
  0x89   : > { %4990 = vmatprep.mubr.msk.f32.mxu1 %vm384_vm1, %v5772_v17  ;;  %v6091_v17 = vld [vmem:[%s5386_s28 + $0x188] sm:$0xff] }
  0x8a   : > { %4938 = vmatmul.mubr.msk.f32.gmra.mxu0 %vm384_vm1, %v6060_v61 }
  0x8b   : > { %4940 = vmatprep.mubr.msk.f32.mxu0 %vm384_vm1, %v6066_v55 }
  0x8c   : > { %4991 = vmatmul.mubr.msk.f32.gmra.mxu1 %vm384_vm1, %v5775_v20 }
  0x8d   : > { %4993 = vmatprep.mubr.msk.f32.mxu1 %vm384_vm1, %v6075_v44 }
  0x8e   : > { %4941 = vmatmul.mubr.msk.f32.gmra.mxu0 %vm384_vm1, %v6080_v36 }
  0x8f   : > { %4943 = vmatprep.mubr.msk.f32.mxu0 %vm384_vm1, %v6086_v26 }
  0x90   : > { %4994 = vmatmul.mubr.msk.f32.gmra.mxu1 %vm384_vm1, %v6091_v17 }
  0x91   : > { %5048 = vmatprep.mubr.msk.f32.mxu1 %vm384_vm1, %v5590_v12  ;;  %v8275_v12 = vld [vmem:[#allocation3_spill] sm:$0xff] }
  0x92   : > { %4944 = vmatmul.mubr.msk.f32.gmra.mxu0 %vm384_vm1, %v6098_v63 }
  0x93   : > { %4998 = vmatprep.mubr.msk.f32.mxu0 %vm384_vm1, %v5433_v22  ;;  %v8274_v22 = vld [vmem:[#allocation2_spill] sm:$0xff] }
  0x94   : > { %5049 = vmatmul.mubr.msk.f32.vlgmr.msra.gmra.mxu1 %vm384_vm1, %v5593_v13  ;;  %v8276_v13 = vld [vmem:[#allocation4_spill] sm:$0xff] }
  0x95   : > { %5051 = vmatprep.mubr.msk.f32.mxu1 %vm384_vm1, %v5860_v53  ;;  %5147 = vmatpush3.msk.msra.mxu1 %vm449_vm0, %v5834_v6  ;;  %v8279_v6 = vld [vmem:[#allocation8_spill] sm:$0xff] }
  0x96   : > { %4999 = vmatmul.mubr.msk.f32.vlgmr.msra.gmra.mxu0 %vm384_vm1, %v5452_v27  ;;  %v8277_v27 = vld [vmem:[#allocation5_spill] sm:$0xff] }
  0x97   : > { %5097 = vmatpush3.msk.msra.mxu0 %vm449_vm0, %v5847_v10  ;;  %5001 = vmatprep.mubr.msk.f32.mxu0 %vm384_vm1, %v8274_v22  ;;  %v8280_v10 = vld [vmem:[#allocation9_spill] sm:$0xff] }
  0x98   : > { %5052 = vmatmul.mubr.msk.f32.gmra.mxu1 %vm384_vm1, %v5873_v21  ;;  %5196 = vmatprep.subr.msk.mxu0 %vm449_vm0, %v6117_v29 }
  0x99   : > { %5054 = vmatprep.mubr.msk.f32.mxu1 %vm384_vm1, %v5879_v51 }
  0x9a   : > { %5002 = vmatmul.mubr.msk.f32.gmra.mxu0 %vm384_vm1, %v8275_v12 }
  0x9b   : > { %5004 = vmatprep.mubr.msk.f32.mxu0 %vm384_vm1, %v8276_v13 }
  0x9c   : > { %5055 = vmatmul.mubr.msk.f32.gmra.mxu1 %vm384_vm1, %v5890_v32 }
  0x9d   : > { %5057 = vmatprep.mubr.msk.f32.mxu1 %vm384_vm1, %v5896_v35 }
  0x9e   : > { %5005 = vmatmul.mubr.msk.f32.gmra.mxu0 %vm384_vm1, %v8277_v27 }
  0x9f   : > { %5007 = vmatprep.mubr.msk.f32.mxu0 %vm384_vm1, %v8278_v60 }
  0xa0   : > { %5058 = vmatmul.mubr.msk.f32.gmra.mxu1 %vm384_vm1, %v5907_v40 }
  0xa1   : > { %5060 = vmatprep.mubr.msk.f32.mxu1 %vm384_vm1, %v5913_v31  ;;  %v8284_v31 = vld [vmem:[#allocation15_spill] sm:$0xff] }
  0xa2   : > { %5008 = vmatmul.mubr.msk.f32.gmra.mxu0 %vm384_vm1, %v8279_v6 }
  0xa3   : > { %5010 = vmatprep.mubr.msk.f32.mxu0 %vm384_vm1, %v8280_v10 }
  0xa4   : > { %5061 = vmatmul.mubr.msk.f32.gmra.mxu1 %vm384_vm1, %v5924_v48  ;;  %v8286_v48 = vld [vmem:[#allocation18_spill] sm:$0xff] }
  0xa5   : > { %5063 = vmatprep.mubr.msk.f32.mxu1 %vm384_vm1, %v5930_v5  ;;  %v8285_v5 = vld [vmem:[#allocation17_spill] sm:$0xff] }
  0xa6   : > { %5011 = vmatmul.mubr.msk.f32.gmra.mxu0 %vm384_vm1, %v8281_v2 }
  0xa7   : > { %5013 = vmatprep.mubr.msk.f32.mxu0 %vm384_vm1, %v8282_v37 }
  0xa8   : > { %5064 = vmatmul.mubr.msk.f32.gmra.mxu1 %vm384_vm1, %v5941_v57  ;;  %v8288_v57 = vld [vmem:[#allocation21_spill] sm:$0xff] }
  0xa9   : > { %5066 = vmatprep.mubr.msk.f32.mxu1 %vm384_vm1, %v5947_v54  ;;  %v8287_v54 = vld [vmem:[#allocation20_spill] sm:$0xff] }
  0xaa   : > { %5014 = vmatmul.mubr.msk.f32.gmra.mxu0 %vm384_vm1, %v8283_v47 }
  0xab   : > { %5016 = vmatprep.mubr.msk.f32.mxu0 %vm384_vm1, %v8284_v31 }
  0xac   : > { %5067 = vmatmul.mubr.msk.f32.gmra.mxu1 %vm384_vm1, %v5958_v7  ;;  %v8290_v7 = vld [vmem:[#allocation24_spill] sm:$0xff] }
  0xad   : > { %5069 = vmatprep.mubr.msk.f32.mxu1 %vm384_vm1, %v5964_v4  ;;  %v8289_v4 = vld [vmem:[#allocation23_spill] sm:$0xff] }
  0xae   : > { %5017 = vmatmul.mubr.msk.f32.gmra.mxu0 %vm384_vm1, %v8285_v5 }
  0xaf   : > { %5019 = vmatprep.mubr.msk.f32.mxu0 %vm384_vm1, %v8286_v48 }
  0xb0   : > { %5070 = vmatmul.mubr.msk.f32.gmra.mxu1 %vm384_vm1, %v5975_v49  ;;  %v8292_v49 = vld [vmem:[#allocation27_spill] sm:$0xff] }
  0xb1   : > { %5072 = vmatprep.mubr.msk.f32.mxu1 %vm384_vm1, %v5981_v11  ;;  %v8291_v11 = vld [vmem:[#allocation26_spill] sm:$0xff] }
  0xb2   : > { %5020 = vmatmul.mubr.msk.f32.gmra.mxu0 %vm384_vm1, %v8287_v54 }
  0xb3   : > { %5022 = vmatprep.mubr.msk.f32.mxu0 %vm384_vm1, %v8288_v57 }
  0xb4   : > { %5073 = vmatmul.mubr.msk.f32.gmra.mxu1 %vm384_vm1, %v5992_v58  ;;  %v1918_v58 = vrot.slane %v6091_v17, 2 }
  0xb5   : > { %5075 = vmatprep.mubr.msk.f32.mxu1 %vm384_vm1, %v5998_v45  ;;  %v8293_v45 = vld [vmem:[#allocation29_spill] sm:$0xff] }
  0xb6   : > { %5023 = vmatmul.mubr.msk.f32.gmra.mxu0 %vm384_vm1, %v8289_v4 }
  0xb7   : > { %5025 = vmatprep.mubr.msk.f32.mxu0 %vm384_vm1, %v8290_v7 }
  0xb8   : > { %5076 = vmatmul.mubr.msk.f32.gmra.mxu1 %vm384_vm1, %v6009_v8  ;;  %v8294_v8 = vld [vmem:[#allocation30_spill] sm:$0xff] }
  0xb9   : > { %5078 = vmatprep.mubr.msk.f32.mxu1 %vm384_vm1, %v6015_v23  ;;  %v8295_v23 = vld [vmem:[#allocation32_spill] sm:$0xff] }
  0xba   : > { %5026 = vmatmul.mubr.msk.f32.gmra.mxu0 %vm384_vm1, %v8291_v11 }
  0xbb   : > { %5028 = vmatprep.mubr.msk.f32.mxu0 %vm384_vm1, %v8292_v49 }
  0xbc   : > { %5079 = vmatmul.mubr.msk.f32.gmra.mxu1 %vm384_vm1, %v6026_v28  ;;  %v8296_v28 = vld [vmem:[#allocation33_spill] sm:$0xff] }
  0xbd   : > { %5081 = vmatprep.mubr.msk.f32.mxu1 %vm384_vm1, %v6032_v46  ;;  %v1917_v46 = vrot.slane %v6075_v44, 2 }
  0xbe   : > { %5029 = vmatmul.mubr.msk.f32.gmra.mxu0 %vm384_vm1, %v8293_v45 }
  0xbf   : > { %5031 = vmatprep.mubr.msk.f32.mxu0 %vm384_vm1, %v8294_v8  ;;  %v6235_v40 = vsel %vm970_vm3, %v1917_v46, %v1918_v58 }
  0xc0   : > { %5082 = vmatmul.mubr.msk.f32.gmra.mxu1 %vm384_vm1, %v6043_v18  ;;  %v1647_v18 = vrot.slane %v6091_v17, 1 }
  0xc1   : > { %5084 = vmatprep.mubr.msk.f32.mxu1 %vm384_vm1, %v6049_v0  ;;  %v1646_v0 = vrot.slane %v6075_v44, 1 }
  0xc2   : > { %5032 = vmatmul.mubr.msk.f32.gmra.mxu0 %vm384_vm1, %v8295_v23 }
  0xc3   : > { %5034 = vmatprep.mubr.msk.f32.mxu0 %vm384_vm1, %v8296_v28 }
  0xc4   : > { %5085 = vmatmul.mubr.msk.f32.gmra.mxu1 %vm384_vm1, %v6060_v61  ;;  %v248_v61 = vld [vmem:[%s5386_s28 + $0x190] sm:$0x3] }
  0xc5   : > { %5087 = vmatprep.mubr.msk.f32.mxu1 %vm384_vm1, %v6066_v55  ;;  %v1920_v55 = vrot.slane %v248_v61, 2  ;;  %v1649_v35 = vrot.slane %v248_v61, 1 }
  0xc6   : > { %5035 = vmatmul.mubr.msk.f32.gmra.mxu0 %vm384_vm1, %v5782_v1 }
  0xc7   : > { %5037 = vmatprep.mubr.msk.f32.mxu0 %vm384_vm1, %v5788_v43  ;;  %v6254_v46 = vsel %vm301_vm2, %v1647_v18, %v1649_v35 }
  0xc8   : > { %5088 = vmatmul.mubr.msk.f32.gmra.mxu1 %vm384_vm1, %v6080_v36  ;;  %v6242_v36 = vsel %vm301_vm2, %v1646_v0, %v1647_v18 }
  0xc9   : > { %5090 = vmatprep.mubr.msk.f32.mxu1 %vm384_vm1, %v6086_v26  ;;  %v6247_v26 = vsel %vm970_vm3, %v1918_v58, %v1920_v55 }
  0xca   : > { %5038 = vmatmul.mubr.msk.f32.gmra.mxu0 %vm384_vm1, %v5802_v38 }
  0xcb   : > { %5040 = vmatprep.mubr.msk.f32.mxu0 %vm384_vm1, %v5808_v62 }
  0xcc   : > { %5091 = vmatmul.mubr.msk.f32.gmra.mxu1 %vm384_vm1, %v6098_v63 }
  0xcd   : > { %5093 = vmatprep.mubr.msk.f32.mxu1 %vm384_vm1, %v6235_v40 }
  0xce   : > { %5041 = vmatmul.mubr.msk.f32.gmra.mxu0 %vm384_vm1, %v5820_v14 }
  0xcf   : > { %5043 = vmatprep.mubr.msk.f32.mxu0 %vm384_vm1, %v6242_v36 }
  0xd0   : > { %5094 = vmatmul.mubr.msk.f32.gmra.mxu1 %vm384_vm1, %v6247_v26 }
  0xd1   : > { %5148 = vmatprep.mubr.msk.f32.mxu1 %vm384_vm1, %v8274_v22 }
  0xd2   : > { %5044 = vmatmul.mubr.msk.f32.gmra.mxu0 %vm384_vm1, %v6254_v46 }
  0xd3   : > { %5098 = vmatprep.mubr.msk.f32.mxu0 %vm384_vm1, %v5416_v15  ;;  %v4850_v58 = vpop.f32.mrf.mxu1 }
  0xd4   : > { %5149 = vmatmul.mubr.msk.f32.vlgmr.msra.gmra.mxu1 %vm384_vm1, %v8275_v12 }
  0xd5   : > { %v811_v0 = vpop.f32.mrf.mxu1  ;;  %5151 = vmatprep.mubr.msk.f32.mxu1 %vm384_vm1, %v8276_v13 }
  0xd6   : > { %v4800_v35 = vpop.f32.mrf.mxu0  ;;  %5099 = vmatmul.mubr.msk.f32.vlgmr.msra.gmra.mxu0 %vm384_vm1, %v5419_v16 }
  0xd7   : > { %v6270_v18 = vadd.f32 %v4850_v58, %v4800_v35  ;;  %5197 = vmatpush3.msk.msra.mxu0 %vm449_vm0, %v6117_v29  ;;  %5101 = vmatprep.mubr.msk.f32.mxu0 %vm384_vm1, %v5437_v24  ;;  %v8297_v35 = vld [vmem:[#allocation7_spill] sm:$0xff] }
  0xd8   : > { %v519_v15 = vpop.f32.mrf.mxu0  ;;  %v4853_v61 = vpop.f32.mrf.mxu1  ;;  %5152 = vmatmul.mubr.msk.f32.gmra.mxu1 %vm384_vm1, %v8277_v27 }
  0xd9   : > { %v6278_v55 = vadd.f32 %v811_v0, %v519_v15  ;;  %5154 = vmatprep.mubr.msk.f32.mxu1 %vm384_vm1, %v8278_v60 }
  0xda   : > { %v4803_v22 = vpop.f32.mrf.mxu0  ;;  %5102 = vmatmul.mubr.msk.f32.gmra.mxu0 %vm384_vm1, %v5440_v25  ;;  %v821_v16 = vpop.f32.mrf.mxu1 }
  0xdb   : > { %v6284_v12 = vadd.f32 %v4853_v61, %v4803_v22  ;;  %5104 = vmatprep.mubr.msk.f32.mxu0 %vm384_vm1, %v5470_v33  ;;  %v8298_v22 = vld [vmem:[#allocation10_spill] sm:$0xff] }
  0xdc   : > { %v529_v24 = vpop.f32.mrf.mxu0  ;;  %v4856_v29 = vpop.f32.mrf.mxu1  ;;  %5155 = vmatmul.mubr.msk.f32.gmra.mxu1 %vm384_vm1, %v8279_v6 }
  0xdd   : > { %v6290_v13 = vadd.f32 %v821_v16, %v529_v24  ;;  %5157 = vmatprep.mubr.msk.f32.mxu1 %vm384_vm1, %v8280_v10 }
  0xde   : > { %v4806_v27 = vpop.f32.mrf.mxu0  ;;  %5105 = vmatmul.mubr.msk.f32.gmra.mxu0 %vm384_vm1, %v5473_v34  ;;  %v831_v25 = vpop.f32.mrf.mxu1 }
  0xdf   : > { %v6296_v60 = vadd.f32 %v4856_v29, %v4806_v27  ;;  %5107 = vmatprep.mubr.msk.f32.mxu0 %vm384_vm1, %v5496_v41  ;;  %v8299_v27 = vld [vmem:[#allocation13_spill] sm:$0xff] }
  0xe0   : > { %v539_v33 = vpop.f32.mrf.mxu0  ;;  %v4859_v58 = vpop.f32.mrf.mxu1  ;;  %5158 = vmatmul.mubr.msk.f32.gmra.mxu1 %vm384_vm1, %v8281_v2 }
  0xe1   : > { %v6302_v6 = vadd.f32 %v831_v25, %v539_v33  ;;  %5160 = vmatprep.mubr.msk.f32.mxu1 %vm384_vm1, %v8282_v37 }
  0xe2   : > { %v4809_v10 = vpop.f32.mrf.mxu0  ;;  %5108 = vmatmul.mubr.msk.f32.gmra.mxu0 %vm384_vm1, %v5499_v42  ;;  %v841_v34 = vpop.f32.mrf.mxu1 }
  0xe3   : > { %v6308_v0 = vadd.f32 %v4859_v58, %v4809_v10  ;;  %5110 = vmatprep.mubr.msk.f32.mxu0 %vm384_vm1, %v8297_v35  ;;  %v8300_v10 = vld [vmem:[#allocation16_spill] sm:$0xff] }
  0xe4   : > { %v549_v41 = vpop.f32.mrf.mxu0  ;;  %v4862_v15 = vpop.f32.mrf.mxu1  ;;  %5161 = vmatmul.mubr.msk.f32.gmra.mxu1 %vm384_vm1, %v8283_v47 }
  0xe5   : > { %v6314_v2 = vadd.f32 %v841_v34, %v549_v41  ;;  %5163 = vmatprep.mubr.msk.f32.mxu1 %vm384_vm1, %v8284_v31 }
  0xe6   : > { %v4812_v37 = vpop.f32.mrf.mxu0  ;;  %5111 = vmatmul.mubr.msk.f32.gmra.mxu0 %vm384_vm1, %v5525_v50  ;;  %v851_v42 = vpop.f32.mrf.mxu1 }
  0xe7   : > { %v6320_v61 = vadd.f32 %v4862_v15, %v4812_v37  ;;  %5113 = vmatprep.mubr.msk.f32.mxu0 %vm384_vm1, %v8298_v22  ;;  %v8301_v15 = vld [vmem:[#allocation19_spill] sm:$0xff] }
  0xe8   : > { %v559_v16 = vpop.f32.mrf.mxu0  ;;  %v4865_v24 = vpop.f32.mrf.mxu1  ;;  %5164 = vmatmul.mubr.msk.f32.gmra.mxu1 %vm384_vm1, %v8285_v5 }
  0xe9   : > { %v6326_v47 = vadd.f32 %v851_v42, %v559_v16  ;;  %5166 = vmatprep.mubr.msk.f32.mxu1 %vm384_vm1, %v8286_v48  ;;  %v8303_v16 = vld [vmem:[#allocation22_spill] sm:$0xff] }
  0xea   : > { %v4815_v31 = vpop.f32.mrf.mxu0  ;;  %5114 = vmatmul.mubr.msk.f32.gmra.mxu0 %vm384_vm1, %v5558_v59  ;;  %v861_v50 = vpop.f32.mrf.mxu1 }
  0xeb   : > { %v6332_v29 = vadd.f32 %v4865_v24, %v4815_v31  ;;  %5116 = vmatprep.mubr.msk.f32.mxu0 %vm384_vm1, %v8299_v27 }
  0xec   : > { %v569_v25 = vpop.f32.mrf.mxu0  ;;  %v4868_v33 = vpop.f32.mrf.mxu1  ;;  %5167 = vmatmul.mubr.msk.f32.gmra.mxu1 %vm384_vm1, %v8287_v54 }
  0xed   : > { %v6338_v5 = vadd.f32 %v861_v50, %v569_v25  ;;  %5169 = vmatprep.mubr.msk.f32.mxu1 %vm384_vm1, %v8288_v57  ;;  %v8306_v50 = vld [vmem:[#allocation25_spill] sm:$0xff] }
  0xee   : > { %v4818_v48 = vpop.f32.mrf.mxu0  ;;  %5117 = vmatmul.mubr.msk.f32.gmra.mxu0 %vm384_vm1, %v5587_v9  ;;  %v871_v59 = vpop.f32.mrf.mxu1 }
  0xef   : > { %v6344_v58 = vadd.f32 %v4868_v33, %v4818_v48  ;;  %5119 = vmatprep.mubr.msk.f32.mxu0 %vm384_vm1, %v8300_v10  ;;  %v8308_v33 = vld [vmem:[#allocation28_spill] sm:$0xff]  ;;  %v8310_v10 = vld [vmem:[#allocation31_spill] sm:$0xff] }
  0xf0   : > { %v579_v34 = vpop.f32.mrf.mxu0  ;;  %v4871_v35 = vpop.f32.mrf.mxu1  ;;  %5170 = vmatmul.mubr.msk.f32.gmra.mxu1 %vm384_vm1, %v8289_v4 }
  0xf1   : > { %v6350_v54 = vadd.f32 %v871_v59, %v579_v34  ;;  %5172 = vmatprep.mubr.msk.f32.mxu1 %vm384_vm1, %v8290_v7  ;;  %v6417_v34 = vld [vmem:[%s5386_s28 + $0x198] sm:$0xff] }
  0xf2   : > { %v4821_v57 = vpop.f32.mrf.mxu0  ;;  %5120 = vmatmul.mubr.msk.f32.gmra.mxu0 %vm384_vm1, %v5619_v30  ;;  %v881_v9 = vpop.f32.mrf.mxu1 }
  0xf3   : > { %v6356_v41 = vadd.f32 %v4871_v35, %v4821_v57  ;;  %5122 = vmatprep.mubr.msk.f32.mxu0 %vm384_vm1, %v8301_v15  ;;  %v6420_v35 = vld [vmem:[%s5386_s28 + $0x1a0] sm:$0xff] }
  0xf4   : > { %v589_v37 = vpop.f32.mrf.mxu0  ;;  %v4874_v42 = vpop.f32.mrf.mxu1  ;;  %5173 = vmatmul.mubr.msk.f32.gmra.mxu1 %vm384_vm1, %v8291_v11  ;;  %v2458_v15 = vrot.slane %v6420_v35, 1 }
  0xf5   : > { %v6362_v4 = vadd.f32 %v881_v9, %v589_v37  ;;  %5175 = vmatprep.mubr.msk.f32.mxu1 %vm384_vm1, %v8292_v49  ;;  %v2457_v9 = vrot.slane %v6417_v34, 1  ;;  %v6435_v37 = vld [vmem:[%s5386_s28 + $0x1a8] sm:$0x3]  ;;  %s7819_s28 = scalar_lea.vmem %s8136_s4, %s4498_s21 }
  0xf6   : > { %v4824_v7 = vpop.f32.mrf.mxu0  ;;  %5123 = vmatmul.mubr.msk.f32.gmra.mxu0 %vm384_vm1, %v5645_v52  ;;  %v6368_v30 = vpop.f32.mrf.mxu1 }
  0xf7   : > { %8302 = vst [vmem:[#allocation2_spill] sm:$0xff] %v6368_v30  ;;  %v6370_v22 = vadd.f32 %v4874_v42, %v4824_v7  ;;  %5125 = vmatprep.mubr.msk.f32.mxu0 %vm384_vm1, %v8303_v16  ;;  %v8312_v7 = vld [vmem:[#allocation34_spill] sm:$0xff]  ;;  %v8329_v30 = vld [vmem:[#allocation45_spill] sm:$0xff] }
  0xf8   : > { %v6374_v24 = vpop.f32.mrf.mxu0  ;;  %v4877_v31 = vpop.f32.mrf.mxu1  ;;  %5176 = vmatmul.mubr.msk.f32.gmra.mxu1 %vm384_vm1, %v8293_v45 }
  0xf9   : > { %8304 = vst [vmem:[#allocation3_spill] sm:$0xff] %v6374_v24  ;;  %5178 = vmatprep.mubr.msk.f32.mxu1 %vm384_vm1, %v8294_v8  ;;  %v8331_v24 = vld [vmem:[#allocation47_spill] sm:$0xff] }
  0xfa   : > { %v4827_v49 = vpop.f32.mrf.mxu0  ;;  %5126 = vmatmul.mubr.msk.f32.gmra.mxu0 %vm384_vm1, %v5671_v3  ;;  %v6382_v52 = vpop.f32.mrf.mxu1 }
  0xfb   : > { %8305 = vst [vmem:[#allocation4_spill] sm:$0xff] %v6382_v52  ;;  %v6384_v11 = vadd.f32 %v4877_v31, %v4827_v49  ;;  %5128 = vmatprep.mubr.msk.f32.mxu0 %vm384_vm1, %v8306_v50  ;;  %v2459_v49 = vsel %vm301_vm2, %v2457_v9, %v2458_v15  ;;  %v8334_v52 = vld [vmem:[#allocation49_spill] sm:$0xff] }
  0xfc   : > { %v6388_v27 = vpop.f32.mrf.mxu0  ;;  %v4880_v25 = vpop.f32.mrf.mxu1  ;;  %5179 = vmatmul.mubr.msk.f32.gmra.mxu1 %vm384_vm1, %v8295_v23 }
  0xfd   : > { %8307 = vst [vmem:[#allocation5_spill] sm:$0xff] %v6388_v27  ;;  %5181 = vmatprep.mubr.msk.f32.mxu1 %vm384_vm1, %v8296_v28  ;;  %v8348_v27 = vld [vmem:[#allocation56_spill] sm:$0xff] }
  0xfe   : > { %v4830_v45 = vpop.f32.mrf.mxu0  ;;  %5129 = vmatmul.mubr.msk.f32.gmra.mxu0 %vm384_vm1, %v5697_v56  ;;  %v6396_v3 = vpop.f32.mrf.mxu1 }
  0xff   : > { %v6398_v8 = vadd.f32 %v4880_v25, %v4830_v45  ;;  %5131 = vmatprep.mubr.msk.f32.mxu0 %vm384_vm1, %v8308_v33 }
 0x100   : > { %v6402_v48 = vpop.f32.mrf.mxu0  ;;  %v4883_v59 = vpop.f32.mrf.mxu1  ;;  %5182 = vmatmul.mubr.msk.f32.gmra.mxu1 %vm384_vm1, %v5782_v1 }
 0x101   : > { %5184 = vmatprep.mubr.msk.f32.mxu1 %vm384_vm1, %v5788_v43 }
 0x102   : > { %v4833_v23 = vpop.f32.mrf.mxu0  ;;  %5132 = vmatmul.mubr.msk.f32.gmra.mxu0 %vm384_vm1, %v5723_v19  ;;  %v6410_v56 = vpop.f32.mrf.mxu1 }
 0x103   : > { %8309 = vst [vmem:[#allocation6_spill] sm:$0xff] %v6410_v56  ;;  %v6412_v28 = vadd.f32 %v4883_v59, %v4833_v23  ;;  %5134 = vmatprep.mubr.msk.f32.mxu0 %vm384_vm1, %v8310_v10 }
 0x104   : > { %v6422_v1 = vpop.f32.mrf.mxu0  ;;  %v4886_v57 = vpop.f32.mrf.mxu1  ;;  %5185 = vmatmul.mubr.msk.f32.gmra.mxu1 %vm384_vm1, %v5802_v38 }
 0x105   : > { %8311 = vst [vmem:[#allocation8_spill] sm:$0xff] %v6422_v1  ;;  %5187 = vmatprep.mubr.msk.f32.mxu1 %vm384_vm1, %v5808_v62 }
 0x106   : > { %v4836_v43 = vpop.f32.mrf.mxu0  ;;  %5135 = vmatmul.mubr.msk.f32.gmra.mxu0 %vm384_vm1, %v5749_v39  ;;  %v6430_v19 = vpop.f32.mrf.mxu1  ;;  %v2460_v39 = vrot.slane %v6435_v37, 1 }
 0x107   : > { %v6437_v42 = vadd.f32 %v4886_v57, %v4836_v43  ;;  %5137 = vmatprep.mubr.msk.f32.mxu0 %vm384_vm1, %v8312_v7 }
 0x108   : > { %v6441_v38 = vpop.f32.mrf.mxu0  ;;  %v4889_v62 = vpop.f32.mrf.mxu1  ;;  %5188 = vmatmul.mubr.msk.f32.gmra.mxu1 %vm384_vm1, %v5820_v14 }
 0x109   : > { %5190 = vmatprep.mubr.msk.f32.mxu1 %vm384_vm1, %v6242_v36  ;;  %v2461_v36 = vsel %vm301_vm2, %v2458_v15, %v2460_v39 }
 0x10a   : > { %v4839_v16 = vpop.f32.mrf.mxu0  ;;  %5138 = vmatmul.mubr.msk.f32.gmra.mxu0 %vm384_vm1, %v5775_v20  ;;  %v6450_v31 = vpop.f32.mrf.mxu1 }
 0x10b   : > { %8313 = vst [vmem:[#allocation9_spill] sm:$0xff] %v6450_v31  ;;  %v6453_v50 = vadd.f32 %v4889_v62, %v4839_v16  ;;  %5140 = vmatprep.mubr.msk.f32.mxu0 %vm384_vm1, %v6075_v44 }
 0x10c   : > { %v6457_v25 = vpop.f32.mrf.mxu0  ;;  %v4892_v14 = vpop.f32.mrf.mxu1  ;;  %5191 = vmatmul.mubr.msk.f32.gmra.mxu1 %vm384_vm1, %v6254_v46 }
 0x10d   : > { %8314 = vst [vmem:[#allocation11_spill] sm:$0xff] %v6457_v25  ;;  %5193 = vmatprep.mubr.msk.f32.mxu1 %vm384_vm1, %v2459_v49 }
 0x10e   : > { %v4842_v20 = vpop.f32.mrf.mxu0  ;;  %5141 = vmatmul.mubr.msk.f32.gmra.mxu0 %vm384_vm1, %v6091_v17  ;;  %v6465_v45 = vpop.f32.mrf.mxu1 }
 0x10f   : > { %v6467_v33 = vadd.f32 %v4892_v14, %v4842_v20  ;;  %5143 = vmatprep.mubr.msk.f32.mxu0 %vm384_vm1, %v6417_v34  ;;  %v8319_v14 = vld [vmem:[#allocation35_spill] sm:$0xff] }
 0x110   : > { %v6471_v44 = vpop.f32.mrf.mxu0  ;;  %v4895_v59 = vpop.f32.mrf.mxu1  ;;  %5194 = vmatmul.mubr.msk.f32.gmra.mxu1 %vm384_vm1, %v2461_v36 }
 0x112   : > { %v4845_v46 = vpop.f32.mrf.mxu0  ;;  %5144 = vmatmul.mubr.msk.f32.gmra.mxu0 %vm384_vm1, %v6420_v35  ;;  %v6476_v23 = vpop.f32.mrf.mxu1 }
 0x113   : > { %8315 = vst [vmem:[#allocation12_spill] sm:$0xff] %v6476_v23  ;;  %v6478_v10 = vadd.f32 %v4895_v59, %v4845_v46  ;;  %5198 = vmatprep.mubr.msk.f32.mxu0 %vm384_vm1, %v5860_v53  ;;  %v8320_v59 = vld [vmem:[#allocation36_spill] sm:$0xff] }
 0x114   : > { %v6482_v17 = vpop.f32.mrf.mxu0  ;;  %v4950_v57 = vpop.f32.mrf.mxu1 }
 0x115   : > { %8316 = vst [vmem:[#allocation14_spill] sm:$0xff] %v6482_v17 }
 0x116   : > { %v4900_v43 = vpop.f32.mrf.mxu0  ;;  %5199 = vmatmul.mubr.msk.f32.vlgmr.msra.gmra.mxu0 %vm384_vm1, %v5873_v21  ;;  %v6486_v9 = vpop.f32.mrf.mxu1 }
 0x117   : > { %8317 = vst [vmem:[#allocation15_spill] sm:$0xff] %v6486_v9  ;;  %v1346_v15 = vadd.f32 %v4900_v43, %v6270_v18  ;;  %5201 = vmatprep.mubr.msk.f32.mxu0 %vm384_vm1, %v5879_v51 }
 0x118   : > { %v1186_v7 = vpop.f32.mrf.mxu0  ;;  %v4953_v62 = vpop.f32.mrf.mxu1 }
 0x119   : > { %v6492_v39 = vadd.f32 %v1186_v7, %v6278_v55  ;;  %v6494_v53 = vadd.f32 %v4950_v57, %v1346_v15  ;;  %v8321_v57 = vld [vmem:[#allocation37_spill] sm:$0xff] }
 0x11a   : > { %v4903_v16 = vpop.f32.mrf.mxu0  ;;  %5202 = vmatmul.mubr.msk.f32.gmra.mxu0 %vm384_vm1, %v5890_v32  ;;  %v6498_v49 = vpop.f32.mrf.mxu1 }
 0x11b   : > { %8318 = vst [vmem:[#allocation17_spill] sm:$0xff] %v6492_v39  ;;  %v1348_v21 = vadd.f32 %v4903_v16, %v6284_v12  ;;  %5204 = vmatprep.mubr.msk.f32.mxu0 %vm384_vm1, %v8319_v14  ;;  %v8323_v14 = vld [vmem:[#allocation39_spill] sm:$0xff] }
 0x11c   : > { %v1196_v18 = vpop.f32.mrf.mxu0  ;;  %v4956_v51 = vpop.f32.mrf.mxu1 }
 0x11d   : > { %v6504_v36 = vadd.f32 %v1196_v18, %v6290_v13  ;;  %v6506_v55 = vadd.f32 %v4953_v62, %v1348_v21  ;;  %v8322_v62 = vld [vmem:[#allocation38_spill] sm:$0xff] }
 0x11e   : > { %v4906_v20 = vpop.f32.mrf.mxu0  ;;  %5205 = vmatmul.mubr.msk.f32.gmra.mxu0 %vm384_vm1, %v8320_v59  ;;  %v6510_v46 = vpop.f32.mrf.mxu1  ;;  %v8324_v59 = vld [vmem:[#allocation40_spill] sm:$0xff] }
 0x11f   : > { %v1350_v32 = vadd.f32 %v4906_v20, %v6296_v60  ;;  %5207 = vmatprep.mubr.msk.f32.mxu0 %vm384_vm1, %v8321_v57 }
 0x120   : > { %v1206_v12 = vpop.f32.mrf.mxu0  ;;  %v4959_v43 = vpop.f32.mrf.mxu1 }
 0x121   : > { %v6516_v15 = vadd.f32 %v1206_v12, %v6302_v6  ;;  %v6518_v13 = vadd.f32 %v4956_v51, %v1350_v32  ;;  %v8325_v12 = vld [vmem:[#allocation41_spill] sm:$0xff] }
 0x122   : > { %v4909_v7 = vpop.f32.mrf.mxu0  ;;  %5208 = vmatmul.mubr.msk.f32.gmra.mxu0 %vm384_vm1, %v8322_v62  ;;  %v6522_v16 = vpop.f32.mrf.mxu1 }
 0x123   : > { %v1352_v21 = vadd.f32 %v4909_v7, %v6308_v0  ;;  %5210 = vmatprep.mubr.msk.f32.mxu0 %vm384_vm1, %v8323_v14 }
 0x124   : > { %v1216_v60 = vpop.f32.mrf.mxu0  ;;  %v4962_v18 = vpop.f32.mrf.mxu1 }
 0x125   : > { %v6528_v20 = vadd.f32 %v1216_v60, %v6314_v2  ;;  %v6530_v6 = vadd.f32 %v4959_v43, %v1352_v21  ;;  %v8326_v21 = vld [vmem:[#allocation42_spill] sm:$0xff] }
 0x126   : > { %v4912_v51 = vpop.f32.mrf.mxu0  ;;  %5211 = vmatmul.mubr.msk.f32.gmra.mxu0 %vm384_vm1, %v8324_v59  ;;  %v6534_v32 = vpop.f32.mrf.mxu1  ;;  %v8327_v59 = vld [vmem:[#allocation43_spill] sm:$0xff] }
 0x127   : > { %v1354_v57 = vadd.f32 %v4912_v51, %v6320_v61  ;;  %5213 = vmatprep.mubr.msk.f32.mxu0 %vm384_vm1, %v8325_v12 }
 0x128   : > { %v1226_v0 = vpop.f32.mrf.mxu0  ;;  %v4965_v7 = vpop.f32.mrf.mxu1 }
 0x129   : > { %v6540_v62 = vadd.f32 %v1226_v0, %v6326_v47  ;;  %v6542_v2 = vadd.f32 %v4962_v18, %v1354_v57  ;;  %v8328_v57 = vld [vmem:[#allocation44_spill] sm:$0xff] }
 0x12a   : > { %v4915_v43 = vpop.f32.mrf.mxu0  ;;  %5214 = vmatmul.mubr.msk.f32.gmra.mxu0 %vm384_vm1, %v8326_v21  ;;  %v6546_v14 = vpop.f32.mrf.mxu1 }
 0x12b   : > { %v1356_v60 = vadd.f32 %v4915_v43, %v6332_v29  ;;  %5216 = vmatprep.mubr.msk.f32.mxu0 %vm384_vm1, %v8327_v59 }
 0x12c   : > { %v1236_v61 = vpop.f32.mrf.mxu0  ;;  %v4968_v51 = vpop.f32.mrf.mxu1 }
 0x12d   : > { %v6552_v12 = vadd.f32 %v1236_v61, %v6338_v5  ;;  %v6554_v47 = vadd.f32 %v4965_v7, %v1356_v60  ;;  %v8330_v60 = vld [vmem:[#allocation46_spill] sm:$0xff] }
 0x12e   : > { %v4918_v18 = vpop.f32.mrf.mxu0  ;;  %5217 = vmatmul.mubr.msk.f32.gmra.mxu0 %vm384_vm1, %v8328_v57  ;;  %v6558_v0 = vpop.f32.mrf.mxu1 }
 0x12f   : > { %v1358_v21 = vadd.f32 %v4918_v18, %v6344_v58  ;;  %5219 = vmatprep.mubr.msk.f32.mxu0 %vm384_vm1, %v8329_v30 }
 0x130   : > { %v1246_v29 = vpop.f32.mrf.mxu0  ;;  %v4971_v43 = vpop.f32.mrf.mxu1 }
 0x131   : > { %v6564_v59 = vadd.f32 %v1246_v29, %v6350_v54  ;;  %v6566_v5 = vadd.f32 %v4968_v51, %v1358_v21  ;;  %v8332_v21 = vld [vmem:[#allocation48_spill] sm:$0xff] }
 0x132   : > { %v4921_v7 = vpop.f32.mrf.mxu0  ;;  %5220 = vmatmul.mubr.msk.f32.gmra.mxu0 %vm384_vm1, %v8330_v60  ;;  %v6570_v61 = vpop.f32.mrf.mxu1 }
 0x133   : > { %v1360_v57 = vadd.f32 %v4921_v7, %v6356_v41  ;;  %5222 = vmatprep.mubr.msk.f32.mxu0 %vm384_vm1, %v8331_v24 }
 0x134   : > { %v1256_v58 = vpop.f32.mrf.mxu0  ;;  %v4974_v30 = vpop.f32.mrf.mxu1 }
 0x135   : > { %v6576_v18 = vadd.f32 %v1256_v58, %v6362_v4  ;;  %v6578_v54 = vadd.f32 %v4971_v43, %v1360_v57  ;;  %v8336_v58 = vld [vmem:[#allocation50_spill] sm:$0xff] }
 0x136   : > { %v4924_v51 = vpop.f32.mrf.mxu0  ;;  %5223 = vmatmul.mubr.msk.f32.gmra.mxu0 %vm384_vm1, %v8332_v21  ;;  %v6582_v29 = vpop.f32.mrf.mxu1  ;;  %v8338_v21 = vld [vmem:[#allocation51_spill] sm:$0xff] }
 0x137   : > { %8333 = vst [vmem:[#allocation18_spill] sm:$0xff] %v6582_v29  ;;  %v1362_v60 = vadd.f32 %v4924_v51, %v6370_v22  ;;  %5225 = vmatprep.mubr.msk.f32.mxu0 %vm384_vm1, %v8334_v52 }
 0x138   : > { %v6587_v41 = vpop.f32.mrf.mxu0  ;;  %v4977_v24 = vpop.f32.mrf.mxu1 }
 0x139   : > { %8335 = vst [vmem:[#allocation20_spill] sm:$0xff] %v6587_v41  ;;  %v6589_v7 = vadd.f32 %v4974_v30, %v1362_v60  ;;  %v8340_v41 = vld [vmem:[#allocation52_spill] sm:$0xff] }
 0x13a   : > { %v4927_v4 = vpop.f32.mrf.mxu0  ;;  %5226 = vmatmul.mubr.msk.f32.gmra.mxu0 %vm384_vm1, %v8336_v58  ;;  %v6593_v43 = vpop.f32.mrf.mxu1  ;;  %v8342_v58 = vld [vmem:[#allocation53_spill] sm:$0xff] }
 0x13b   : > { %8337 = vst [vmem:[#allocation21_spill] sm:$0xff] %v6593_v43  ;;  %v1364_v57 = vadd.f32 %v4927_v4, %v6384_v11  ;;  %5228 = vmatprep.mubr.msk.f32.mxu0 %vm384_vm1, %v8338_v21 }
 0x13c   : > { %v6598_v22 = vpop.f32.mrf.mxu0  ;;  %v4980_v51 = vpop.f32.mrf.mxu1 }
 0x13d   : > { %8339 = vst [vmem:[#allocation23_spill] sm:$0xff] %v6598_v22  ;;  %v6600_v52 = vadd.f32 %v4977_v24, %v1364_v57  ;;  %v8344_v22 = vld [vmem:[#allocation54_spill] sm:$0xff]  ;;  %v8346_v57 = vld [vmem:[#allocation55_spill] sm:$0xff] }
 0x13e   : > { %v4930_v29 = vpop.f32.mrf.mxu0  ;;  %5229 = vmatmul.mubr.msk.f32.gmra.mxu0 %vm384_vm1, %v8340_v41  ;;  %v6604_v30 = vpop.f32.mrf.mxu1 }
 0x13f   : > { %8341 = vst [vmem:[#allocation24_spill] sm:$0xff] %v6604_v30  ;;  %v1366_v60 = vadd.f32 %v4930_v29, %v6398_v8  ;;  %5231 = vmatprep.mubr.msk.f32.mxu0 %vm384_vm1, %v8342_v58 }
 0x140   : > { %v6609_v11 = vpop.f32.mrf.mxu0  ;;  %v4983_v4 = vpop.f32.mrf.mxu1 }
 0x141   : > { %8343 = vst [vmem:[#allocation26_spill] sm:$0xff] %v6609_v11  ;;  %v6611_v21 = vadd.f32 %v4980_v51, %v1366_v60  ;;  %v8350_v60 = vld [vmem:[#allocation57_spill] sm:$0xff] }
 0x142   : > { %v4933_v43 = vpop.f32.mrf.mxu0  ;;  %5232 = vmatmul.mubr.msk.f32.gmra.mxu0 %vm384_vm1, %v8344_v22  ;;  %v6615_v24 = vpop.f32.mrf.mxu1 }
 0x143   : > { %8345 = vst [vmem:[#allocation27_spill] sm:$0xff] %v6615_v24  ;;  %v1368_v41 = vadd.f32 %v4933_v43, %v6412_v28  ;;  %5234 = vmatprep.mubr.msk.f32.mxu0 %vm384_vm1, %v8346_v57  ;;  %v2728_v28 = vrot.slane %v6417_v34, 2  ;;  %v2729_v24 = vrot.slane %v6420_v35, 2  ;;  %v2731_v34 = vrot.slane %v6435_v37, 2 }
 0x144   : > { %v6620_v8 = vpop.f32.mrf.mxu0  ;;  %v4986_v29 = vpop.f32.mrf.mxu1 }
 0x145   : > { %8347 = vst [vmem:[#allocation29_spill] sm:$0xff] %v6620_v8  ;;  %v6622_v58 = vadd.f32 %v4983_v4, %v1368_v41  ;;  %v2730_v35 = vsel %vm970_vm3, %v2728_v28, %v2729_v24 }
 0x146   : > { %v4936_v30 = vpop.f32.mrf.mxu0  ;;  %5235 = vmatmul.mubr.msk.f32.gmra.mxu0 %vm384_vm1, %v8348_v27  ;;  %v6626_v51 = vpop.f32.mrf.mxu1 }
 0x147   : > { %8349 = vst [vmem:[#allocation30_spill] sm:$0xff] %v6626_v51  ;;  %v1370_v22 = vadd.f32 %v4936_v30, %v6437_v42  ;;  %5237 = vmatprep.mubr.msk.f32.mxu0 %vm384_vm1, %v8350_v60 }
 0x148   : > { %v6632_v43 = vpop.f32.mrf.mxu0  ;;  %v4989_v57 = vpop.f32.mrf.mxu1 }
 0x149   : > { %8351 = vst [vmem:[#allocation32_spill] sm:$0xff] %v6632_v43  ;;  %v6635_v4 = vadd.f32 %v4986_v29, %v1370_v22 }
 0x14a   : > { %v4939_v41 = vpop.f32.mrf.mxu0  ;;  %5238 = vmatmul.mubr.msk.f32.gmra.mxu0 %vm384_vm1, %v6098_v63  ;;  %v6639_v27 = vpop.f32.mrf.mxu1 }
 0x14b   : > { %8352 = vst [vmem:[#allocation33_spill] sm:$0xff] %v6639_v27  ;;  %v1372_v42 = vadd.f32 %v4939_v41, %v6453_v50  ;;  %5240 = vmatprep.mubr.msk.f32.mxu0 %vm384_vm1, %v6235_v40  ;;  %v2732_v40 = vsel %vm970_vm3, %v2729_v24, %v2731_v34 }
 0x14c   : > { %v6645_v30 = vpop.f32.mrf.mxu0  ;;  %v4992_v60 = vpop.f32.mrf.mxu1 }
 0x14d   : > { %8353 = vst [vmem:[#allocation7_spill] sm:$0xff] %v6645_v30  ;;  %v6648_v29 = vadd.f32 %v4989_v57, %v1372_v42 }
 0x14e   : > { %v4942_v22 = vpop.f32.mrf.mxu0  ;;  %5241 = vmatmul.mubr.msk.f32.gmra.mxu0 %vm384_vm1, %v6247_v26  ;;  %v6652_v63 = vpop.f32.mrf.mxu1 }
 0x14f   : > { %8354 = vst [vmem:[#allocation10_spill] sm:$0xff] %v6652_v63  ;;  %v1374_v50 = vadd.f32 %v4942_v22, %v6467_v33  ;;  %5243 = vmatprep.mubr.msk.f32.mxu0 %vm384_vm1, %v2730_v35 }
 0x150   : > { %v6657_v37 = vpop.f32.mrf.mxu0  ;;  %v4995_v41 = vpop.f32.mrf.mxu1 }
 0x151   : > { %8355 = vst [vmem:[#allocation13_spill] sm:$0xff] %v6657_v37  ;;  %v6659_v11 = vadd.f32 %v4992_v60, %v1374_v50 }
 0x152   : > { %v4945_v28 = vpop.f32.mrf.mxu0  ;;  %5244 = vmatmul.mubr.msk.f32.gmra.mxu0 %vm384_vm1, %v2732_v40  ;;  %v6662_v57 = vpop.f32.mrf.mxu1 }
 0x153   : > { %8356 = vst [vmem:[#allocation16_spill] sm:$0xff] %v6662_v57  ;;  %v1376_v26 = vadd.f32 %v4945_v28, %v6478_v10 }
 0x154   : > { %v6665_v42 = vpop.f32.mrf.mxu0  ;;  %v5050_v51 = vpop.f32.mrf.mxu1 }
 0x155   : > { %8357 = vst [vmem:[#allocation19_spill] sm:$0xff] %v6665_v42  ;;  %v6667_v33 = vadd.f32 %v4995_v41, %v1376_v26  ;;  %v8216_v42 = vmov 0.0  }
 0x156   : > { %v5000_v35 = vpop.f32.mrf.mxu0  ;;  %v6669_v22 = vpop.f32.mrf.mxu1  ;;  %3294 = vmatprep.subr.mxu0 %v8216_v42  ;;  %5246 = vmatprep.subr.mxu1 %v8216_v42 }
 0x157   : > { %8358 = vst [vmem:[#allocation22_spill] sm:$0xff] %v6669_v22  ;;  %v1886_v24 = vadd.f32 %v5000_v35, %v6494_v53 }
 0x158   : > { %v6672_v34 = vpop.f32.mrf.mxu0  ;;  %v5053_v60 = vpop.f32.mrf.mxu1 }
 0x159   : > { %8359 = vst [vmem:[#allocation25_spill] sm:$0xff] %v6672_v34  ;;  %v6674_v50 = vadd.f32 %v5050_v51, %v1886_v24 }
 0x15a   : > { %v5003_v40 = vpop.f32.mrf.mxu0  ;;  %v6676_v8 = vpop.f32.mrf.mxu1 }
 0x15b   : > { %8360 = vst [vmem:[#allocation28_spill] sm:$0xff] %v6676_v8  ;;  %v1888_v10 = vadd.f32 %v5003_v40, %v6506_v55 }
 0x15c   : > { %v6679_v28 = vpop.f32.mrf.mxu0  ;;  %v5056_v56 = vpop.f32.mrf.mxu1 }
 0x15d   : > { %v6681_v41 = vadd.f32 %v5053_v60, %v1888_v10 }
 0x15e   : > { %v5006_v26 = vpop.f32.mrf.mxu0  ;;  %v6683_v1 = vpop.f32.mrf.mxu1 }
 0x15f   : > { %8361 = vst [vmem:[#allocation31_spill] sm:$0xff] %v6683_v1  ;;  %v1890_v53 = vadd.f32 %v5006_v26, %v6518_v13 }
 0x160   : > { %v6686_v35 = vpop.f32.mrf.mxu0  ;;  %v5059_v27 = vpop.f32.mrf.mxu1 }
 0x161   : > { %v6688_v51 = vadd.f32 %v5056_v56, %v1890_v53 }
 0x162   : > { %v5009_v24 = vpop.f32.mrf.mxu0  ;;  %v6690_v43 = vpop.f32.mrf.mxu1 }
 0x163   : > { %v1892_v55 = vadd.f32 %v5009_v24, %v6530_v6 }
 0x164   : > { %v6693_v40 = vpop.f32.mrf.mxu0  ;;  %v5062_v63 = vpop.f32.mrf.mxu1 }
 0x165   : > { %v6695_v60 = vadd.f32 %v5059_v27, %v1892_v55 }
 0x166   : > { %v5012_v10 = vpop.f32.mrf.mxu0  ;;  %v6697_v22 = vpop.f32.mrf.mxu1 }
 0x167   : > { %v1894_v13 = vadd.f32 %v5012_v10, %v6542_v2 }
 0x168   : > { %v6700_v26 = vpop.f32.mrf.mxu0  ;;  %v5065_v57 = vpop.f32.mrf.mxu1 }
 0x169   : > { %v6702_v56 = vadd.f32 %v5062_v63, %v1894_v13 }
 0x16a   : > { %v5015_v53 = vpop.f32.mrf.mxu0  ;;  %v6704_v30 = vpop.f32.mrf.mxu1 }
 0x16b   : > { %v1896_v6 = vadd.f32 %v5015_v53, %v6554_v47 }
 0x16c   : > { %v6707_v24 = vpop.f32.mrf.mxu0  ;;  %v5068_v37 = vpop.f32.mrf.mxu1 }
 0x16d   : > { %v6709_v27 = vadd.f32 %v5065_v57, %v1896_v6 }
 0x16e   : > { %v5018_v55 = vpop.f32.mrf.mxu0  ;;  %v6711_v31 = vpop.f32.mrf.mxu1 }
 0x16f   : > { %v1898_v2 = vadd.f32 %v5018_v55, %v6566_v5 }
 0x170   : > { %v6714_v10 = vpop.f32.mrf.mxu0  ;;  %v6716_v25 = vpop.f32.mrf.mxu1 }
 0x171   : > { %v6718_v63 = vadd.f32 %v5068_v37, %v1898_v2 }
 0x172   : > { %v5021_v13 = vpop.f32.mrf.mxu0  ;;  %v6720_v8 = vpop.f32.mrf.mxu1 }
 0x173   : > { %v6723_v47 = vadd.f32 %v5021_v13, %v6578_v54 }
 0x174   : > { %v6725_v53 = vpop.f32.mrf.mxu0  ;;  %v5074_v57 = vpop.f32.mrf.mxu1 }
 0x176   : > { %v5024_v6 = vpop.f32.mrf.mxu0  ;;  %v6727_v34 = vpop.f32.mrf.mxu1 }
 0x177   : > { %8362 = vst [vmem:[#allocation34_spill] sm:$0xff] %v6727_v34  ;;  %v1902_v5 = vadd.f32 %v5024_v6, %v6589_v7 }
 0x178   : > { %v6732_v37 = vpop.f32.mrf.mxu0  ;;  %v5077_v55 = vpop.f32.mrf.mxu1 }
 0x179   : > { %8363 = vst [vmem:[#allocation35_spill] sm:$0xff] %v6732_v37  ;;  %v6734_v2 = vadd.f32 %v5074_v57, %v1902_v5 }
 0x17a   : > { %v5027_v54 = vpop.f32.mrf.mxu0  ;;  %v6736_v13 = vpop.f32.mrf.mxu1 }
 0x17b   : > { %8364 = vst [vmem:[#allocation36_spill] sm:$0xff] %v6736_v13  ;;  %v1904_v9 = vadd.f32 %v5027_v54, %v6600_v52 }
 0x17c   : > { %v6739_v39 = vpop.f32.mrf.mxu0  ;;  %v5080_v34 = vpop.f32.mrf.mxu1 }
 0x17d   : > { %8365 = vst [vmem:[#allocation37_spill] sm:$0xff] %v6739_v39  ;;  %v6741_v23 = vadd.f32 %v5077_v55, %v1904_v9 }
 0x17e   : > { %v5030_v17 = vpop.f32.mrf.mxu0  ;;  %v6743_v1 = vpop.f32.mrf.mxu1 }
 0x17f   : > { %8366 = vst [vmem:[#allocation38_spill] sm:$0xff] %v6743_v1  ;;  %v1906_v7 = vadd.f32 %v5030_v17, %v6611_v21 }
 0x180   : > { %v6746_v6 = vpop.f32.mrf.mxu0  ;;  %v5083_v42 = vpop.f32.mrf.mxu1 }
 0x181   : > { %8367 = vst [vmem:[#allocation39_spill] sm:$0xff] %v6746_v6  ;;  %v6748_v57 = vadd.f32 %v5080_v34, %v1906_v7 }
 0x182   : > { %v5033_v5 = vpop.f32.mrf.mxu0  ;;  %v6750_v37 = vpop.f32.mrf.mxu1 }
 0x183   : > { %8368 = vst [vmem:[#allocation40_spill] sm:$0xff] %v6750_v37  ;;  %v1908_v52 = vadd.f32 %v5033_v5, %v6622_v58 }
 0x184   : > { %v6753_v54 = vpop.f32.mrf.mxu0  ;;  %v5086_v13 = vpop.f32.mrf.mxu1 }
 0x185   : > { %8369 = vst [vmem:[#allocation41_spill] sm:$0xff] %v6753_v54  ;;  %v6755_v9 = vadd.f32 %v5083_v42, %v1908_v52 }
 0x186   : > { %v5036_v55 = vpop.f32.mrf.mxu0  ;;  %v6757_v39 = vpop.f32.mrf.mxu1 }
 0x187   : > { %8370 = vst [vmem:[#allocation42_spill] sm:$0xff] %v6757_v39  ;;  %v1910_v17 = vadd.f32 %v5036_v55, %v6635_v4 }
 0x188   : > { %v6760_v21 = vpop.f32.mrf.mxu0  ;;  %v5089_v1 = vpop.f32.mrf.mxu1 }
 0x189   : > { %8371 = vst [vmem:[#allocation43_spill] sm:$0xff] %v6760_v21  ;;  %v6762_v34 = vadd.f32 %v5086_v13, %v1910_v17 }
 0x18a   : > { %v5039_v7 = vpop.f32.mrf.mxu0  ;;  %v6764_v6 = vpop.f32.mrf.mxu1 }
 0x18b   : > { %8372 = vst [vmem:[#allocation44_spill] sm:$0xff] %v6764_v6  ;;  %v1912_v58 = vadd.f32 %v5039_v7, %v6648_v29 }
 0x18c   : > { %v6767_v5 = vpop.f32.mrf.mxu0  ;;  %v5092_v37 = vpop.f32.mrf.mxu1 }
 0x18d   : > { %8373 = vst [vmem:[#allocation45_spill] sm:$0xff] %v6767_v5  ;;  %v6769_v42 = vadd.f32 %v5089_v1, %v1912_v58 }
 0x18e   : > { %v5042_v52 = vpop.f32.mrf.mxu0  ;;  %v6771_v54 = vpop.f32.mrf.mxu1 }
 0x18f   : > { %8374 = vst [vmem:[#allocation46_spill] sm:$0xff] %v6771_v54  ;;  %v1914_v4 = vadd.f32 %v5042_v52, %v6659_v11 }
 0x190   : > { %v6774_v55 = vpop.f32.mrf.mxu0  ;;  %v6776_v39 = vpop.f32.mrf.mxu1 }
 0x191   : > { %8375 = vst [vmem:[#allocation47_spill] sm:$0xff] %v6774_v55  ;;  %8376 = vst [vmem:[#allocation48_spill] sm:$0xff] %v6776_v39  ;;  %v6778_v13 = vadd.f32 %v5092_v37, %v1914_v4 }
 0x192   : > { %v5045_v17 = vpop.f32.mrf.mxu0  ;;  %v6780_v6 = vpop.f32.mrf.mxu1 }
 0x193   : > { %8377 = vst [vmem:[#allocation49_spill] sm:$0xff] %v6780_v6  ;;  %v6783_v29 = vadd.f32 %v5045_v17, %v6667_v33 }
 0x194   : > { %v6785_v7 = vpop.f32.mrf.mxu0  ;;  %v6787_v1 = vpop.f32.mrf.mxu1 }
 0x195   : > { %8378 = vst [vmem:[#allocation50_spill] sm:$0xff] %v6783_v29  ;;  %8379 = vst [vmem:[#allocation51_spill] sm:$0xff] %v6785_v7 }
 0x196   : > { %8380 = vst [vmem:[#allocation52_spill] sm:$0xff] %v6787_v1  ;;  %v5100_v58 = vpop.f32.mrf.mxu0  ;;  %v6794_v52 = vpop.f32.mrf.mxu1 }
 0x197   : > { %v6790_v21 = vadd.f32 %v5100_v58, %v6674_v50  ;;  %8383 = vst [vmem:[#allocation55_spill] sm:$0xff] %v6794_v52 }
 0x198   : > { %v6792_v11 = vpop.f32.mrf.mxu0  ;;  %v6801_v33 = vpop.f32.mrf.mxu1 }
 0x199   : > { %8381 = vst [vmem:[#allocation53_spill] sm:$0xff] %v6790_v21  ;;  %8382 = vst [vmem:[#allocation54_spill] sm:$0xff] %v6792_v11 }
 0x19a   : > { %v5103_v37 = vpop.f32.mrf.mxu0  ;;  %8386 = vst [vmem:[#allocation58_spill] sm:$0xff] %v6801_v33  ;;  %v6806_v6 = vpop.f32.mrf.mxu1 }
 0x19b   : > { %v6797_v4 = vadd.f32 %v5103_v37, %v6681_v41  ;;  %8388 = vst [vmem:[#allocation60_spill] sm:$0xff] %v6806_v6 }
 0x19c   : > { %v6799_v54 = vpop.f32.mrf.mxu0  ;;  %v6813_v52 = vpop.f32.mrf.mxu1 }
 0x19d   : > { %8384 = vst [vmem:[#allocation56_spill] sm:$0xff] %v6797_v4  ;;  %8385 = vst [vmem:[#allocation57_spill] sm:$0xff] %v6799_v54 }
 0x19e   : > { %v5106_v17 = vpop.f32.mrf.mxu0  ;;  %8391 = vst [vmem:[#allocation63_spill] sm:$0xff] %v6813_v52  ;;  %v6820_v39 = vpop.f32.mrf.mxu1 }
 0x19f   : > { %v6804_v5 = vadd.f32 %v5106_v17, %v6688_v51  ;;  %8392 = vst [vmem:[#allocation64_spill] sm:$0xff] %v6820_v39 }
 0x1a0   : > { %v6808_v50 = vpop.f32.mrf.mxu0  ;;  %v6827_v55 = vpop.f32.mrf.mxu1 }
 0x1a1   : > { %8387 = vst [vmem:[#allocation59_spill] sm:$0xff] %v6804_v5  ;;  %8389 = vst [vmem:[#allocation61_spill] sm:$0xff] %v6808_v50 }
 0x1a2   : > { %v5109_v58 = vpop.f32.mrf.mxu0  ;;  %8393 = vst [vmem:[#allocation65_spill] sm:$0xff] %v6827_v55  ;;  %v6834_v11 = vpop.f32.mrf.mxu1 }
 0x1a3   : > { %v6811_v1 = vadd.f32 %v5109_v58, %v6695_v60  ;;  %8394 = vst [vmem:[#allocation66_spill] sm:$0xff] %v6834_v11 }
 0x1a4   : > { %v6815_v41 = vpop.f32.mrf.mxu0  ;;  %v6838_v7 = vpop.f32.mrf.mxu1 }
 0x1a5   : > { %8390 = vst [vmem:[#allocation62_spill] sm:$0xff] %v6811_v1 }
 0x1a6   : > { %v5112_v37 = vpop.f32.mrf.mxu0 }
 0x1a7   : > { %v6818_v21 = vadd.f32 %v5112_v37, %v6702_v56 }
 0x1a8   : > { %v6822_v51 = vpop.f32.mrf.mxu0 }
 0x1aa   : > { %v5115_v17 = vpop.f32.mrf.mxu0 }
 0x1ab   : > { %v6825_v29 = vadd.f32 %v5115_v17, %v6709_v27  ;;  %v3151_v27 = vld [vmem:[%s8135_s3 + $0x388] sm:$0xff] }
 0x1ac   : > { %v6829_v60 = vpop.f32.mrf.mxu0  ;;  %3638 = vmatprep.mubr.f32.mxu1 %v3151_v27 }
 0x1ae   : > { %v5118_v58 = vpop.f32.mrf.mxu0 }
 0x1af   : > { %v6832_v6 = vadd.f32 %v5118_v58, %v6718_v63  ;;  %v6848_v63 = vpop.f32.mrf.mxu1 }
 0x1b0   : > { %v6836_v56 = vpop.f32.mrf.mxu0 }
 0x1b1   : > { %v6855_v52 = vpop.f32.mrf.mxu1 }
 0x1b2   : > { %v5121_v37 = vpop.f32.mrf.mxu0 }
 0x1b3   : > { %v6862_v27 = vpop.f32.mrf.mxu1 }
 0x1b4   : > { %v6840_v33 = vpop.f32.mrf.mxu0 }
 0x1b6   : > { %v5124_v17 = vpop.f32.mrf.mxu0 }
 0x1b7   : > { %v6846_v4 = vadd.f32 %v5124_v17, %v6734_v2 }
 0x1b8   : > { %v6850_v58 = vpop.f32.mrf.mxu0 }
 0x1b9   : > { %8395 = vst [vmem:[#allocation67_spill] sm:$0xff] %v6846_v4  ;;  %8396 = vst [vmem:[#allocation68_spill] sm:$0xff] %v6850_v58  ;;  %v5168_v58 = vpop.f32.mrf.mxu1 }
 0x1ba   : > { %v5127_v39 = vpop.f32.mrf.mxu0 }
 0x1bb   : > { %v6853_v54 = vadd.f32 %v5127_v39, %v6741_v23 }
 0x1bc   : > { %v6857_v5 = vpop.f32.mrf.mxu0 }
 0x1bd   : > { %8397 = vst [vmem:[#allocation69_spill] sm:$0xff] %v6853_v54  ;;  %8398 = vst [vmem:[#allocation70_spill] sm:$0xff] %v6857_v5  ;;  %v2597_v54 = vpop.f32.mrf.mxu1 }
 0x1be   : > { %v5130_v11 = vpop.f32.mrf.mxu0 }
 0x1bf   : > { %v6860_v50 = vadd.f32 %v5130_v11, %v6748_v57 }
 0x1c0   : > { %v6864_v2 = vpop.f32.mrf.mxu0 }
 0x1c1   : > { %8399 = vst [vmem:[#allocation71_spill] sm:$0xff] %v6860_v50  ;;  %8400 = vst [vmem:[#allocation72_spill] sm:$0xff] %v6864_v2  ;;  %v5171_v50 = vpop.f32.mrf.mxu1 }
 0x1c2   : > { %v5133_v17 = vpop.f32.mrf.mxu0 }
 0x1c3   : > { %v6867_v4 = vadd.f32 %v5133_v17, %v6755_v9  ;;  %v2607_v17 = vpop.f32.mrf.mxu1 }
 0x1c4   : > { %v6869_v55 = vpop.f32.mrf.mxu0 }
 0x1c5   : > { %8401 = vst [vmem:[#allocation73_spill] sm:$0xff] %v6867_v4  ;;  %8402 = vst [vmem:[#allocation74_spill] sm:$0xff] %v6869_v55 }
 0x1c6   : > { %v5136_v23 = vpop.f32.mrf.mxu0 }
 0x1c7   : > { %v6872_v39 = vadd.f32 %v5136_v23, %v6762_v34  ;;  %v6888_v34 = vpop.f32.mrf.mxu1 }
 0x1c8   : > { %v6874_v5 = vpop.f32.mrf.mxu0  ;;  %8410 = vst [vmem:[#allocation82_spill] sm:$0xff] %v6888_v34 }
 0x1c9   : > { %8403 = vst [vmem:[#allocation75_spill] sm:$0xff] %v6872_v39  ;;  %8404 = vst [vmem:[#allocation76_spill] sm:$0xff] %v6874_v5 }
 0x1ca   : > { %v5139_v57 = vpop.f32.mrf.mxu0 }
 0x1cb   : > { %v6877_v11 = vadd.f32 %v5139_v57, %v6769_v42  ;;  %v6894_v42 = vpop.f32.mrf.mxu1 }
 0x1cc   : > { %v6879_v2 = vpop.f32.mrf.mxu0  ;;  %8413 = vst [vmem:[#allocation85_spill] sm:$0xff] %v6894_v42 }
 0x1cd   : > { %8405 = vst [vmem:[#allocation77_spill] sm:$0xff] %v6877_v11  ;;  %8406 = vst [vmem:[#allocation78_spill] sm:$0xff] %v6879_v2  ;;  %v6900_v11 = vpop.f32.mrf.mxu1 }
 0x1ce   : > { %v5142_v1 = vpop.f32.mrf.mxu0  ;;  %8416 = vst [vmem:[#allocation88_spill] sm:$0xff] %v6900_v11 }
 0x1cf   : > { %v6882_v9 = vadd.f32 %v5142_v1, %v6778_v13  ;;  %v6906_v2 = vpop.f32.mrf.mxu1 }
 0x1d0   : > { %v6884_v4 = vpop.f32.mrf.mxu0  ;;  %8419 = vst [vmem:[#allocation91_spill] sm:$0xff] %v6906_v2  ;;  %v1625_v2 = vadd.f32 %v6558_v0, %v6564_v59 }
 0x1d1   : > { %8407 = vst [vmem:[#allocation79_spill] sm:$0xff] %v6882_v9  ;;  %8408 = vst [vmem:[#allocation80_spill] sm:$0xff] %v6884_v4  ;;  %v6912_v4 = vpop.f32.mrf.mxu1 }
 0x1d2   : > { %v6886_v55 = vpop.f32.mrf.mxu0  ;;  %8421 = vst [vmem:[#allocation93_spill] sm:$0xff] %v6912_v4  ;;  %v2171_v4 = vadd.f32 %v6716_v25, %v6723_v47 }
 0x1d3   : > { %8409 = vst [vmem:[#allocation81_spill] sm:$0xff] %v6886_v55  ;;  %v6920_v11 = vpop.f32.mrf.mxu1 }
 0x1d4   : > { %v6890_v23 = vpop.f32.mrf.mxu0  ;;  %8423 = vst [vmem:[#allocation95_spill] sm:$0xff] %v6920_v11  ;;  %v2439_v11 = vadd.f32 %v5121_v37, %v2171_v4 }
 0x1d5   : > { %8411 = vst [vmem:[#allocation83_spill] sm:$0xff] %v6890_v23 }
 0x1d6   : > { %v6892_v39 = vpop.f32.mrf.mxu0 }
 0x1d7   : > { %8412 = vst [vmem:[#allocation84_spill] sm:$0xff] %v6892_v39 }
 0x1d8   : > { %v6896_v57 = vpop.f32.mrf.mxu0 }
 0x1d9   : > { %8414 = vst [vmem:[#allocation86_spill] sm:$0xff] %v6896_v57  ;;  %v1627_v57 = vadd.f32 %v6570_v61, %v6576_v18 }
 0x1da   : > { %v6898_v5 = vpop.f32.mrf.mxu0 }
 0x1db   : > { %8415 = vst [vmem:[#allocation87_spill] sm:$0xff] %v6898_v5  ;;  %v1899_v55 = vadd.f32 %v6725_v53, %v1627_v57  ;;  %v1897_v5 = vadd.f32 %v6714_v10, %v1625_v2  ;;  %v1621_v10 = vadd.f32 %v6534_v32, %v6540_v62  ;;  %v1619_v32 = vadd.f32 %v6522_v16, %v6528_v20 }
 0x1dc   : > { %v6902_v13 = vpop.f32.mrf.mxu0  ;;  %v2707_v20 = vadd.f32 %v6855_v52, %v6825_v29 }
 0x1dd   : > { %8417 = vst [vmem:[#allocation89_spill] sm:$0xff] %v6902_v13  ;;  %v2170_v18 = vadd.f32 %v6720_v8, %v1899_v55  ;;  %v2168_v59 = vadd.f32 %v6711_v31, %v1897_v5  ;;  %v1893_v2 = vadd.f32 %v6700_v26, %v1621_v10  ;;  %v3039_v31 = vld [vmem:[%s8135_s3 + $0x8] sm:$0xff] }
 0x1de   : > { %v6904_v1 = vpop.f32.mrf.mxu0  ;;  %3358 = vmatprep.mubr.f32.mxu0 %v3039_v31 }
 0x1df   : > { %8418 = vst [vmem:[#allocation90_spill] sm:$0xff] %v6904_v1  ;;  %v6932_v1 = vpop.f32.mrf.mxu1  ;;  %v2438_v53 = vadd.f32 %v6840_v33, %v2170_v18 }
 0x1e0   : > { %v6908_v9 = vpop.f32.mrf.mxu0 }
 0x1e1   : > { %8420 = vst [vmem:[#allocation92_spill] sm:$0xff] %v6908_v9  ;;  %v1623_v9 = vadd.f32 %v6546_v14, %v6552_v12  ;;  %v6940_v25 = vpop.f32.mrf.mxu1  ;;  %v2436_v14 = vadd.f32 %v6836_v56, %v2168_v59  ;;  %v2711_v12 = vadd.f32 %v5171_v50, %v2439_v11  ;;  %v2710_v5 = vadd.f32 %v2607_v17, %v2438_v53  ;;  %v8427_v53 = vld [vmem:[#allocation65_spill] sm:$0xff] }
 0x1e2   : > { %v6910_v34 = vpop.f32.mrf.mxu0  ;;  %v2164_v11 = vadd.f32 %v6697_v22, %v1893_v2  ;;  %v8424_v22 = vmov 0.0  }
 0x1e3   : > { %v6952_v33 = vpop.f32.mrf.mxu1  ;;  %v2708_v50 = vadd.f32 %v2597_v54, %v2436_v14  ;;  %v1617_v54 = vadd.f32 %v6510_v46, %v6516_v15  ;;  %v6980_v46 = vadd.f32 %v6396_v3, %v6402_v48  ;;  %v6993_v3 = vadd.f32 %v6430_v19, %v6441_v38  ;;  %v8430_v14 = vld [vmem:[#allocation17_spill] sm:$0xff] }
 0x1e4   : > { %v6914_v23 = vpop.f32.mrf.mxu0  ;;  %v2432_v17 = vadd.f32 %v6822_v51, %v2164_v11  ;;  %v1615_v48 = vadd.f32 %v6498_v49, %v6504_v36  ;;  %v952_v38 = vadd.f32 %v6465_v45, %v6471_v44  ;;  %v8425_v36 = vld [vmem:[#allocation31_spill] sm:$0xff]  ;;  %v8428_v45 = vld [vmem:[#allocation14_spill] sm:$0xff]  ;;  %v8429_v44 = vld [vmem:[#allocation12_spill] sm:$0xff] }
 0x1e5   : > { %8422 = vst [vmem:[#allocation94_spill] sm:$0xff] %v6914_v23  ;;  %v1895_v23 = vadd.f32 %v6707_v24, %v1623_v9  ;;  %v2709_v24 = vadd.f32 %v5168_v58, %v6832_v6  ;;  %v1891_v58 = vadd.f32 %v6693_v40, %v1619_v32  ;;  %v1889_v15 = vadd.f32 %v6686_v35, %v1617_v54  ;;  %v8437_v11 = vld [vmem:[#allocation59_spill] sm:$0xff] }
 0x1e6   : > { %v6916_v42 = vpop.f32.mrf.mxu0  ;;  %v1887_v49 = vadd.f32 %v6679_v28, %v1615_v48  ;;  %v962_v28 = vadd.f32 %v8429_v44, %v8428_v45  ;;  %v8444_v48 = vld [vmem:[#allocation64_spill] sm:$0xff] }
 0x1e7   : > { %v2166_v8 = vadd.f32 %v6704_v30, %v1895_v23  ;;  %v6957_v30 = vld [vmem:[%s8134_s2] ss:$0 sm:$0xff]  ;;  %v6970_v23 = vpop.f32.mrf.mxu1  ;;  %v2162_v51 = vadd.f32 %v6690_v43, %v1891_v58 }
 0x1e8   : > { %v6922_v39 = vpop.f32.mrf.mxu0  ;;  %v8451_v44 = vld [vmem:[#allocation92_spill] sm:$0xff] }
 0x1e9   : > { %v2434_v62 = vadd.f32 %v6829_v60, %v2166_v8  ;;  %v2430_v43 = vadd.f32 %v6815_v41, %v2162_v51  ;;  %v6998_v35 = vpop.f32.mrf.mxu1  ;;  %v2160_v41 = vadd.f32 %v8425_v36, %v1889_v15  ;;  %v8432_v8 = vld [vmem:[#allocation61_spill] sm:$0xff]  ;;  %v8447_v36 = vld [vmem:[#allocation16_spill] sm:$0xff] }
 0x1ea   : > { %v5215_v13 = vpop.f32.mrf.mxu0  ;;  %v8443_v51 = vld [vmem:[#allocation57_spill] sm:$0xff] }
 0x1eb   : > { %v2706_v29 = vadd.f32 %v6862_v27, %v2434_v62  ;;  %v2978_v52 = vadd.f32 %v5215_v13, %v2707_v20  ;;  %v2705_v27 = vadd.f32 %v6838_v7, %v6818_v21  ;;  %v2704_v21 = vadd.f32 %v6848_v63, %v2432_v17  ;;  %v8426_v63 = vld [vmem:[#allocation62_spill] sm:$0xff]  ;;  %v7024_v31 = vpop.f32.mrf.mxu1  ;;  %v8434_v62 = vld [vmem:[#allocation19_spill] sm:$0xff] }
 0x1ec   : > { %v2858_v61 = vpop.f32.mrf.mxu0  ;;  %v8438_v20 = vld [vmem:[#allocation63_spill] sm:$0xff] }
 0x1ed   : > { %v2977_v13 = vadd.f32 %v2858_v61, %v2706_v29  ;;  %v2976_v7 = vadd.f32 %v6916_v42, %v2705_v27  ;;  %v3017_v19 = vadd.f32 %v6957_v30, %v2978_v52  ;;  %v2703_v42 = vadd.f32 %v8427_v53, %v8426_v63  ;;  %v8440_v17 = vld [vmem:[#allocation11_spill] sm:$0xff]  ;;  %v8441_v29 = vld [vmem:[#allocation9_spill] sm:$0xff]  ;;  %v8448_v63 = vld [vmem:[#allocation22_spill] sm:$0xff] }
 0x1ee   : > { %v5218_v0 = vpop.f32.mrf.mxu0  ;;  %v2975_v10 = vadd.f32 %v6922_v39, %v2704_v21  ;;  %v8433_v39 = vld [vmem:[#allocation66_spill] sm:$0xff]  ;;  %v942_v52 = vadd.f32 %v8441_v29, %v8440_v17  ;;  %v8461_v29 = vld [vmem:[#allocation53_spill] sm:$0xff] }
 0x1ef   : > { %v2980_v56 = vadd.f32 %v5218_v0, %v2709_v24  ;;  %v3015_v32 = vadd.f32 %v6957_v30, %v2976_v7  ;;  %v8445_v21 = vld [vmem:[#allocation90_spill] sm:$0xff] }
 0x1f0   : > { %v2868_v47 = vpop.f32.mrf.mxu0  ;;  %v3014_v54 = vadd.f32 %v6957_v30, %v2975_v10  ;;  %v8449_v10 = vld [vmem:[#allocation56_spill] sm:$0xff] }
 0x1f1   : > { %v2979_v60 = vadd.f32 %v2868_v47, %v2708_v50  ;;  %v3019_v57 = vadd.f32 %v6957_v30, %v2980_v56  ;;  %v3016_v47 = vadd.f32 %v6957_v30, %v2977_v13  ;;  %v8435_v50 = vld [vmem:[#allocation25_spill] sm:$0xff]  ;;  %v7048_v13 = vpop.f32.mrf.mxu1 }
 0x1f2   : > { %v5221_v55 = vpop.f32.mrf.mxu0 }
 0x1f3   : > { %v2982_v4 = vadd.f32 %v5221_v55, %v2711_v12  ;;  %v3018_v0 = vadd.f32 %v6957_v30, %v2979_v60  ;;  %v8431_v12 = vld [vmem:[#allocation15_spill] sm:$0xff]  ;;  %v2428_v55 = vadd.f32 %v8432_v8, %v2160_v41  ;;  %v2701_v60 = vadd.f32 %v8438_v20, %v8437_v11 }
 0x1f4   : > { %v2878_v26 = vpop.f32.mrf.mxu0  ;;  %v1613_v2 = vadd.f32 %v8431_v12, %v8430_v14  ;;  %v8452_v12 = vld [vmem:[#allocation10_spill] sm:$0xff]  ;;  %v8453_v8 = vld [vmem:[#allocation51_spill] sm:$0xff] }
 0x1f5   : > { %v3021_v6 = vadd.f32 %v6957_v30, %v2982_v4  ;;  %v2981_v37 = vadd.f32 %v2878_v26, %v2710_v5  ;;  %v2702_v5 = vadd.f32 %v8433_v39, %v2430_v43  ;;  %v2974_v4 = vadd.f32 %v6910_v34, %v2703_v42  ;;  %v8439_v34 = vld [vmem:[#allocation94_spill] sm:$0xff]  ;;  %v8458_v20 = vld [vmem:[#allocation47_spill] sm:$0xff] }
 0x1f6   : > { %v6962_v16 = vpop.f32.mrf.mxu0  ;;  %v1375_v26 = vadd.f32 %v8434_v62, %v962_v28  ;;  %v1885_v56 = vadd.f32 %v8435_v50, %v1613_v2  ;;  %v2700_v43 = vadd.f32 %v8444_v48, %v2428_v55  ;;  %v2972_v7 = vadd.f32 %v8445_v21, %v2701_v60  ;;  %v8454_v39 = vld [vmem:[#allocation54_spill] sm:$0xff]  ;;  %v8455_v62 = vld [vmem:[#allocation60_spill] sm:$0xff]  ;;  %v8456_v50 = vld [vmem:[#allocation87_spill] sm:$0xff] }
 0x1f7   : > { %v3020_v9 = vadd.f32 %v6957_v30, %v2981_v37  ;;  %3295 = vmatpush1.msra.mxu0 %v3021_v6  ;;  %5278 = vmatpush1.msra.mxu1 %v3021_v6  ;;  %v8436_v6 = vld [vmem:[#allocation28_spill] sm:$0xff] }
 0x1f8   : > { %v6972_v40 = vpop.f32.mrf.mxu0  ;;  %3296 = vmatprep.subr.mxu0 %v8424_v22  ;;  %5247 = vmatprep.subr.mxu1 %v8424_v22  ;;  %v2158_v37 = vadd.f32 %v8436_v6, %v1887_v49  ;;  %v8446_v49 = vld [vmem:[#allocation7_spill] sm:$0xff]  ;;  %v1643_v41 = vadd.f32 %v8447_v36, %v1375_v26  ;;  %v2156_v53 = vadd.f32 %v8448_v63, %v1885_v56 }
 0x1f9   : > { %3297 = vmatpush1.msra.mxu0 %v3020_v9  ;;  %5279 = vmatpush1.msra.mxu1 %v3020_v9  ;;  %v2973_v9 = vadd.f32 %v8439_v34, %v2702_v5  ;;  %v2971_v28 = vadd.f32 %v8451_v44, %v2700_v43  ;;  %v3011_v6 = vadd.f32 %v6957_v30, %v2972_v7  ;;  %v8459_v34 = vld [vmem:[#allocation50_spill] sm:$0xff]  ;;  %v8465_v43 = vld [vmem:[#allocation49_spill] sm:$0xff]  ;;  %v8466_v7 = vld [vmem:[#allocation55_spill] sm:$0xff] }
 0x1fa   : > { %v6984_v18 = vpop.f32.mrf.mxu0  ;;  %3298 = vmatprep.subr.mxu0 %v8424_v22  ;;  %5248 = vmatprep.subr.mxu1 %v8424_v22  ;;  %v2426_v27 = vadd.f32 %v8443_v51, %v2158_v37  ;;  %v1915_v55 = vadd.f32 %v8453_v8, %v1643_v41  ;;  %v2424_v5 = vadd.f32 %v8454_v39, %v2156_v53  ;;  %v8457_v37 = vld [vmem:[#allocation32_spill] sm:$0xff]  ;;  %v8467_v41 = vld [vmem:[#allocation81_spill] sm:$0xff] }
 0x1fb   : > { %3299 = vmatpush1.msra.mxu0 %v3019_v57  ;;  %5280 = vmatpush1.msra.mxu1 %v3019_v57  ;;  %v8442_v57 = vld [vmem:[#allocation13_spill] sm:$0xff]  ;;  %v3012_v14 = vadd.f32 %v6957_v30, %v2973_v9  ;;  %v1369_v11 = vadd.f32 %v8457_v37, %v6993_v3  ;;  %v8460_v9 = vld [vmem:[#allocation48_spill] sm:$0xff] }
 0x1fc   : > { %v7000_v59 = vpop.f32.mrf.mxu0  ;;  %3300 = vmatprep.subr.mxu0 %v8424_v22  ;;  %5249 = vmatprep.subr.mxu1 %v8424_v22  ;;  %v1373_v15 = vadd.f32 %v8442_v57, %v952_v38  ;;  %v1371_v38 = vadd.f32 %v8446_v49, %v942_v52  ;;  %v2698_v26 = vadd.f32 %v8455_v62, %v2426_v27  ;;  %v8462_v52 = vld [vmem:[#allocation52_spill] sm:$0xff]  ;;  %v8464_v3 = vld [vmem:[#allocation33_spill] sm:$0xff] }
 0x1fd   : > { %3301 = vmatpush1.msra.mxu0 %v3018_v0  ;;  %5281 = vmatpush1.msra.mxu1 %v3018_v0  ;;  %v2697_v57 = vadd.f32 %v8462_v52, %v8461_v29  ;;  %v3010_v27 = vadd.f32 %v6957_v30, %v2971_v28  ;;  %v2186_v21 = vadd.f32 %v8465_v43, %v1915_v55  ;;  %v8468_v53 = vld [vmem:[#allocation84_spill] sm:$0xff]  ;;  %v8471_v28 = vld [vmem:[#allocation45_spill] sm:$0xff]  ;;  %v8473_v55 = vld [vmem:[#allocation83_spill] sm:$0xff] }
 0x1fe   : > { %v7011_v61 = vpop.f32.mrf.mxu0  ;;  %3302 = vmatprep.subr.mxu0 %v8424_v22  ;;  %5250 = vmatprep.subr.mxu1 %v8424_v22  ;;  %v1641_v2 = vadd.f32 %v8452_v12, %v1373_v15  ;;  %v8463_v15 = vld [vmem:[#allocation89_spill] sm:$0xff]  ;;  %v1639_v48 = vadd.f32 %v8464_v3, %v1371_v38  ;;  %v8469_v38 = vld [vmem:[#allocation8_spill] sm:$0xff]  ;;  %v8472_v12 = vld [vmem:[#allocation46_spill] sm:$0xff] }
 0x1ff   : > { %3303 = vmatpush1.msra.mxu0 %v3017_v19  ;;  %5282 = vmatpush1.msra.mxu1 %v3017_v19  ;;  %v3013_v19 = vadd.f32 %v6957_v30, %v2974_v4  ;;  %v7071_v4 = vpop.f32.mrf.mxu1  ;;  %v2969_v51 = vadd.f32 %v8463_v15, %v2698_v26  ;;  %v2454_v39 = vadd.f32 %v8473_v55, %v2186_v21  ;;  %v8479_v15 = vld [vmem:[#allocation43_spill] sm:$0xff] }
 0x200   : > { %v7026_v24 = vpop.f32.mrf.mxu0  ;;  %3304 = vmatprep.subr.mxu0 %v8424_v22  ;;  %5251 = vmatprep.subr.mxu1 %v8424_v22  ;;  %v1913_v60 = vadd.f32 %v8458_v20, %v1641_v2  ;;  %v8477_v20 = vld [vmem:[#allocation80_spill] sm:$0xff]  ;;  %v8481_v3 = vld [vmem:[#allocation79_spill] sm:$0xff] }
 0x201   : > { %3305 = vmatpush1.msra.mxu0 %v3016_v47  ;;  %5283 = vmatpush1.msra.mxu1 %v3016_v47  ;;  %v8450_v47 = vld [vmem:[#allocation58_spill] sm:$0xff]  ;;  %v5195_v49 = vpop.f32.mrf.mxu1  ;;  %v3008_v26 = vadd.f32 %v6957_v30, %v2969_v51 }
 0x202   : > { %v7036_v58 = vpop.f32.mrf.mxu0  ;;  %3306 = vmatprep.subr.mxu0 %v8424_v22  ;;  %5252 = vmatprep.subr.mxu1 %v8424_v22  ;;  %v2699_v45 = vadd.f32 %v8450_v47, %v8449_v10  ;;  %v2968_v10 = vadd.f32 %v8468_v53, %v2697_v57  ;;  %v2184_v2 = vadd.f32 %v8472_v12, %v1913_v60 }
 0x203   : > { %3307 = vmatpush1.msra.mxu0 %v3015_v32  ;;  %5284 = vmatpush1.msra.mxu1 %v3015_v32  ;;  %v2687_v60 = vpop.f32.mrf.mxu1 }
 0x204   : > { %v7050_v0 = vpop.f32.mrf.mxu0  ;;  %3308 = vmatprep.subr.mxu0 %v8424_v22  ;;  %5253 = vmatprep.subr.mxu1 %v8424_v22  ;;  %v2970_v56 = vadd.f32 %v8456_v50, %v2699_v45  ;;  %v8470_v45 = vld [vmem:[#allocation6_spill] sm:$0xff]  ;;  %v8475_v50 = vld [vmem:[#allocation29_spill] sm:$0xff]  ;;  %v3007_v57 = vadd.f32 %v6957_v30, %v2968_v10  ;;  %v2726_v21 = vadd.f32 %v2687_v60, %v2454_v39  ;;  %v8492_v60 = vld [vmem:[#allocation3_spill] sm:$0xff] }
 0x205   : > { %3309 = vmatpush1.msra.mxu0 %v3014_v54  ;;  %5285 = vmatpush1.msra.mxu1 %v3014_v54  ;;  %v2187_v54 = vadd.f32 %v8460_v9, %v8459_v34  ;;  %v922_v44 = vadd.f32 %v8470_v45, %v8469_v38  ;;  %v2452_v34 = vadd.f32 %v8477_v20, %v2184_v2  ;;  %v8484_v45 = vld [vmem:[#allocation5_spill] sm:$0xff]  ;;  %v8487_v2 = vld [vmem:[#allocation42_spill] sm:$0xff] }
 0x206   : > { %v7060_v42 = vpop.f32.mrf.mxu0  ;;  %3310 = vmatprep.subr.mxu0 %v8424_v22  ;;  %5254 = vmatprep.subr.mxu1 %v8424_v22  ;;  %v3009_v47 = vadd.f32 %v6957_v30, %v2970_v56 }
 0x207   : > { %3311 = vmatpush1.msra.mxu0 %v3013_v19  ;;  %5286 = vmatpush1.msra.mxu1 %v3013_v19  ;;  %v2696_v19 = vadd.f32 %v8466_v7, %v2424_v5  ;;  %v2455_v63 = vadd.f32 %v8467_v41, %v2187_v54  ;;  %v8474_v5 = vld [vmem:[#allocation86_spill] sm:$0xff]  ;;  %v1367_v56 = vadd.f32 %v8475_v50, %v922_v44  ;;  %v8485_v44 = vld [vmem:[#allocation4_spill] sm:$0xff] }
 0x208   : > { %v7073_v32 = vpop.f32.mrf.mxu0  ;;  %3312 = vmatprep.subr.mxu0 %v8424_v22  ;;  %5255 = vmatprep.subr.mxu1 %v8424_v22  ;;  %v8478_v54 = vld [vmem:[#allocation26_spill] sm:$0xff]  ;;  %v2724_v53 = vadd.f32 %v7071_v4, %v2452_v34  ;;  %v8488_v4 = vld [vmem:[#allocation77_spill] sm:$0xff]  ;;  %v8490_v50 = vld [vmem:[#allocation24_spill] sm:$0xff] }
 0x209   : > { %3313 = vmatpush1.msra.mxu0 %v3012_v14  ;;  %5287 = vmatpush1.msra.mxu1 %v3012_v14  ;;  %v1911_v14 = vadd.f32 %v8471_v28, %v1639_v48  ;;  %v2967_v62 = vadd.f32 %v8474_v5, %v2696_v19  ;;  %v1365_v29 = vadd.f32 %v8478_v54, %v6980_v46  ;;  %v8482_v19 = vld [vmem:[#allocation27_spill] sm:$0xff]  ;;  %v8483_v41 = vld [vmem:[#allocation78_spill] sm:$0xff] }
 0x20a   : > { %v7085_v17 = vpop.f32.mrf.mxu0  ;;  %3314 = vmatprep.subr.mxu0 %v8424_v22  ;;  %5256 = vmatprep.subr.mxu1 %v8424_v22  ;;  %v2727_v52 = vadd.f32 %v5195_v49, %v2455_v63  ;;  %v2725_v48 = vadd.f32 %v7048_v13, %v8481_v3  ;;  %v1635_v49 = vadd.f32 %v8482_v19, %v1367_v56  ;;  %v8500_v19 = vld [vmem:[#allocation37_spill] sm:$0xff] }
 0x20b   : > { %3315 = vmatpush1.msra.mxu0 %v3011_v6  ;;  %5288 = vmatpush1.msra.mxu1 %v3011_v6  ;;  %v8476_v6 = vld [vmem:[#allocation30_spill] sm:$0xff]  ;;  %v3006_v46 = vadd.f32 %v6957_v30, %v2967_v62  ;;  %v902_v28 = vadd.f32 %v8485_v44, %v8484_v45  ;;  %v2723_v39 = vadd.f32 %v6998_v35, %v8488_v4  ;;  %v8489_v62 = vld [vmem:[#allocation23_spill] sm:$0xff]  ;;  %v8508_v4 = vld [vmem:[#allocation93_spill] sm:$0xff] }
 0x20c   : > { %v7096_v36 = vpop.f32.mrf.mxu0  ;;  %3316 = vmatprep.subr.mxu0 %v8424_v22  ;;  %5257 = vmatprep.subr.mxu1 %v8424_v22  ;;  %v1637_v37 = vadd.f32 %v8476_v6, %v1369_v11  ;;  %v1633_v56 = vadd.f32 %v8490_v50, %v1365_v29  ;;  %v8491_v6 = vld [vmem:[#allocation76_spill] sm:$0xff] }
 0x20d   : > { %3317 = vmatpush1.msra.mxu0 %v3010_v27  ;;  %5289 = vmatpush1.msra.mxu1 %v3010_v27  ;;  %v8480_v27 = vld [vmem:[#allocation44_spill] sm:$0xff]  ;;  %v2994_v34 = vadd.f32 %v7085_v17, %v2723_v39 }
 0x20e   : > { %v5242_v8 = vpop.f32.mrf.mxu0  ;;  %3318 = vmatprep.subr.mxu0 %v8424_v22  ;;  %5258 = vmatprep.subr.mxu1 %v8424_v22  ;;  %v1909_v51 = vadd.f32 %v8479_v15, %v1637_v37  ;;  %v2182_v11 = vadd.f32 %v8480_v27, %v1911_v14  ;;  %v8486_v14 = vld [vmem:[#allocation41_spill] sm:$0xff]  ;;  %v8495_v29 = vld [vmem:[#allocation40_spill] sm:$0xff] }
 0x20f   : > { %3319 = vmatpush1.msra.mxu0 %v3009_v47  ;;  %5290 = vmatpush1.msra.mxu1 %v3009_v47  ;;  %v2996_v13 = vadd.f32 %v5242_v8, %v2725_v48  ;;  %v1907_v12 = vadd.f32 %v8486_v14, %v1635_v49  ;;  %v8498_v48 = vld [vmem:[#allocation21_spill] sm:$0xff] }
 0x210   : > { %v2948_v9 = vpop.f32.mrf.mxu0  ;;  %3320 = vmatprep.subr.mxu0 %v8424_v22  ;;  %5259 = vmatprep.subr.mxu1 %v8424_v22  ;;  %v2450_v63 = vadd.f32 %v8483_v41, %v2182_v11  ;;  %v2180_v55 = vadd.f32 %v8487_v2, %v1909_v51  ;;  %v8496_v51 = vld [vmem:[#allocation75_spill] sm:$0xff]  ;;  %v8497_v11 = vld [vmem:[#allocation20_spill] sm:$0xff]  ;;  %v8501_v41 = vld [vmem:[#allocation38_spill] sm:$0xff] }
 0x211   : > { %3321 = vmatpush1.msra.mxu0 %v3008_v26  ;;  %5291 = vmatpush1.msra.mxu1 %v3008_v26  ;;  %v2995_v8 = vadd.f32 %v2948_v9, %v2724_v53  ;;  %v1363_v26 = vadd.f32 %v8489_v62, %v902_v28  ;;  %v3035_v35 = vadd.f32 %v6957_v30, %v2996_v13  ;;  %v8493_v9 = vld [vmem:[#allocation2_spill] sm:$0xff]  ;;  %v8502_v53 = vld [vmem:[#allocation73_spill] sm:$0xff]  ;;  %v8510_v62 = vld [vmem:[#allocation95_spill] sm:$0xff] }
 0x212   : > { %v5245_v43 = vpop.f32.mrf.mxu0  ;;  %3322 = vmatprep.subr.mxu0 %v8424_v22  ;;  %5260 = vmatprep.subr.mxu1 %v8424_v22  ;;  %v2448_v37 = vadd.f32 %v8491_v6, %v2180_v55  ;;  %v2722_v20 = vadd.f32 %v7024_v31, %v2450_v63  ;;  %v892_v54 = vadd.f32 %v8493_v9, %v8492_v60  ;;  %v8507_v55 = vld [vmem:[#allocation71_spill] sm:$0xff]  ;;  %v8511_v6 = vld [vmem:[#allocation34_spill] sm:$0xff] }
 0x213   : > { %v2998_v7 = vadd.f32 %v5245_v43, %v2727_v52  ;;  %3323 = vmatpush1.msra.mxu0 %v3007_v57  ;;  %5292 = vmatpush1.msra.mxu1 %v3007_v57  ;;  %v8494_v52 = vld [vmem:[#allocation39_spill] sm:$0xff]  ;;  %v2178_v15 = vadd.f32 %v8495_v29, %v1907_v12  ;;  %v2721_v31 = vadd.f32 %v6952_v33, %v8496_v51  ;;  %v8506_v12 = vld [vmem:[#allocation36_spill] sm:$0xff] }
 0x214   : > { %v2958_v10 = vpop.f32.mrf.mxu0  ;;  %3324 = vmatprep.subr.mxu0 %v8424_v22  ;;  %5261 = vmatprep.subr.mxu1 %v8424_v22  ;;  %v1905_v57 = vadd.f32 %v8494_v52, %v1633_v56  ;;  %v2993_v17 = vadd.f32 %v7096_v36, %v2722_v20  ;;  %v3034_v27 = vadd.f32 %v6957_v30, %v2995_v8  ;;  %v8513_v20 = vld [vmem:[#allocation88_spill] sm:$0xff] }
 0x215   : > { %v3037_v47 = vadd.f32 %v6957_v30, %v2998_v7  ;;  %v2997_v38 = vadd.f32 %v2958_v10, %v2726_v21  ;;  %3325 = vmatpush1.msra.mxu0 %v3006_v46  ;;  %5293 = vmatpush1.msra.mxu1 %v3006_v46  ;;  %v1361_v3 = vadd.f32 %v8497_v11, %v892_v54  ;;  %v8499_v21 = vld [vmem:[#allocation74_spill] sm:$0xff]  ;;  %v8515_v54 = vld [vmem:[#allocation91_spill] sm:$0xff] }
 0x216   : > { %3326 = vmatprep.subr.mxu0 %v8424_v22  ;;  %5262 = vmatprep.subr.mxu1 %v8424_v22  ;;  %v1631_v43 = vadd.f32 %v8498_v48, %v1363_v26  ;;  %v2446_v46 = vadd.f32 %v8499_v21, %v2178_v15  ;;  %v2720_v7 = vadd.f32 %v6970_v23, %v2448_v37  ;;  %v8512_v37 = vld [vmem:[#allocation69_spill] sm:$0xff]  ;;  %v8517_v15 = vld [vmem:[#allocation82_spill] sm:$0xff] }
 0x217   : > { %v3036_v5 = vadd.f32 %v6957_v30, %v2997_v38  ;;  %3327 = vmatpush2.msra.mxu0 %v3037_v47  ;;  %5294 = vmatpush2.msra.mxu1 %v3037_v47  ;;  %v2992_v33 = vadd.f32 %v7060_v42, %v2721_v31  ;;  %v3033_v36 = vadd.f32 %v6957_v30, %v2994_v34  ;;  %v8503_v42 = vld [vmem:[#allocation18_spill] sm:$0xff]  ;;  %v8504_v38 = vld [vmem:[#allocation72_spill] sm:$0xff] }
 0x218   : > { %3328 = vmatprep.subr.mxu0 %v8424_v22  ;;  %5263 = vmatprep.subr.mxu1 %v8424_v22  ;;  %v1903_v49 = vadd.f32 %v8500_v19, %v1631_v43  ;;  %v2176_v63 = vadd.f32 %v8501_v41, %v1905_v57  ;;  %v2719_v10 = vadd.f32 %v6932_v1, %v8502_v53  ;;  %v3038_v21 = vld [vmem:[%s8135_s3] sm:$0xff]  ;;  %v3157_v41 = vld [vmem:[%s8135_s3 + $0x3b8] sm:$0xff]  ;;  %v3156_v53 = vld [vmem:[%s8135_s3 + $0x3b0] sm:$0xff] }
 0x219   : > { %3329 = vmatpush2.msra.mxu0 %v3036_v5  ;;  %5295 = vmatpush2.msra.mxu1 %v3036_v5  ;;  %v2991_v13 = vadd.f32 %v7073_v32, %v2720_v7  ;;  %v3032_v23 = vadd.f32 %v6957_v30, %v2993_v17  ;;  %v1629_v47 = vadd.f32 %v8503_v42, %v1361_v3  ;;  %v8505_v32 = vld [vmem:[#allocation35_spill] sm:$0xff]  ;;  %v3152_v7 = vld [vmem:[%s8135_s3 + $0x390] sm:$0xff]  ;;  %v3154_v19 = vld [vmem:[%s8135_s3 + $0x3a0] sm:$0xff] }
 0x21a   : > { %3330 = vmatprep.subr.mxu0 %v8424_v22  ;;  %5264 = vmatprep.subr.mxu1 %v8424_v22  ;;  %v2444_v45 = vadd.f32 %v8504_v38, %v2176_v63  ;;  %v2718_v44 = vadd.f32 %v6940_v25, %v2446_v46  ;;  %v2990_v28 = vadd.f32 %v7036_v58, %v2719_v10  ;;  %v8509_v58 = vld [vmem:[#allocation70_spill] sm:$0xff]  ;;  %v3153_v46 = vld [vmem:[%s8135_s3 + $0x398] sm:$0xff]  ;;  %v3044_v10 = vld [vmem:[%s8135_s3 + $0x30] sm:$0xff] }
 0x21b   : > { %3331 = vmatpush2.msra.mxu0 %v3035_v35  ;;  %5296 = vmatpush2.msra.mxu1 %v3035_v35  ;;  %v3031_v1 = vadd.f32 %v6957_v30, %v2992_v33  ;;  %v1901_v14 = vadd.f32 %v8505_v32, %v1629_v47  ;;  %v2174_v2 = vadd.f32 %v8506_v12, %v1903_v49  ;;  %v3155_v33 = vld [vmem:[%s8135_s3 + $0x3a8] sm:$0xff]  ;;  %v3042_v49 = vld [vmem:[%s8135_s3 + $0x20] sm:$0xff]  ;;  %v3045_v63 = vld [vmem:[%s8135_s3 + $0x38] sm:$0xff] }
 0x21c   : > { %3332 = vmatprep.subr.mxu0 %v8424_v22  ;;  %5265 = vmatprep.subr.mxu1 %v8424_v22  ;;  %v2717_v39 = vadd.f32 %v8508_v4, %v8507_v55  ;;  %v2989_v8 = vadd.f32 %v7050_v0, %v2718_v44  ;;  %v3030_v25 = vadd.f32 %v6957_v30, %v2991_v13  ;;  %v3159_v13 = vld [vmem:[%s8135_s3 + $0x3c8] sm:$0xff]  ;;  %v3158_v42 = vld [vmem:[%s8135_s3 + $0x3c0] sm:$0xff]  ;;  %v3161_v38 = vld [vmem:[%s8135_s3 + $0x3d8] sm:$0xff] }
 0x21d   : > { %3333 = vmatpush2.msra.mxu0 %v3034_v27  ;;  %5297 = vmatpush2.msra.mxu1 %v3034_v27  ;;  %v2442_v5 = vadd.f32 %v8509_v58, %v2174_v2  ;;  %v2716_v26 = vadd.f32 %v8510_v62, %v2444_v45  ;;  %v3029_v56 = vadd.f32 %v6957_v30, %v2990_v28  ;;  %v3046_v47 = vld [vmem:[%s8135_s3 + $0x40] sm:$0xff]  ;;  %v3049_v45 = vld [vmem:[%s8135_s3 + $0x58] sm:$0xff]  ;;  %v3160_v44 = vld [vmem:[%s8135_s3 + $0x3d0] sm:$0xff] }
 0x21e   : > { %3334 = vmatprep.subr.mxu0 %v8424_v22  ;;  %5266 = vmatprep.subr.mxu1 %v8424_v22  ;;  %v2988_v50 = vadd.f32 %v7011_v61, %v2717_v39  ;;  %v2172_v0 = vadd.f32 %v8511_v6, %v1901_v14  ;;  %v2715_v34 = vadd.f32 %v8513_v20, %v8512_v37  ;;  %v8514_v61 = vld [vmem:[#allocation68_spill] sm:$0xff]  ;;  %v3051_v32 = vld [vmem:[%s8135_s3 + $0x68] sm:$0xff]  ;;  %v3162_v14 = vld [vmem:[%s8135_s3 + $0x3e0] sm:$0xff] }
 0x21f   : > { %3335 = vmatpush2.msra.mxu0 %v3033_v36  ;;  %5298 = vmatpush2.msra.mxu1 %v3033_v36  ;;  %v2987_v35 = vadd.f32 %v7026_v24, %v2716_v26  ;;  %v3028_v60 = vadd.f32 %v6957_v30, %v2989_v8  ;;  %v2714_v52 = vadd.f32 %v8515_v54, %v2442_v5  ;;  %v8516_v24 = vld [vmem:[#allocation67_spill] sm:$0xff]  ;;  %v3048_v28 = vld [vmem:[%s8135_s3 + $0x50] sm:$0xff]  ;;  %v3050_v12 = vld [vmem:[%s8135_s3 + $0x60] sm:$0xff] }
 0x220   : > { %3336 = vmatprep.subr.mxu0 %v8424_v22  ;;  %5267 = vmatprep.subr.mxu1 %v8424_v22  ;;  %v2440_v9 = vadd.f32 %v8514_v61, %v2172_v0  ;;  %v2986_v57 = vadd.f32 %v6984_v18, %v2715_v34  ;;  %v3027_v29 = vadd.f32 %v6957_v30, %v2988_v50  ;;  %v8518_v18 = vld [vmem:[#allocation85_spill] sm:$0xff]  ;;  %v3043_v36 = vld [vmem:[%s8135_s3 + $0x28] sm:$0xff]  ;;  %v3164_v4 = vld [vmem:[%s8135_s3 + $0x3f0] sm:$0xff] }
 0x221   : > { %3337 = vmatpush2.msra.mxu0 %v3032_v23  ;;  %5299 = vmatpush2.msra.mxu1 %v3032_v23  ;;  %v2713_v51 = vadd.f32 %v8517_v15, %v8516_v24  ;;  %v2985_v31 = vadd.f32 %v7000_v59, %v2714_v52  ;;  %v3026_v17 = vadd.f32 %v6957_v30, %v2987_v35  ;;  %v3047_v23 = vld [vmem:[%s8135_s3 + $0x48] sm:$0xff]  ;;  %v3165_v2 = vld [vmem:[%s8135_s3 + $0x3f8] sm:$0xff]  ;;  %v3052_v39 = vld [vmem:[%s8135_s3 + $0x70] sm:$0xff] }
 0x222   : > { %3338 = vmatprep.subr.mxu0 %v8424_v22  ;;  %5268 = vmatprep.subr.mxu1 %v8424_v22  ;;  %v2712_v27 = vadd.f32 %v8518_v18, %v2440_v9  ;;  %v3025_v3 = vadd.f32 %v6957_v30, %v2986_v57  ;;  %v3053_v55 = vld [vmem:[%s8135_s3 + $0x78] sm:$0xff]  ;;  %v3167_v8 = vld [vmem:[%s8135_s3 + $0x408] sm:$0xff]  ;;  %v3166_v58 = vld [vmem:[%s8135_s3 + $0x400] sm:$0xff] }
 0x223   : > { %3339 = vmatpush2.msra.mxu0 %v3031_v1  ;;  %5300 = vmatpush2.msra.mxu1 %v3031_v1  ;;  %v2984_v11 = vadd.f32 %v6962_v16, %v2713_v51  ;;  %v3024_v48 = vadd.f32 %v6957_v30, %v2985_v31  ;;  %v3163_v1 = vld [vmem:[%s8135_s3 + $0x3e8] sm:$0xff]  ;;  %v3054_v5 = vld [vmem:[%s8135_s3 + $0x80] sm:$0xff]  ;;  %v3169_v62 = vld [vmem:[%s8135_s3 + $0x418] sm:$0xff] }
 0x224   : > { %3340 = vmatprep.subr.mxu0 %v8424_v22  ;;  %5269 = vmatprep.subr.mxu1 %v8424_v22  ;;  %v2983_v59 = vadd.f32 %v6972_v40, %v2712_v27  ;;  %v3150_v40 = vld [vmem:[%s8135_s3 + $0x380] sm:$0xff]  ;;  %v3057_v26 = vld [vmem:[%s8135_s3 + $0x98] sm:$0xff]  ;;  %v3168_v50 = vld [vmem:[%s8135_s3 + $0x410] sm:$0xff] }
 0x225   : > { %3341 = vmatpush2.msra.mxu0 %v3030_v25  ;;  %5301 = vmatpush2.msra.mxu1 %v3030_v25  ;;  %v3023_v16 = vadd.f32 %v6957_v30, %v2984_v11  ;;  %v3055_v25 = vld [vmem:[%s8135_s3 + $0x88] sm:$0xff]  ;;  %v3170_v37 = vld [vmem:[%s8135_s3 + $0x420] sm:$0xff]  ;;  %v3173_v34 = vld [vmem:[%s8135_s3 + $0x438] sm:$0xff] }
 0x226   : > { %3342 = vmatprep.subr.mxu0 %v8424_v22  ;;  %5270 = vmatprep.subr.mxu1 %v8424_v22  ;;  %v3022_v43 = vadd.f32 %v6957_v30, %v2983_v59  ;;  %v3041_v30 = vld [vmem:[%s8135_s3 + $0x18] sm:$0xff]  ;;  %v3171_v6 = vld [vmem:[%s8135_s3 + $0x428] sm:$0xff]  ;;  %v3058_v20 = vld [vmem:[%s8135_s3 + $0xa0] sm:$0xff] }
 0x227   : > { %3343 = vmatpush2.msra.mxu0 %v3029_v56  ;;  %5302 = vmatpush2.msra.mxu1 %v3029_v56  ;;  %v3056_v56 = vld [vmem:[%s8135_s3 + $0x90] sm:$0xff]  ;;  %v3059_v0 = vld [vmem:[%s8135_s3 + $0xa8] sm:$0xff]  ;;  %v3061_v35 = vld [vmem:[%s8135_s3 + $0xb8] sm:$0xff] }
 0x228   : > { %3344 = vmatprep.subr.mxu0 %v8424_v22  ;;  %5271 = vmatprep.subr.mxu1 %v8424_v22  ;;  %v3060_v61 = vld [vmem:[%s8135_s3 + $0xb0] sm:$0xff]  ;;  %v3175_v9 = vld [vmem:[%s8135_s3 + $0x448] sm:$0xff]  ;;  %v3174_v52 = vld [vmem:[%s8135_s3 + $0x440] sm:$0xff] }
 0x229   : > { %3345 = vmatpush2.msra.mxu0 %v3028_v60  ;;  %5303 = vmatpush2.msra.mxu1 %v3028_v60  ;;  %v3172_v60 = vld [vmem:[%s8135_s3 + $0x430] sm:$0xff]  ;;  %v3063_v54 = vld [vmem:[%s8135_s3 + $0xc8] sm:$0xff]  ;;  %v3062_v57 = vld [vmem:[%s8135_s3 + $0xc0] sm:$0xff] }
 0x22a   : > { %3346 = vmatprep.subr.mxu0 %v8424_v22  ;;  %5272 = vmatprep.subr.mxu1 %v8424_v22  ;;  %v3065_v24 = vld [vmem:[%s8135_s3 + $0xd8] sm:$0xff]  ;;  %v3176_v15 = vld [vmem:[%s8135_s3 + $0x450] sm:$0xff]  ;;  %v3179_v31 = vld [vmem:[%s8135_s3 + $0x468] sm:$0xff] }
 0x22b   : > { %3347 = vmatpush2.msra.mxu0 %v3027_v29  ;;  %5304 = vmatpush2.msra.mxu1 %v3027_v29  ;;  %v3177_v29 = vld [vmem:[%s8135_s3 + $0x458] sm:$0xff]  ;;  %v3064_v51 = vld [vmem:[%s8135_s3 + $0xd0] sm:$0xff]  ;;  %v3178_v18 = vld [vmem:[%s8135_s3 + $0x460] sm:$0xff] }
 0x22c   : > { %3348 = vmatprep.subr.mxu0 %v8424_v22  ;;  %5273 = vmatprep.subr.mxu1 %v8424_v22  ;;  %v3066_v27 = vld [vmem:[%s8135_s3 + $0xe0] sm:$0xff]  ;;  %v3181_v11 = vld [vmem:[%s8135_s3 + $0x478] sm:$0xff]  ;;  %v3180_v59 = vld [vmem:[%s8135_s3 + $0x470] sm:$0xff] }
 0x22d   : > { %3349 = vmatpush2.msra.mxu0 %v3026_v17  ;;  %5305 = vmatpush2.msra.mxu1 %v3026_v17  ;;  %v3067_v17 = vld [vmem:[%s8135_s3 + $0xe8] sm:$0xff] }
 0x22e   : > { %3350 = vmatprep.subr.mxu0 %v8424_v22  ;;  %5274 = vmatprep.subr.mxu1 %v8424_v22 }
 0x22f   : > { %3351 = vmatpush2.msra.mxu0 %v3025_v3  ;;  %5306 = vmatpush2.msra.mxu1 %v3025_v3  ;;  %v3069_v3 = vld [vmem:[%s8135_s3 + $0xf8] sm:$0xff] }
 0x230   : > { %3352 = vmatprep.subr.mxu0 %v8424_v22  ;;  %5275 = vmatprep.subr.mxu1 %v8424_v22 }
 0x231   : > { %3353 = vmatpush2.msra.mxu0 %v3024_v48  ;;  %5307 = vmatpush2.msra.mxu1 %v3024_v48  ;;  %v3068_v48 = vld [vmem:[%s8135_s3 + $0xf0] sm:$0xff] }
 0x232   : > { %3354 = vmatprep.subr.mxu0 %v8424_v22  ;;  %5276 = vmatprep.subr.mxu1 %v8424_v22 }
 0x233   : > { %3355 = vmatpush2.msra.mxu0 %v3023_v16  ;;  %5308 = vmatpush2.msra.mxu1 %v3023_v16  ;;  %v3183_v16 = vld [vmem:[%s8135_s3 + $0x488] sm:$0xff] }
 0x234   : > { %3356 = vmatprep.subr.mxu0 %v8424_v22  ;;  %5277 = vmatprep.subr.mxu1 %v8424_v22  ;;  %v3040_v22 = vld [vmem:[%s8135_s3 + $0x10] sm:$0xff] }
 0x235   : > { %3357 = vmatpush2.msra.mxu0 %v3022_v43  ;;  %5309 = vmatpush2.msra.mxu1 %v3022_v43  ;;  %v3071_v43 = vld [vmem:[%s8135_s3 + $0x108] sm:$0xff] }
 0x236   : > { %3639 = vmatmul.mubr.f32.vlgmr.msra.gmra.mxu1 %v3150_v40  ;;  %3359 = vmatmul.mubr.f32.vlgmr.msra.gmra.mxu0 %v3038_v21  ;;  %v3182_v40 = vld [vmem:[%s8135_s3 + $0x480] sm:$0xff] }
 0x237   : > { %3643 = vmatprep.mubr.f32.mxu1 %v3153_v46  ;;  %3363 = vmatprep.mubr.f32.mxu0 %v3041_v30  ;;  %v3070_v21 = vld [vmem:[%s8135_s3 + $0x100] sm:$0xff]  ;;  %v3185_v46 = vld [vmem:[%s8135_s3 + $0x498] sm:$0xff] }
 0x238   : > { %v3073_v30 = vld [vmem:[%s8135_s3 + $0x118] sm:$0xff] }
 0x23a   : > { %3644 = vmatmul.mubr.f32.gmra.mxu1 %v3152_v7  ;;  %3364 = vmatmul.mubr.f32.gmra.mxu0 %v3040_v22  ;;  %v3184_v7 = vld [vmem:[%s8135_s3 + $0x490] sm:$0xff] }
 0x23b   : > { %3648 = vmatprep.mubr.f32.mxu1 %v3155_v33  ;;  %3368 = vmatprep.mubr.f32.mxu0 %v3043_v36  ;;  %v3072_v22 = vld [vmem:[%s8135_s3 + $0x110] sm:$0xff]  ;;  %v3187_v33 = vld [vmem:[%s8135_s3 + $0x4a8] sm:$0xff] }
 0x23c   : > { %v3075_v36 = vld [vmem:[%s8135_s3 + $0x128] sm:$0xff] }
 0x23e   : > { %3649 = vmatmul.mubr.f32.gmra.mxu1 %v3154_v19  ;;  %3369 = vmatmul.mubr.f32.gmra.mxu0 %v3042_v49  ;;  %v3186_v19 = vld [vmem:[%s8135_s3 + $0x4a0] sm:$0xff] }
 0x23f   : > { %3653 = vmatprep.mubr.f32.mxu1 %v3157_v41  ;;  %3373 = vmatprep.mubr.f32.mxu0 %v3045_v63  ;;  %v3074_v49 = vld [vmem:[%s8135_s3 + $0x120] sm:$0xff]  ;;  %v3189_v41 = vld [vmem:[%s8135_s3 + $0x4b8] sm:$0xff] }
 0x240   : > { %v3077_v63 = vld [vmem:[%s8135_s3 + $0x138] sm:$0xff] }
 0x242   : > { %3654 = vmatmul.mubr.f32.gmra.mxu1 %v3156_v53  ;;  %3374 = vmatmul.mubr.f32.gmra.mxu0 %v3044_v10  ;;  %v3188_v53 = vld [vmem:[%s8135_s3 + $0x4b0] sm:$0xff] }
 0x243   : > { %3658 = vmatprep.mubr.f32.mxu1 %v3159_v13  ;;  %3378 = vmatprep.mubr.f32.mxu0 %v3047_v23  ;;  %v3076_v10 = vld [vmem:[%s8135_s3 + $0x130] sm:$0xff]  ;;  %v3191_v13 = vld [vmem:[%s8135_s3 + $0x4c8] sm:$0xff] }
 0x244   : > { %v3079_v23 = vld [vmem:[%s8135_s3 + $0x148] sm:$0xff] }
 0x246   : > { %3659 = vmatmul.mubr.f32.gmra.mxu1 %v3158_v42  ;;  %3379 = vmatmul.mubr.f32.gmra.mxu0 %v3046_v47  ;;  %v3190_v42 = vld [vmem:[%s8135_s3 + $0x4c0] sm:$0xff] }
 0x247   : > { %3663 = vmatprep.mubr.f32.mxu1 %v3161_v38  ;;  %3383 = vmatprep.mubr.f32.mxu0 %v3049_v45  ;;  %v3078_v47 = vld [vmem:[%s8135_s3 + $0x140] sm:$0xff]  ;;  %v3193_v38 = vld [vmem:[%s8135_s3 + $0x4d8] sm:$0xff] }
 0x248   : > { %v3081_v45 = vld [vmem:[%s8135_s3 + $0x158] sm:$0xff] }
 0x24a   : > { %3664 = vmatmul.mubr.f32.gmra.mxu1 %v3160_v44  ;;  %3384 = vmatmul.mubr.f32.gmra.mxu0 %v3048_v28  ;;  %v3192_v44 = vld [vmem:[%s8135_s3 + $0x4d0] sm:$0xff] }
 0x24b   : > { %3668 = vmatprep.mubr.f32.mxu1 %v3163_v1  ;;  %3388 = vmatprep.mubr.f32.mxu0 %v3051_v32  ;;  %v3080_v28 = vld [vmem:[%s8135_s3 + $0x150] sm:$0xff]  ;;  %v3195_v1 = vld [vmem:[%s8135_s3 + $0x4e8] sm:$0xff] }
 0x24c   : > { %v3083_v32 = vld [vmem:[%s8135_s3 + $0x168] sm:$0xff] }
 0x24e   : > { %3669 = vmatmul.mubr.f32.gmra.mxu1 %v3162_v14  ;;  %3389 = vmatmul.mubr.f32.gmra.mxu0 %v3050_v12  ;;  %v3194_v14 = vld [vmem:[%s8135_s3 + $0x4e0] sm:$0xff] }
 0x24f   : > { %3673 = vmatprep.mubr.f32.mxu1 %v3165_v2  ;;  %3393 = vmatprep.mubr.f32.mxu0 %v3053_v55  ;;  %v3082_v12 = vld [vmem:[%s8135_s3 + $0x160] sm:$0xff]  ;;  %v3197_v2 = vld [vmem:[%s8135_s3 + $0x4f8] sm:$0xff] }
 0x250   : > { %v3085_v55 = vld [vmem:[%s8135_s3 + $0x178] sm:$0xff] }
 0x252   : > { %3674 = vmatmul.mubr.f32.gmra.mxu1 %v3164_v4  ;;  %3394 = vmatmul.mubr.f32.gmra.mxu0 %v3052_v39  ;;  %v3196_v4 = vld [vmem:[%s8135_s3 + $0x4f0] sm:$0xff] }
 0x253   : > { %3678 = vmatprep.mubr.f32.mxu1 %v3167_v8  ;;  %3398 = vmatprep.mubr.f32.mxu0 %v3055_v25  ;;  %v3084_v39 = vld [vmem:[%s8135_s3 + $0x170] sm:$0xff]  ;;  %v3199_v8 = vld [vmem:[%s8135_s3 + $0x508] sm:$0xff] }
 0x254   : > { %v3087_v25 = vld [vmem:[%s8135_s3 + $0x188] sm:$0xff] }
 0x256   : > { %3679 = vmatmul.mubr.f32.gmra.mxu1 %v3166_v58  ;;  %3399 = vmatmul.mubr.f32.gmra.mxu0 %v3054_v5  ;;  %v3198_v58 = vld [vmem:[%s8135_s3 + $0x500] sm:$0xff] }
 0x257   : > { %3683 = vmatprep.mubr.f32.mxu1 %v3169_v62  ;;  %3403 = vmatprep.mubr.f32.mxu0 %v3057_v26  ;;  %v3086_v5 = vld [vmem:[%s8135_s3 + $0x180] sm:$0xff]  ;;  %v3201_v62 = vld [vmem:[%s8135_s3 + $0x518] sm:$0xff] }
 0x258   : > { %v3089_v26 = vld [vmem:[%s8135_s3 + $0x198] sm:$0xff] }
 0x25a   : > { %3684 = vmatmul.mubr.f32.gmra.mxu1 %v3168_v50  ;;  %3404 = vmatmul.mubr.f32.gmra.mxu0 %v3056_v56  ;;  %v3200_v50 = vld [vmem:[%s8135_s3 + $0x510] sm:$0xff] }
 0x25b   : > { %3688 = vmatprep.mubr.f32.mxu1 %v3171_v6  ;;  %3408 = vmatprep.mubr.f32.mxu0 %v3059_v0  ;;  %v3088_v56 = vld [vmem:[%s8135_s3 + $0x190] sm:$0xff]  ;;  %v3203_v6 = vld [vmem:[%s8135_s3 + $0x528] sm:$0xff] }
 0x25c   : > { %v3091_v0 = vld [vmem:[%s8135_s3 + $0x1a8] sm:$0xff] }
 0x25e   : > { %3689 = vmatmul.mubr.f32.gmra.mxu1 %v3170_v37  ;;  %3409 = vmatmul.mubr.f32.gmra.mxu0 %v3058_v20  ;;  %v3202_v37 = vld [vmem:[%s8135_s3 + $0x520] sm:$0xff] }
 0x25f   : > { %3693 = vmatprep.mubr.f32.mxu1 %v3173_v34  ;;  %3413 = vmatprep.mubr.f32.mxu0 %v3061_v35  ;;  %v3090_v20 = vld [vmem:[%s8135_s3 + $0x1a0] sm:$0xff]  ;;  %v3205_v34 = vld [vmem:[%s8135_s3 + $0x538] sm:$0xff] }
 0x260   : > { %v3093_v35 = vld [vmem:[%s8135_s3 + $0x1b8] sm:$0xff] }
 0x262   : > { %3694 = vmatmul.mubr.f32.gmra.mxu1 %v3172_v60  ;;  %3414 = vmatmul.mubr.f32.gmra.mxu0 %v3060_v61  ;;  %v3204_v60 = vld [vmem:[%s8135_s3 + $0x530] sm:$0xff] }
 0x263   : > { %3698 = vmatprep.mubr.f32.mxu1 %v3175_v9  ;;  %3418 = vmatprep.mubr.f32.mxu0 %v3063_v54  ;;  %v3092_v61 = vld [vmem:[%s8135_s3 + $0x1b0] sm:$0xff]  ;;  %v3207_v9 = vld [vmem:[%s8135_s3 + $0x548] sm:$0xff] }
 0x264   : > { %v3095_v54 = vld [vmem:[%s8135_s3 + $0x1c8] sm:$0xff] }
 0x266   : > { %3699 = vmatmul.mubr.f32.gmra.mxu1 %v3174_v52  ;;  %3419 = vmatmul.mubr.f32.gmra.mxu0 %v3062_v57  ;;  %v3206_v52 = vld [vmem:[%s8135_s3 + $0x540] sm:$0xff] }
 0x267   : > { %3703 = vmatprep.mubr.f32.mxu1 %v3177_v29  ;;  %3423 = vmatprep.mubr.f32.mxu0 %v3065_v24  ;;  %v3094_v57 = vld [vmem:[%s8135_s3 + $0x1c0] sm:$0xff]  ;;  %v3209_v29 = vld [vmem:[%s8135_s3 + $0x558] sm:$0xff] }
 0x268   : > { %v3097_v24 = vld [vmem:[%s8135_s3 + $0x1d8] sm:$0xff] }
 0x26a   : > { %3704 = vmatmul.mubr.f32.gmra.mxu1 %v3176_v15  ;;  %3424 = vmatmul.mubr.f32.gmra.mxu0 %v3064_v51  ;;  %v3208_v15 = vld [vmem:[%s8135_s3 + $0x550] sm:$0xff] }
 0x26b   : > { %3708 = vmatprep.mubr.f32.mxu1 %v3179_v31  ;;  %3428 = vmatprep.mubr.f32.mxu0 %v3067_v17  ;;  %v3096_v51 = vld [vmem:[%s8135_s3 + $0x1d0] sm:$0xff]  ;;  %v3211_v31 = vld [vmem:[%s8135_s3 + $0x568] sm:$0xff] }
 0x26c   : > { %v3099_v17 = vld [vmem:[%s8135_s3 + $0x1e8] sm:$0xff] }
 0x26e   : > { %3709 = vmatmul.mubr.f32.gmra.mxu1 %v3178_v18  ;;  %3429 = vmatmul.mubr.f32.gmra.mxu0 %v3066_v27  ;;  %v3210_v18 = vld [vmem:[%s8135_s3 + $0x560] sm:$0xff] }
 0x26f   : > { %3713 = vmatprep.mubr.f32.mxu1 %v3181_v11  ;;  %3433 = vmatprep.mubr.f32.mxu0 %v3069_v3  ;;  %v3098_v27 = vld [vmem:[%s8135_s3 + $0x1e0] sm:$0xff]  ;;  %v3213_v11 = vld [vmem:[%s8135_s3 + $0x578] sm:$0xff] }
 0x270   : > { %v3101_v3 = vld [vmem:[%s8135_s3 + $0x1f8] sm:$0xff] }
 0x272   : > { %3714 = vmatmul.mubr.f32.gmra.mxu1 %v3180_v59  ;;  %3434 = vmatmul.mubr.f32.gmra.mxu0 %v3068_v48  ;;  %v3212_v59 = vld [vmem:[%s8135_s3 + $0x570] sm:$0xff] }
 0x273   : > { %3718 = vmatprep.mubr.f32.mxu1 %v3183_v16  ;;  %3438 = vmatprep.mubr.f32.mxu0 %v3071_v43  ;;  %v3100_v48 = vld [vmem:[%s8135_s3 + $0x1f0] sm:$0xff]  ;;  %v3215_v16 = vld [vmem:[%s8135_s3 + $0x588] sm:$0xff] }
 0x274   : > { %v3103_v43 = vld [vmem:[%s8135_s3 + $0x208] sm:$0xff] }
 0x276   : > { %3719 = vmatmul.mubr.f32.gmra.mxu1 %v3182_v40  ;;  %3439 = vmatmul.mubr.f32.gmra.mxu0 %v3070_v21  ;;  %v3214_v40 = vld [vmem:[%s8135_s3 + $0x580] sm:$0xff] }
 0x277   : > { %3723 = vmatprep.mubr.f32.mxu1 %v3185_v46  ;;  %3443 = vmatprep.mubr.f32.mxu0 %v3073_v30  ;;  %v3102_v21 = vld [vmem:[%s8135_s3 + $0x200] sm:$0xff]  ;;  %v3217_v46 = vld [vmem:[%s8135_s3 + $0x598] sm:$0xff] }
 0x278   : > { %v3105_v30 = vld [vmem:[%s8135_s3 + $0x218] sm:$0xff] }
 0x27a   : > { %3724 = vmatmul.mubr.f32.gmra.mxu1 %v3184_v7  ;;  %3444 = vmatmul.mubr.f32.gmra.mxu0 %v3072_v22  ;;  %v3216_v7 = vld [vmem:[%s8135_s3 + $0x590] sm:$0xff] }
 0x27b   : > { %3728 = vmatprep.mubr.f32.mxu1 %v3187_v33  ;;  %3448 = vmatprep.mubr.f32.mxu0 %v3075_v36  ;;  %v3104_v22 = vld [vmem:[%s8135_s3 + $0x210] sm:$0xff]  ;;  %v3219_v33 = vld [vmem:[%s8135_s3 + $0x5a8] sm:$0xff] }
 0x27c   : > { %v3107_v36 = vld [vmem:[%s8135_s3 + $0x228] sm:$0xff] }
 0x27e   : > { %3729 = vmatmul.mubr.f32.gmra.mxu1 %v3186_v19  ;;  %3449 = vmatmul.mubr.f32.gmra.mxu0 %v3074_v49  ;;  %v3218_v19 = vld [vmem:[%s8135_s3 + $0x5a0] sm:$0xff] }
 0x27f   : > { %3733 = vmatprep.mubr.f32.mxu1 %v3189_v41  ;;  %3453 = vmatprep.mubr.f32.mxu0 %v3077_v63  ;;  %v3106_v49 = vld [vmem:[%s8135_s3 + $0x220] sm:$0xff]  ;;  %v3221_v41 = vld [vmem:[%s8135_s3 + $0x5b8] sm:$0xff] }
 0x280   : > { %v3109_v63 = vld [vmem:[%s8135_s3 + $0x238] sm:$0xff] }
 0x282   : > { %3734 = vmatmul.mubr.f32.gmra.mxu1 %v3188_v53  ;;  %3454 = vmatmul.mubr.f32.gmra.mxu0 %v3076_v10  ;;  %v3220_v53 = vld [vmem:[%s8135_s3 + $0x5b0] sm:$0xff] }
 0x283   : > { %3738 = vmatprep.mubr.f32.mxu1 %v3191_v13  ;;  %3458 = vmatprep.mubr.f32.mxu0 %v3079_v23  ;;  %v3108_v10 = vld [vmem:[%s8135_s3 + $0x230] sm:$0xff]  ;;  %v3223_v13 = vld [vmem:[%s8135_s3 + $0x5c8] sm:$0xff] }
 0x284   : > { %v3111_v23 = vld [vmem:[%s8135_s3 + $0x248] sm:$0xff] }
 0x286   : > { %3739 = vmatmul.mubr.f32.gmra.mxu1 %v3190_v42  ;;  %3459 = vmatmul.mubr.f32.gmra.mxu0 %v3078_v47  ;;  %v3222_v42 = vld [vmem:[%s8135_s3 + $0x5c0] sm:$0xff] }
 0x287   : > { %3743 = vmatprep.mubr.f32.mxu1 %v3193_v38  ;;  %3463 = vmatprep.mubr.f32.mxu0 %v3081_v45  ;;  %v3110_v47 = vld [vmem:[%s8135_s3 + $0x240] sm:$0xff]  ;;  %v3225_v38 = vld [vmem:[%s8135_s3 + $0x5d8] sm:$0xff] }
 0x288   : > { %v3113_v45 = vld [vmem:[%s8135_s3 + $0x258] sm:$0xff] }
 0x28a   : > { %3744 = vmatmul.mubr.f32.gmra.mxu1 %v3192_v44  ;;  %3464 = vmatmul.mubr.f32.gmra.mxu0 %v3080_v28  ;;  %v3224_v44 = vld [vmem:[%s8135_s3 + $0x5d0] sm:$0xff] }
 0x28b   : > { %3748 = vmatprep.mubr.f32.mxu1 %v3195_v1  ;;  %3468 = vmatprep.mubr.f32.mxu0 %v3083_v32  ;;  %v3112_v28 = vld [vmem:[%s8135_s3 + $0x250] sm:$0xff]  ;;  %v3227_v1 = vld [vmem:[%s8135_s3 + $0x5e8] sm:$0xff] }
 0x28c   : > { %v3115_v32 = vld [vmem:[%s8135_s3 + $0x268] sm:$0xff] }
 0x28e   : > { %3749 = vmatmul.mubr.f32.gmra.mxu1 %v3194_v14  ;;  %3469 = vmatmul.mubr.f32.gmra.mxu0 %v3082_v12  ;;  %v3226_v14 = vld [vmem:[%s8135_s3 + $0x5e0] sm:$0xff] }
 0x28f   : > { %3753 = vmatprep.mubr.f32.mxu1 %v3197_v2  ;;  %3473 = vmatprep.mubr.f32.mxu0 %v3085_v55  ;;  %v3114_v12 = vld [vmem:[%s8135_s3 + $0x260] sm:$0xff]  ;;  %v3229_v2 = vld [vmem:[%s8135_s3 + $0x5f8] sm:$0xff] }
 0x290   : > { %v3117_v55 = vld [vmem:[%s8135_s3 + $0x278] sm:$0xff] }
 0x292   : > { %3754 = vmatmul.mubr.f32.gmra.mxu1 %v3196_v4  ;;  %3474 = vmatmul.mubr.f32.gmra.mxu0 %v3084_v39  ;;  %v3228_v4 = vld [vmem:[%s8135_s3 + $0x5f0] sm:$0xff] }
 0x293   : > { %3758 = vmatprep.mubr.f32.mxu1 %v3199_v8  ;;  %3478 = vmatprep.mubr.f32.mxu0 %v3087_v25  ;;  %v3116_v39 = vld [vmem:[%s8135_s3 + $0x270] sm:$0xff]  ;;  %v3231_v8 = vld [vmem:[%s8135_s3 + $0x608] sm:$0xff] }
 0x294   : > { %v3119_v25 = vld [vmem:[%s8135_s3 + $0x288] sm:$0xff] }
 0x296   : > { %3759 = vmatmul.mubr.f32.gmra.mxu1 %v3198_v58  ;;  %3479 = vmatmul.mubr.f32.gmra.mxu0 %v3086_v5  ;;  %v3230_v58 = vld [vmem:[%s8135_s3 + $0x600] sm:$0xff] }
 0x297   : > { %3763 = vmatprep.mubr.f32.mxu1 %v3201_v62  ;;  %3483 = vmatprep.mubr.f32.mxu0 %v3089_v26  ;;  %v3118_v5 = vld [vmem:[%s8135_s3 + $0x280] sm:$0xff]  ;;  %v3233_v62 = vld [vmem:[%s8135_s3 + $0x618] sm:$0xff] }
 0x298   : > { %v3121_v26 = vld [vmem:[%s8135_s3 + $0x298] sm:$0xff] }
 0x29a   : > { %3764 = vmatmul.mubr.f32.gmra.mxu1 %v3200_v50  ;;  %3484 = vmatmul.mubr.f32.gmra.mxu0 %v3088_v56  ;;  %v3232_v50 = vld [vmem:[%s8135_s3 + $0x610] sm:$0xff] }
 0x29b   : > { %3768 = vmatprep.mubr.f32.mxu1 %v3203_v6  ;;  %3488 = vmatprep.mubr.f32.mxu0 %v3091_v0  ;;  %v3120_v56 = vld [vmem:[%s8135_s3 + $0x290] sm:$0xff]  ;;  %v3235_v6 = vld [vmem:[%s8135_s3 + $0x628] sm:$0xff] }
 0x29c   : > { %v3123_v0 = vld [vmem:[%s8135_s3 + $0x2a8] sm:$0xff] }
 0x29e   : > { %3769 = vmatmul.mubr.f32.gmra.mxu1 %v3202_v37  ;;  %3489 = vmatmul.mubr.f32.gmra.mxu0 %v3090_v20  ;;  %v3234_v37 = vld [vmem:[%s8135_s3 + $0x620] sm:$0xff] }
 0x29f   : > { %3773 = vmatprep.mubr.f32.mxu1 %v3205_v34  ;;  %3493 = vmatprep.mubr.f32.mxu0 %v3093_v35  ;;  %v3122_v20 = vld [vmem:[%s8135_s3 + $0x2a0] sm:$0xff]  ;;  %v3237_v34 = vld [vmem:[%s8135_s3 + $0x638] sm:$0xff] }
 0x2a0   : > { %v3125_v35 = vld [vmem:[%s8135_s3 + $0x2b8] sm:$0xff] }
 0x2a2   : > { %3774 = vmatmul.mubr.f32.gmra.mxu1 %v3204_v60  ;;  %3494 = vmatmul.mubr.f32.gmra.mxu0 %v3092_v61  ;;  %v3236_v60 = vld [vmem:[%s8135_s3 + $0x630] sm:$0xff] }
 0x2a3   : > { %3778 = vmatprep.mubr.f32.mxu1 %v3207_v9  ;;  %3498 = vmatprep.mubr.f32.mxu0 %v3095_v54  ;;  %v3124_v61 = vld [vmem:[%s8135_s3 + $0x2b0] sm:$0xff]  ;;  %v3239_v9 = vld [vmem:[%s8135_s3 + $0x648] sm:$0xff] }
 0x2a4   : > { %v3127_v54 = vld [vmem:[%s8135_s3 + $0x2c8] sm:$0xff] }
 0x2a6   : > { %3779 = vmatmul.mubr.f32.gmra.mxu1 %v3206_v52  ;;  %3499 = vmatmul.mubr.f32.gmra.mxu0 %v3094_v57  ;;  %v3238_v52 = vld [vmem:[%s8135_s3 + $0x640] sm:$0xff] }
 0x2a7   : > { %3783 = vmatprep.mubr.f32.mxu1 %v3209_v29  ;;  %3503 = vmatprep.mubr.f32.mxu0 %v3097_v24  ;;  %v3126_v57 = vld [vmem:[%s8135_s3 + $0x2c0] sm:$0xff]  ;;  %v3241_v29 = vld [vmem:[%s8135_s3 + $0x658] sm:$0xff] }
 0x2a8   : > { %v3129_v24 = vld [vmem:[%s8135_s3 + $0x2d8] sm:$0xff] }
 0x2aa   : > { %3784 = vmatmul.mubr.f32.gmra.mxu1 %v3208_v15  ;;  %3504 = vmatmul.mubr.f32.gmra.mxu0 %v3096_v51  ;;  %v3240_v15 = vld [vmem:[%s8135_s3 + $0x650] sm:$0xff] }
 0x2ab   : > { %3788 = vmatprep.mubr.f32.mxu1 %v3211_v31  ;;  %3508 = vmatprep.mubr.f32.mxu0 %v3099_v17  ;;  %v3128_v51 = vld [vmem:[%s8135_s3 + $0x2d0] sm:$0xff]  ;;  %v3243_v31 = vld [vmem:[%s8135_s3 + $0x668] sm:$0xff] }
 0x2ac   : > { %v3131_v17 = vld [vmem:[%s8135_s3 + $0x2e8] sm:$0xff] }
 0x2ae   : > { %3789 = vmatmul.mubr.f32.gmra.mxu1 %v3210_v18  ;;  %3509 = vmatmul.mubr.f32.gmra.mxu0 %v3098_v27  ;;  %v3242_v18 = vld [vmem:[%s8135_s3 + $0x660] sm:$0xff] }
 0x2af   : > { %3793 = vmatprep.mubr.f32.mxu1 %v3213_v11  ;;  %3513 = vmatprep.mubr.f32.mxu0 %v3101_v3  ;;  %v3130_v27 = vld [vmem:[%s8135_s3 + $0x2e0] sm:$0xff]  ;;  %v3245_v11 = vld [vmem:[%s8135_s3 + $0x678] sm:$0xff] }
 0x2b0   : > { %v3133_v3 = vld [vmem:[%s8135_s3 + $0x2f8] sm:$0xff] }
 0x2b2   : > { %3794 = vmatmul.mubr.f32.gmra.mxu1 %v3212_v59  ;;  %3514 = vmatmul.mubr.f32.gmra.mxu0 %v3100_v48  ;;  %v3244_v59 = vld [vmem:[%s8135_s3 + $0x670] sm:$0xff] }
 0x2b3   : > { %3798 = vmatprep.mubr.f32.mxu1 %v3215_v16  ;;  %3518 = vmatprep.mubr.f32.mxu0 %v3103_v43  ;;  %v3132_v48 = vld [vmem:[%s8135_s3 + $0x2f0] sm:$0xff]  ;;  %v3247_v16 = vld [vmem:[%s8135_s3 + $0x688] sm:$0xff] }
 0x2b4   : > { %v3135_v43 = vld [vmem:[%s8135_s3 + $0x308] sm:$0xff] }
 0x2b6   : > { %3799 = vmatmul.mubr.f32.gmra.mxu1 %v3214_v40  ;;  %3519 = vmatmul.mubr.f32.gmra.mxu0 %v3102_v21  ;;  %v3246_v40 = vld [vmem:[%s8135_s3 + $0x680] sm:$0xff] }
 0x2b7   : > { %3803 = vmatprep.mubr.f32.mxu1 %v3217_v46  ;;  %3523 = vmatprep.mubr.f32.mxu0 %v3105_v30  ;;  %v3134_v21 = vld [vmem:[%s8135_s3 + $0x300] sm:$0xff]  ;;  %v3249_v46 = vld [vmem:[%s8135_s3 + $0x698] sm:$0xff] }
 0x2b8   : > { %v3137_v30 = vld [vmem:[%s8135_s3 + $0x318] sm:$0xff] }
 0x2ba   : > { %3804 = vmatmul.mubr.f32.gmra.mxu1 %v3216_v7  ;;  %3524 = vmatmul.mubr.f32.gmra.mxu0 %v3104_v22 }
 0x2bb   : > { %3808 = vmatprep.mubr.f32.mxu1 %v3219_v33  ;;  %3528 = vmatprep.mubr.f32.mxu0 %v3107_v36  ;;  %v3248_v33 = vld [vmem:[%s8135_s3 + $0x690] sm:$0xff] }
 0x2bc   : > { %v3136_v36 = vld [vmem:[%s8135_s3 + $0x310] sm:$0xff] }
 0x2be   : > { %3809 = vmatmul.mubr.f32.gmra.mxu1 %v3218_v19  ;;  %3529 = vmatmul.mubr.f32.gmra.mxu0 %v3106_v49  ;;  %v3251_v49 = vld [vmem:[%s8135_s3 + $0x6a8] sm:$0xff] }
 0x2bf   : > { %3813 = vmatprep.mubr.f32.mxu1 %v3221_v41  ;;  %3533 = vmatprep.mubr.f32.mxu0 %v3109_v63  ;;  %v3139_v63 = vld [vmem:[%s8135_s3 + $0x328] sm:$0xff] }
 0x2c2   : > { %3814 = vmatmul.mubr.f32.gmra.mxu1 %v3220_v53  ;;  %3534 = vmatmul.mubr.f32.gmra.mxu0 %v3108_v10 }
 0x2c3   : > { %3818 = vmatprep.mubr.f32.mxu1 %v3223_v13  ;;  %3538 = vmatprep.mubr.f32.mxu0 %v3111_v23  ;;  %v3250_v13 = vld [vmem:[%s8135_s3 + $0x6a0] sm:$0xff] }
 0x2c4   : > { %v3138_v23 = vld [vmem:[%s8135_s3 + $0x320] sm:$0xff] }
 0x2c6   : > { %3819 = vmatmul.mubr.f32.gmra.mxu1 %v3222_v42  ;;  %3539 = vmatmul.mubr.f32.gmra.mxu0 %v3110_v47  ;;  %v3253_v47 = vld [vmem:[%s8135_s3 + $0x6b8] sm:$0xff] }
 0x2c7   : > { %3823 = vmatprep.mubr.f32.mxu1 %v3225_v38  ;;  %3543 = vmatprep.mubr.f32.mxu0 %v3113_v45  ;;  %v3141_v45 = vld [vmem:[%s8135_s3 + $0x338] sm:$0xff] }
 0x2ca   : > { %3824 = vmatmul.mubr.f32.gmra.mxu1 %v3224_v44  ;;  %3544 = vmatmul.mubr.f32.gmra.mxu0 %v3112_v28 }
 0x2cb   : > { %3828 = vmatprep.mubr.f32.mxu1 %v3227_v1  ;;  %3548 = vmatprep.mubr.f32.mxu0 %v3115_v32  ;;  %v3252_v1 = vld [vmem:[%s8135_s3 + $0x6b0] sm:$0xff] }
 0x2cc   : > { %v3140_v32 = vld [vmem:[%s8135_s3 + $0x330] sm:$0xff] }
 0x2ce   : > { %3829 = vmatmul.mubr.f32.gmra.mxu1 %v3226_v14  ;;  %3549 = vmatmul.mubr.f32.gmra.mxu0 %v3114_v12  ;;  %v3255_v12 = vld [vmem:[%s8135_s3 + $0x6c8] sm:$0xff] }
 0x2cf   : > { %3833 = vmatprep.mubr.f32.mxu1 %v3229_v2  ;;  %3553 = vmatprep.mubr.f32.mxu0 %v3117_v55  ;;  %v3143_v55 = vld [vmem:[%s8135_s3 + $0x348] sm:$0xff] }
 0x2d2   : > { %3834 = vmatmul.mubr.f32.gmra.mxu1 %v3228_v4  ;;  %3554 = vmatmul.mubr.f32.gmra.mxu0 %v3116_v39 }
 0x2d3   : > { %3838 = vmatprep.mubr.f32.mxu1 %v3231_v8  ;;  %3558 = vmatprep.mubr.f32.mxu0 %v3119_v25  ;;  %v3254_v8 = vld [vmem:[%s8135_s3 + $0x6c0] sm:$0xff] }
 0x2d4   : > { %v3142_v25 = vld [vmem:[%s8135_s3 + $0x340] sm:$0xff] }
 0x2d6   : > { %3839 = vmatmul.mubr.f32.gmra.mxu1 %v3230_v58  ;;  %3559 = vmatmul.mubr.f32.gmra.mxu0 %v3118_v5  ;;  %v3257_v5 = vld [vmem:[%s8135_s3 + $0x6d8] sm:$0xff] }
 0x2d7   : > { %3843 = vmatprep.mubr.f32.mxu1 %v3233_v62  ;;  %3563 = vmatprep.mubr.f32.mxu0 %v3121_v26  ;;  %v3145_v26 = vld [vmem:[%s8135_s3 + $0x358] sm:$0xff] }
 0x2da   : > { %3844 = vmatmul.mubr.f32.gmra.mxu1 %v3232_v50  ;;  %3564 = vmatmul.mubr.f32.gmra.mxu0 %v3120_v56 }
 0x2db   : > { %3848 = vmatprep.mubr.f32.mxu1 %v3235_v6  ;;  %3568 = vmatprep.mubr.f32.mxu0 %v3123_v0  ;;  %v3256_v6 = vld [vmem:[%s8135_s3 + $0x6d0] sm:$0xff] }
 0x2dc   : > { %v3144_v0 = vld [vmem:[%s8135_s3 + $0x350] sm:$0xff] }
 0x2de   : > { %3849 = vmatmul.mubr.f32.gmra.mxu1 %v3234_v37  ;;  %3569 = vmatmul.mubr.f32.gmra.mxu0 %v3122_v20  ;;  %v3259_v20 = vld [vmem:[%s8135_s3 + $0x6e8] sm:$0xff] }
 0x2df   : > { %3853 = vmatprep.mubr.f32.mxu1 %v3237_v34  ;;  %3573 = vmatprep.mubr.f32.mxu0 %v3125_v35  ;;  %v3147_v35 = vld [vmem:[%s8135_s3 + $0x368] sm:$0xff] }
 0x2e2   : > { %3854 = vmatmul.mubr.f32.gmra.mxu1 %v3236_v60  ;;  %3574 = vmatmul.mubr.f32.gmra.mxu0 %v3124_v61 }
 0x2e3   : > { %3858 = vmatprep.mubr.f32.mxu1 %v3239_v9  ;;  %3578 = vmatprep.mubr.f32.mxu0 %v3127_v54  ;;  %v3258_v9 = vld [vmem:[%s8135_s3 + $0x6e0] sm:$0xff] }
 0x2e4   : > { %v3146_v54 = vld [vmem:[%s8135_s3 + $0x360] sm:$0xff] }
 0x2e6   : > { %3859 = vmatmul.mubr.f32.gmra.mxu1 %v3238_v52  ;;  %3579 = vmatmul.mubr.f32.gmra.mxu0 %v3126_v57  ;;  %v3261_v57 = vld [vmem:[%s8135_s3 + $0x6f8] sm:$0xff] }
 0x2e7   : > { %3863 = vmatprep.mubr.f32.mxu1 %v3241_v29  ;;  %3583 = vmatprep.mubr.f32.mxu0 %v3129_v24  ;;  %v3149_v24 = vld [vmem:[%s8135_s3 + $0x378] sm:$0xff] }
 0x2ea   : > { %3864 = vmatmul.mubr.f32.gmra.mxu1 %v3240_v15  ;;  %3584 = vmatmul.mubr.f32.gmra.mxu0 %v3128_v51 }
 0x2eb   : > { %3868 = vmatprep.mubr.f32.mxu1 %v3243_v31  ;;  %3588 = vmatprep.mubr.f32.mxu0 %v3131_v17  ;;  %v3260_v31 = vld [vmem:[%s8135_s3 + $0x6f0] sm:$0xff] }
 0x2ec   : > { %v3148_v17 = vld [vmem:[%s8135_s3 + $0x370] sm:$0xff] }
 0x2ee   : > { %3869 = vmatmul.mubr.f32.gmra.mxu1 %v3242_v18  ;;  %3589 = vmatmul.mubr.f32.gmra.mxu0 %v3130_v27  ;;  %v3263_v27 = vld [vmem:[%s8135_s3 + $0x708] sm:$0xff] }
 0x2ef   : > { %3873 = vmatprep.mubr.f32.mxu1 %v3245_v11  ;;  %3593 = vmatprep.mubr.f32.mxu0 %v3133_v3 }
 0x2f2   : > { %3874 = vmatmul.mubr.f32.gmra.mxu1 %v3244_v59  ;;  %3594 = vmatmul.mubr.f32.gmra.mxu0 %v3132_v48  ;;  %v3262_v48 = vld [vmem:[%s8135_s3 + $0x700] sm:$0xff] }
 0x2f3   : > { %3878 = vmatprep.mubr.f32.mxu1 %v3247_v16  ;;  %3598 = vmatprep.mubr.f32.mxu0 %v3135_v43  ;;  %v3265_v43 = vld [vmem:[%s8135_s3 + $0x718] sm:$0xff] }
 0x2f6   : > { %v3640_v7 = vpop.f32.mrf.mxu1  ;;  %3879 = vmatmul.mubr.f32.gmra.mxu1 %v3246_v40  ;;  %v3360_v22 = vpop.f32.mrf.mxu0  ;;  %3599 = vmatmul.mubr.f32.gmra.mxu0 %v3134_v21 }
 0x2f7   : > { %4055 = vst [vmem:[%s7819_s28 + $0x1c0] sm:$0xff] %v3640_v7  ;;  %3883 = vmatprep.mubr.f32.mxu1 %v3249_v46  ;;  %3999 = vst [vmem:[%s7819_s28] sm:$0xff] %v3360_v22  ;;  %3603 = vmatprep.mubr.f32.mxu0 %v3137_v30  ;;  %v3264_v30 = vld [vmem:[%s8135_s3 + $0x710] sm:$0xff]  ;;  %v3267_v22 = vld [vmem:[%s8135_s3 + $0x728] sm:$0xff] }
 0x2f8   : > { %v3642_v19 = vpop.f32.mrf.mxu1  ;;  %v3362_v41 = vpop.f32.mrf.mxu0 }
 0x2fa   : > { %v3645_v53 = vpop.f32.mrf.mxu1  ;;  %3884 = vmatmul.mubr.f32.gmra.mxu1 %v3248_v33  ;;  %v3365_v10 = vpop.f32.mrf.mxu0  ;;  %3604 = vmatmul.mubr.f32.gmra.mxu0 %v3136_v36 }
 0x2fb   : > { %4056 = vst [vmem:[%s7819_s28 + $0x1c8] sm:$0xff] %v3645_v53  ;;  %3888 = vmatprep.mubr.f32.mxu1 %v3251_v49  ;;  %4000 = vst [vmem:[%s7819_s28 + $0x8] sm:$0xff] %v3365_v10  ;;  %3608 = vmatprep.mubr.f32.mxu0 %v3139_v63  ;;  %v3266_v49 = vld [vmem:[%s8135_s3 + $0x720] sm:$0xff]  ;;  %v3269_v63 = vld [vmem:[%s8135_s3 + $0x738] sm:$0xff] }
 0x2fc   : > { %v3647_v42 = vpop.f32.mrf.mxu1  ;;  %v3367_v38 = vpop.f32.mrf.mxu0 }
 0x2fe   : > { %v3650_v44 = vpop.f32.mrf.mxu1  ;;  %3889 = vmatmul.mubr.f32.gmra.mxu1 %v3250_v13  ;;  %v3370_v28 = vpop.f32.mrf.mxu0  ;;  %3609 = vmatmul.mubr.f32.gmra.mxu0 %v3138_v23  ;;  %v3268_v23 = vld [vmem:[%s8135_s3 + $0x730] sm:$0xff] }
 0x2ff   : > { %4057 = vst [vmem:[%s7819_s28 + $0x1d0] sm:$0xff] %v3650_v44  ;;  %3893 = vmatprep.mubr.f32.mxu1 %v3253_v47  ;;  %4001 = vst [vmem:[%s7819_s28 + $0x10] sm:$0xff] %v3370_v28  ;;  %3613 = vmatprep.mubr.f32.mxu0 %v3141_v45  ;;  %v3271_v47 = vld [vmem:[%s8135_s3 + $0x748] sm:$0xff]  ;;  %v3270_v28 = vld [vmem:[%s8135_s3 + $0x740] sm:$0xff] }
 0x300   : > { %v3652_v14 = vpop.f32.mrf.mxu1  ;;  %v3372_v2 = vpop.f32.mrf.mxu0 }
 0x302   : > { %v3655_v4 = vpop.f32.mrf.mxu1  ;;  %3894 = vmatmul.mubr.f32.gmra.mxu1 %v3252_v1  ;;  %v3375_v39 = vpop.f32.mrf.mxu0  ;;  %3614 = vmatmul.mubr.f32.gmra.mxu0 %v3140_v32  ;;  %v3273_v32 = vld [vmem:[%s8135_s3 + $0x758] sm:$0xff] }
 0x303   : > { %4058 = vst [vmem:[%s7819_s28 + $0x1d8] sm:$0xff] %v3655_v4  ;;  %3898 = vmatprep.mubr.f32.mxu1 %v3255_v12  ;;  %4002 = vst [vmem:[%s7819_s28 + $0x18] sm:$0xff] %v3375_v39  ;;  %3618 = vmatprep.mubr.f32.mxu0 %v3143_v55  ;;  %v3272_v55 = vld [vmem:[%s8135_s3 + $0x750] sm:$0xff]  ;;  %v3275_v39 = vld [vmem:[%s8135_s3 + $0x768] sm:$0xff] }
 0x304   : > { %v3657_v58 = vpop.f32.mrf.mxu1  ;;  %v3377_v62 = vpop.f32.mrf.mxu0 }
 0x306   : > { %v3660_v50 = vpop.f32.mrf.mxu1  ;;  %3899 = vmatmul.mubr.f32.gmra.mxu1 %v3254_v8  ;;  %v3380_v56 = vpop.f32.mrf.mxu0  ;;  %3619 = vmatmul.mubr.f32.gmra.mxu0 %v3142_v25 }
 0x307   : > { %4059 = vst [vmem:[%s7819_s28 + $0x1e0] sm:$0xff] %v3660_v50  ;;  %3903 = vmatprep.mubr.f32.mxu1 %v3257_v5  ;;  %4003 = vst [vmem:[%s7819_s28 + $0x20] sm:$0xff] %v3380_v56  ;;  %3623 = vmatprep.mubr.f32.mxu0 %v3145_v26  ;;  %v3274_v5 = vld [vmem:[%s8135_s3 + $0x760] sm:$0xff]  ;;  %v3277_v26 = vld [vmem:[%s8135_s3 + $0x778] sm:$0xff] }
 0x308   : > { %v3662_v37 = vpop.f32.mrf.mxu1  ;;  %v3382_v34 = vpop.f32.mrf.mxu0 }
 0x30a   : > { %v3665_v60 = vpop.f32.mrf.mxu1  ;;  %3904 = vmatmul.mubr.f32.gmra.mxu1 %v3256_v6  ;;  %v3385_v61 = vpop.f32.mrf.mxu0  ;;  %3624 = vmatmul.mubr.f32.gmra.mxu0 %v3144_v0  ;;  %v3276_v0 = vld [vmem:[%s8135_s3 + $0x770] sm:$0xff] }
 0x30b   : > { %4060 = vst [vmem:[%s7819_s28 + $0x1e8] sm:$0xff] %v3665_v60  ;;  %3908 = vmatprep.mubr.f32.mxu1 %v3259_v20  ;;  %4004 = vst [vmem:[%s7819_s28 + $0x28] sm:$0xff] %v3385_v61  ;;  %3628 = vmatprep.mubr.f32.mxu0 %v3147_v35  ;;  %v3279_v20 = vld [vmem:[%s8135_s3 + $0x788] sm:$0xff]  ;;  %v3278_v61 = vld [vmem:[%s8135_s3 + $0x780] sm:$0xff] }
 0x30c   : > { %v3667_v52 = vpop.f32.mrf.mxu1  ;;  %v3387_v29 = vpop.f32.mrf.mxu0 }
 0x30e   : > { %v3670_v15 = vpop.f32.mrf.mxu1  ;;  %3909 = vmatmul.mubr.f32.gmra.mxu1 %v3258_v9  ;;  %v3390_v51 = vpop.f32.mrf.mxu0  ;;  %3629 = vmatmul.mubr.f32.gmra.mxu0 %v3146_v54  ;;  %v3281_v54 = vld [vmem:[%s8135_s3 + $0x798] sm:$0xff] }
 0x30f   : > { %4061 = vst [vmem:[%s7819_s28 + $0x1f0] sm:$0xff] %v3670_v15  ;;  %3913 = vmatprep.mubr.f32.mxu1 %v3261_v57  ;;  %4005 = vst [vmem:[%s7819_s28 + $0x30] sm:$0xff] %v3390_v51  ;;  %3633 = vmatprep.mubr.f32.mxu0 %v3149_v24  ;;  %v3280_v24 = vld [vmem:[%s8135_s3 + $0x790] sm:$0xff]  ;;  %v3283_v51 = vld [vmem:[%s8135_s3 + $0x7a8] sm:$0xff] }
 0x310   : > { %v3672_v18 = vpop.f32.mrf.mxu1  ;;  %v3392_v11 = vpop.f32.mrf.mxu0 }
 0x312   : > { %v3675_v3 = vpop.f32.mrf.mxu1  ;;  %3914 = vmatmul.mubr.f32.gmra.mxu1 %v3260_v31  ;;  %v3395_v59 = vpop.f32.mrf.mxu0  ;;  %3634 = vmatmul.mubr.f32.gmra.mxu0 %v3148_v17 }
 0x313   : > { %4062 = vst [vmem:[%s7819_s28 + $0x1f8] sm:$0xff] %v3675_v3  ;;  %3918 = vmatprep.mubr.f32.mxu1 %v3263_v27  ;;  %4006 = vst [vmem:[%s7819_s28 + $0x38] sm:$0xff] %v3395_v59  ;;  %v3282_v27 = vld [vmem:[%s8135_s3 + $0x7a0] sm:$0xff]  ;;  %v3285_v3 = vld [vmem:[%s8135_s3 + $0x7b8] sm:$0xff] }
 0x314   : > { %v3677_v16 = vpop.f32.mrf.mxu1  ;;  %v3397_v40 = vpop.f32.mrf.mxu0 }
 0x316   : > { %v3680_v21 = vpop.f32.mrf.mxu1  ;;  %3919 = vmatmul.mubr.f32.gmra.mxu1 %v3262_v48  ;;  %v3400_v46 = vpop.f32.mrf.mxu0 }
 0x317   : > { %4063 = vst [vmem:[%s7819_s28 + $0x200] sm:$0xff] %v3680_v21  ;;  %3923 = vmatprep.mubr.f32.mxu1 %v3265_v43  ;;  %4007 = vst [vmem:[%s7819_s28 + $0x40] sm:$0xff] %v3400_v46  ;;  %v3284_v43 = vld [vmem:[%s8135_s3 + $0x7b0] sm:$0xff]  ;;  %v3287_v21 = vld [vmem:[%s8135_s3 + $0x7c8] sm:$0xff] }
 0x318   : > { %v3682_v7 = vpop.f32.mrf.mxu1  ;;  %v3402_v33 = vpop.f32.mrf.mxu0 }
 0x31a   : > { %v3685_v36 = vpop.f32.mrf.mxu1  ;;  %3924 = vmatmul.mubr.f32.gmra.mxu1 %v3264_v30  ;;  %v3405_v19 = vpop.f32.mrf.mxu0 }
 0x31b   : > { %4064 = vst [vmem:[%s7819_s28 + $0x208] sm:$0xff] %v3685_v36  ;;  %3928 = vmatprep.mubr.f32.mxu1 %v3267_v22  ;;  %4008 = vst [vmem:[%s7819_s28 + $0x48] sm:$0xff] %v3405_v19  ;;  %v3286_v22 = vld [vmem:[%s8135_s3 + $0x7c0] sm:$0xff]  ;;  %v3289_v36 = vld [vmem:[%s8135_s3 + $0x7d8] sm:$0xff] }
 0x31c   : > { %v3687_v41 = vpop.f32.mrf.mxu1  ;;  %v3407_v53 = vpop.f32.mrf.mxu0 }
 0x31e   : > { %v3690_v10 = vpop.f32.mrf.mxu1  ;;  %3929 = vmatmul.mubr.f32.gmra.mxu1 %v3266_v49  ;;  %v3410_v13 = vpop.f32.mrf.mxu0 }
 0x31f   : > { %4065 = vst [vmem:[%s7819_s28 + $0x210] sm:$0xff] %v3690_v10  ;;  %3933 = vmatprep.mubr.f32.mxu1 %v3269_v63  ;;  %4009 = vst [vmem:[%s7819_s28 + $0x50] sm:$0xff] %v3410_v13  ;;  %v3288_v63 = vld [vmem:[%s8135_s3 + $0x7d0] sm:$0xff]  ;;  %v3291_v10 = vld [vmem:[%s8135_s3 + $0x7e8] sm:$0xff] }
 0x320   : > { %v3692_v42 = vpop.f32.mrf.mxu1  ;;  %v3412_v38 = vpop.f32.mrf.mxu0 }
 0x322   : > { %v3695_v45 = vpop.f32.mrf.mxu1  ;;  %3934 = vmatmul.mubr.f32.gmra.mxu1 %v3268_v23  ;;  %v3415_v44 = vpop.f32.mrf.mxu0 }
 0x323   : > { %4066 = vst [vmem:[%s7819_s28 + $0x218] sm:$0xff] %v3695_v45  ;;  %3938 = vmatprep.mubr.f32.mxu1 %v3271_v47  ;;  %4010 = vst [vmem:[%s7819_s28 + $0x58] sm:$0xff] %v3415_v44  ;;  %v3290_v47 = vld [vmem:[%s8135_s3 + $0x7e0] sm:$0xff]  ;;  %v3293_v45 = vld [vmem:[%s8135_s3 + $0x7f8] sm:$0xff] }
 0x324   : > { %v3697_v1 = vpop.f32.mrf.mxu1  ;;  %v3417_v14 = vpop.f32.mrf.mxu0 }
 0x326   : > { %v3700_v12 = vpop.f32.mrf.mxu1  ;;  %3939 = vmatmul.mubr.f32.gmra.mxu1 %v3270_v28  ;;  %v3420_v2 = vpop.f32.mrf.mxu0 }
 0x327   : > { %4067 = vst [vmem:[%s7819_s28 + $0x220] sm:$0xff] %v3700_v12  ;;  %3943 = vmatprep.mubr.f32.mxu1 %v3273_v32  ;;  %4011 = vst [vmem:[%s7819_s28 + $0x60] sm:$0xff] %v3420_v2  ;;  %v3292_v32 = vld [vmem:[%s8135_s3 + $0x7f0] sm:$0xff] }
 0x328   : > { %v3702_v4 = vpop.f32.mrf.mxu1  ;;  %v3422_v8 = vpop.f32.mrf.mxu0 }
 0x32a   : > { %v3705_v25 = vpop.f32.mrf.mxu1  ;;  %3944 = vmatmul.mubr.f32.gmra.mxu1 %v3272_v55  ;;  %v3425_v58 = vpop.f32.mrf.mxu0 }
 0x32b   : > { %4068 = vst [vmem:[%s7819_s28 + $0x228] sm:$0xff] %v3705_v25  ;;  %3948 = vmatprep.mubr.f32.mxu1 %v3275_v39  ;;  %4012 = vst [vmem:[%s7819_s28 + $0x68] sm:$0xff] %v3425_v58 }
 0x32c   : > { %v3707_v62 = vpop.f32.mrf.mxu1  ;;  %v3427_v50 = vpop.f32.mrf.mxu0 }
 0x32e   : > { %v3710_v56 = vpop.f32.mrf.mxu1  ;;  %3949 = vmatmul.mubr.f32.gmra.mxu1 %v3274_v5  ;;  %v3430_v6 = vpop.f32.mrf.mxu0 }
 0x32f   : > { %4069 = vst [vmem:[%s7819_s28 + $0x230] sm:$0xff] %v3710_v56  ;;  %3953 = vmatprep.mubr.f32.mxu1 %v3277_v26  ;;  %4013 = vst [vmem:[%s7819_s28 + $0x70] sm:$0xff] %v3430_v6 }
 0x330   : > { %v3712_v37 = vpop.f32.mrf.mxu1  ;;  %v3432_v34 = vpop.f32.mrf.mxu0 }
 0x332   : > { %v3715_v35 = vpop.f32.mrf.mxu1  ;;  %3954 = vmatmul.mubr.f32.gmra.mxu1 %v3276_v0  ;;  %v3435_v60 = vpop.f32.mrf.mxu0 }
 0x333   : > { %4070 = vst [vmem:[%s7819_s28 + $0x238] sm:$0xff] %v3715_v35  ;;  %3958 = vmatprep.mubr.f32.mxu1 %v3279_v20  ;;  %4014 = vst [vmem:[%s7819_s28 + $0x78] sm:$0xff] %v3435_v60 }
 0x334   : > { %v3717_v9 = vpop.f32.mrf.mxu1  ;;  %v3437_v52 = vpop.f32.mrf.mxu0 }
 0x336   : > { %v3720_v57 = vpop.f32.mrf.mxu1  ;;  %3959 = vmatmul.mubr.f32.gmra.mxu1 %v3278_v61  ;;  %v3440_v29 = vpop.f32.mrf.mxu0 }
 0x337   : > { %4071 = vst [vmem:[%s7819_s28 + $0x240] sm:$0xff] %v3720_v57  ;;  %3963 = vmatprep.mubr.f32.mxu1 %v3281_v54  ;;  %4015 = vst [vmem:[%s7819_s28 + $0x80] sm:$0xff] %v3440_v29 }
 0x338   : > { %v3722_v15 = vpop.f32.mrf.mxu1  ;;  %v3442_v31 = vpop.f32.mrf.mxu0 }
 0x33a   : > { %v3725_v17 = vpop.f32.mrf.mxu1  ;;  %3964 = vmatmul.mubr.f32.gmra.mxu1 %v3280_v24  ;;  %v3445_v18 = vpop.f32.mrf.mxu0 }
 0x33b   : > { %4072 = vst [vmem:[%s7819_s28 + $0x248] sm:$0xff] %v3725_v17  ;;  %3968 = vmatprep.mubr.f32.mxu1 %v3283_v51  ;;  %4016 = vst [vmem:[%s7819_s28 + $0x88] sm:$0xff] %v3445_v18 }
 0x33c   : > { %v3727_v11 = vpop.f32.mrf.mxu1  ;;  %v3447_v59 = vpop.f32.mrf.mxu0 }
 0x33e   : > { %v3730_v48 = vpop.f32.mrf.mxu1  ;;  %3969 = vmatmul.mubr.f32.gmra.mxu1 %v3282_v27  ;;  %v3450_v16 = vpop.f32.mrf.mxu0 }
 0x33f   : > { %4073 = vst [vmem:[%s7819_s28 + $0x250] sm:$0xff] %v3730_v48  ;;  %3973 = vmatprep.mubr.f32.mxu1 %v3285_v3  ;;  %4017 = vst [vmem:[%s7819_s28 + $0x90] sm:$0xff] %v3450_v16 }
 0x340   : > { %v3732_v40 = vpop.f32.mrf.mxu1  ;;  %v3452_v46 = vpop.f32.mrf.mxu0 }
 0x342   : > { %v3735_v30 = vpop.f32.mrf.mxu1  ;;  %3974 = vmatmul.mubr.f32.gmra.mxu1 %v3284_v43  ;;  %v3455_v7 = vpop.f32.mrf.mxu0 }
 0x343   : > { %4074 = vst [vmem:[%s7819_s28 + $0x258] sm:$0xff] %v3735_v30  ;;  %3978 = vmatprep.mubr.f32.mxu1 %v3287_v21  ;;  %4018 = vst [vmem:[%s7819_s28 + $0x98] sm:$0xff] %v3455_v7 }
 0x344   : > { %v3737_v33 = vpop.f32.mrf.mxu1  ;;  %v3457_v19 = vpop.f32.mrf.mxu0 }
 0x346   : > { %v3740_v49 = vpop.f32.mrf.mxu1  ;;  %3979 = vmatmul.mubr.f32.gmra.mxu1 %v3286_v22  ;;  %v3460_v41 = vpop.f32.mrf.mxu0 }
 0x347   : > { %4075 = vst [vmem:[%s7819_s28 + $0x260] sm:$0xff] %v3740_v49  ;;  %3983 = vmatprep.mubr.f32.mxu1 %v3289_v36  ;;  %4019 = vst [vmem:[%s7819_s28 + $0xa0] sm:$0xff] %v3460_v41 }
 0x348   : > { %v3742_v53 = vpop.f32.mrf.mxu1  ;;  %v3462_v13 = vpop.f32.mrf.mxu0 }
 0x34a   : > { %v3745_v23 = vpop.f32.mrf.mxu1  ;;  %3984 = vmatmul.mubr.f32.gmra.mxu1 %v3288_v63  ;;  %v3465_v42 = vpop.f32.mrf.mxu0 }
 0x34b   : > { %4076 = vst [vmem:[%s7819_s28 + $0x268] sm:$0xff] %v3745_v23  ;;  %3988 = vmatprep.mubr.f32.mxu1 %v3291_v10  ;;  %4020 = vst [vmem:[%s7819_s28 + $0xa8] sm:$0xff] %v3465_v42 }
 0x34c   : > { %v3747_v38 = vpop.f32.mrf.mxu1  ;;  %v3467_v44 = vpop.f32.mrf.mxu0 }
 0x34e   : > { %v3750_v28 = vpop.f32.mrf.mxu1  ;;  %3989 = vmatmul.mubr.f32.gmra.mxu1 %v3290_v47  ;;  %v3470_v1 = vpop.f32.mrf.mxu0 }
 0x34f   : > { %4077 = vst [vmem:[%s7819_s28 + $0x270] sm:$0xff] %v3750_v28  ;;  %3993 = vmatprep.mubr.f32.mxu1 %v3293_v45  ;;  %4021 = vst [vmem:[%s7819_s28 + $0xb0] sm:$0xff] %v3470_v1 }
 0x350   : > { %v3752_v14 = vpop.f32.mrf.mxu1  ;;  %v3472_v12 = vpop.f32.mrf.mxu0 }
 0x352   : > { %v3755_v2 = vpop.f32.mrf.mxu1  ;;  %3994 = vmatmul.mubr.f32.gmra.mxu1 %v3292_v32  ;;  %v3475_v55 = vpop.f32.mrf.mxu0 }
 0x353   : > { %4078 = vst [vmem:[%s7819_s28 + $0x278] sm:$0xff] %v3755_v2  ;;  %4022 = vst [vmem:[%s7819_s28 + $0xb8] sm:$0xff] %v3475_v55 }
 0x354   : > { %v3757_v4 = vpop.f32.mrf.mxu1  ;;  %v3477_v39 = vpop.f32.mrf.mxu0 }
 0x356   : > { %v3760_v8 = vpop.f32.mrf.mxu1  ;;  %v3480_v25 = vpop.f32.mrf.mxu0 }
 0x357   : > { %4079 = vst [vmem:[%s7819_s28 + $0x280] sm:$0xff] %v3760_v8  ;;  %4023 = vst [vmem:[%s7819_s28 + $0xc0] sm:$0xff] %v3480_v25 }
 0x358   : > { %v3762_v58 = vpop.f32.mrf.mxu1  ;;  %v3482_v5 = vpop.f32.mrf.mxu0 }
 0x35a   : > { %v3765_v62 = vpop.f32.mrf.mxu1  ;;  %v3485_v26 = vpop.f32.mrf.mxu0 }
 0x35b   : > { %4080 = vst [vmem:[%s7819_s28 + $0x288] sm:$0xff] %v3765_v62  ;;  %4024 = vst [vmem:[%s7819_s28 + $0xc8] sm:$0xff] %v3485_v26 }
 0x35c   : > { %v3767_v50 = vpop.f32.mrf.mxu1  ;;  %v3487_v56 = vpop.f32.mrf.mxu0 }
 0x35e   : > { %v3770_v6 = vpop.f32.mrf.mxu1  ;;  %v3490_v0 = vpop.f32.mrf.mxu0 }
 0x35f   : > { %4081 = vst [vmem:[%s7819_s28 + $0x290] sm:$0xff] %v3770_v6  ;;  %4025 = vst [vmem:[%s7819_s28 + $0xd0] sm:$0xff] %v3490_v0 }
 0x360   : > { %v3772_v37 = vpop.f32.mrf.mxu1  ;;  %v3492_v20 = vpop.f32.mrf.mxu0 }
 0x362   : > { %v3775_v34 = vpop.f32.mrf.mxu1  ;;  %v3495_v35 = vpop.f32.mrf.mxu0 }
 0x363   : > { %4082 = vst [vmem:[%s7819_s28 + $0x298] sm:$0xff] %v3775_v34  ;;  %4026 = vst [vmem:[%s7819_s28 + $0xd8] sm:$0xff] %v3495_v35 }
 0x364   : > { %v3777_v60 = vpop.f32.mrf.mxu1  ;;  %v3497_v61 = vpop.f32.mrf.mxu0 }
 0x366   : > { %v3780_v9 = vpop.f32.mrf.mxu1  ;;  %v3500_v54 = vpop.f32.mrf.mxu0 }
 0x367   : > { %4083 = vst [vmem:[%s7819_s28 + $0x2a0] sm:$0xff] %v3780_v9  ;;  %4027 = vst [vmem:[%s7819_s28 + $0xe0] sm:$0xff] %v3500_v54 }
 0x368   : > { %v3782_v52 = vpop.f32.mrf.mxu1  ;;  %v3502_v57 = vpop.f32.mrf.mxu0 }
 0x36a   : > { %v3785_v29 = vpop.f32.mrf.mxu1  ;;  %v3505_v24 = vpop.f32.mrf.mxu0 }
 0x36b   : > { %4084 = vst [vmem:[%s7819_s28 + $0x2a8] sm:$0xff] %v3785_v29  ;;  %4028 = vst [vmem:[%s7819_s28 + $0xe8] sm:$0xff] %v3505_v24 }
 0x36c   : > { %v3787_v15 = vpop.f32.mrf.mxu1  ;;  %v3507_v51 = vpop.f32.mrf.mxu0 }
 0x36e   : > { %v3790_v31 = vpop.f32.mrf.mxu1  ;;  %v3510_v17 = vpop.f32.mrf.mxu0 }
 0x36f   : > { %4085 = vst [vmem:[%s7819_s28 + $0x2b0] sm:$0xff] %v3790_v31  ;;  %4029 = vst [vmem:[%s7819_s28 + $0xf0] sm:$0xff] %v3510_v17 }
 0x370   : > { %v3792_v18 = vpop.f32.mrf.mxu1  ;;  %v3512_v27 = vpop.f32.mrf.mxu0 }
 0x372   : > { %v3795_v11 = vpop.f32.mrf.mxu1  ;;  %v3515_v3 = vpop.f32.mrf.mxu0 }
 0x373   : > { %4086 = vst [vmem:[%s7819_s28 + $0x2b8] sm:$0xff] %v3795_v11  ;;  %4030 = vst [vmem:[%s7819_s28 + $0xf8] sm:$0xff] %v3515_v3 }
 0x374   : > { %v3797_v59 = vpop.f32.mrf.mxu1  ;;  %v3517_v48 = vpop.f32.mrf.mxu0 }
 0x376   : > { %v3800_v16 = vpop.f32.mrf.mxu1  ;;  %v3520_v43 = vpop.f32.mrf.mxu0 }
 0x377   : > { %4087 = vst [vmem:[%s7819_s28 + $0x2c0] sm:$0xff] %v3800_v16  ;;  %4031 = vst [vmem:[%s7819_s28 + $0x100] sm:$0xff] %v3520_v43 }
 0x378   : > { %v3802_v40 = vpop.f32.mrf.mxu1  ;;  %v3522_v21 = vpop.f32.mrf.mxu0 }
 0x37a   : > { %v3805_v46 = vpop.f32.mrf.mxu1  ;;  %v3525_v30 = vpop.f32.mrf.mxu0 }
 0x37b   : > { %4088 = vst [vmem:[%s7819_s28 + $0x2c8] sm:$0xff] %v3805_v46  ;;  %4032 = vst [vmem:[%s7819_s28 + $0x108] sm:$0xff] %v3525_v30 }
 0x37c   : > { %v3807_v7 = vpop.f32.mrf.mxu1  ;;  %v3527_v22 = vpop.f32.mrf.mxu0 }
 0x37e   : > { %v3810_v33 = vpop.f32.mrf.mxu1  ;;  %v3530_v36 = vpop.f32.mrf.mxu0 }
 0x37f   : > { %4089 = vst [vmem:[%s7819_s28 + $0x2d0] sm:$0xff] %v3810_v33  ;;  %4033 = vst [vmem:[%s7819_s28 + $0x110] sm:$0xff] %v3530_v36 }
 0x380   : > { %v3812_v19 = vpop.f32.mrf.mxu1  ;;  %v3532_v49 = vpop.f32.mrf.mxu0 }
 0x382   : > { %v3815_v41 = vpop.f32.mrf.mxu1  ;;  %v3535_v63 = vpop.f32.mrf.mxu0 }
 0x383   : > { %4090 = vst [vmem:[%s7819_s28 + $0x2d8] sm:$0xff] %v3815_v41  ;;  %4034 = vst [vmem:[%s7819_s28 + $0x118] sm:$0xff] %v3535_v63 }
 0x384   : > { %v3817_v53 = vpop.f32.mrf.mxu1  ;;  %v3537_v10 = vpop.f32.mrf.mxu0 }
 0x386   : > { %v3820_v13 = vpop.f32.mrf.mxu1  ;;  %v3540_v23 = vpop.f32.mrf.mxu0 }
 0x387   : > { %4091 = vst [vmem:[%s7819_s28 + $0x2e0] sm:$0xff] %v3820_v13  ;;  %4035 = vst [vmem:[%s7819_s28 + $0x120] sm:$0xff] %v3540_v23 }
 0x388   : > { %v3822_v42 = vpop.f32.mrf.mxu1  ;;  %v3542_v47 = vpop.f32.mrf.mxu0 }
 0x38a   : > { %v3825_v38 = vpop.f32.mrf.mxu1  ;;  %v3545_v45 = vpop.f32.mrf.mxu0 }
 0x38b   : > { %4092 = vst [vmem:[%s7819_s28 + $0x2e8] sm:$0xff] %v3825_v38  ;;  %4036 = vst [vmem:[%s7819_s28 + $0x128] sm:$0xff] %v3545_v45 }
 0x38c   : > { %v3827_v44 = vpop.f32.mrf.mxu1  ;;  %v3547_v28 = vpop.f32.mrf.mxu0 }
 0x38e   : > { %v3830_v1 = vpop.f32.mrf.mxu1  ;;  %v3550_v32 = vpop.f32.mrf.mxu0 }
 0x38f   : > { %4093 = vst [vmem:[%s7819_s28 + $0x2f0] sm:$0xff] %v3830_v1  ;;  %4037 = vst [vmem:[%s7819_s28 + $0x130] sm:$0xff] %v3550_v32 }
 0x390   : > { %v3832_v14 = vpop.f32.mrf.mxu1  ;;  %v3552_v12 = vpop.f32.mrf.mxu0 }
 0x392   : > { %v3835_v2 = vpop.f32.mrf.mxu1  ;;  %v3555_v55 = vpop.f32.mrf.mxu0 }
 0x393   : > { %4094 = vst [vmem:[%s7819_s28 + $0x2f8] sm:$0xff] %v3835_v2  ;;  %4038 = vst [vmem:[%s7819_s28 + $0x138] sm:$0xff] %v3555_v55 }
 0x394   : > { %v3837_v4 = vpop.f32.mrf.mxu1  ;;  %v3557_v39 = vpop.f32.mrf.mxu0 }
 0x396   : > { %v3840_v8 = vpop.f32.mrf.mxu1  ;;  %v3560_v25 = vpop.f32.mrf.mxu0 }
 0x397   : > { %4095 = vst [vmem:[%s7819_s28 + $0x300] sm:$0xff] %v3840_v8  ;;  %4039 = vst [vmem:[%s7819_s28 + $0x140] sm:$0xff] %v3560_v25 }
 0x398   : > { %v3842_v58 = vpop.f32.mrf.mxu1  ;;  %v3562_v5 = vpop.f32.mrf.mxu0 }
 0x39a   : > { %v3845_v62 = vpop.f32.mrf.mxu1  ;;  %v3565_v26 = vpop.f32.mrf.mxu0 }
 0x39b   : > { %4096 = vst [vmem:[%s7819_s28 + $0x308] sm:$0xff] %v3845_v62  ;;  %4040 = vst [vmem:[%s7819_s28 + $0x148] sm:$0xff] %v3565_v26 }
 0x39c   : > { %v3847_v50 = vpop.f32.mrf.mxu1  ;;  %v3567_v56 = vpop.f32.mrf.mxu0 }
 0x39e   : > { %v3850_v6 = vpop.f32.mrf.mxu1  ;;  %v3570_v0 = vpop.f32.mrf.mxu0 }
 0x39f   : > { %4097 = vst [vmem:[%s7819_s28 + $0x310] sm:$0xff] %v3850_v6  ;;  %4041 = vst [vmem:[%s7819_s28 + $0x150] sm:$0xff] %v3570_v0 }
 0x3a0   : > { %v3852_v37 = vpop.f32.mrf.mxu1  ;;  %v3572_v20 = vpop.f32.mrf.mxu0 }
 0x3a2   : > { %v3855_v34 = vpop.f32.mrf.mxu1  ;;  %v3575_v35 = vpop.f32.mrf.mxu0 }
 0x3a3   : > { %4098 = vst [vmem:[%s7819_s28 + $0x318] sm:$0xff] %v3855_v34  ;;  %4042 = vst [vmem:[%s7819_s28 + $0x158] sm:$0xff] %v3575_v35 }
 0x3a4   : > { %v3857_v60 = vpop.f32.mrf.mxu1  ;;  %v3577_v61 = vpop.f32.mrf.mxu0 }
 0x3a6   : > { %v3860_v9 = vpop.f32.mrf.mxu1  ;;  %v3580_v54 = vpop.f32.mrf.mxu0 }
 0x3a7   : > { %4099 = vst [vmem:[%s7819_s28 + $0x320] sm:$0xff] %v3860_v9  ;;  %4043 = vst [vmem:[%s7819_s28 + $0x160] sm:$0xff] %v3580_v54 }
 0x3a8   : > { %v3862_v52 = vpop.f32.mrf.mxu1  ;;  %v3582_v57 = vpop.f32.mrf.mxu0 }
 0x3aa   : > { %v3865_v29 = vpop.f32.mrf.mxu1  ;;  %v3585_v24 = vpop.f32.mrf.mxu0 }
 0x3ab   : > { %4100 = vst [vmem:[%s7819_s28 + $0x328] sm:$0xff] %v3865_v29  ;;  %4044 = vst [vmem:[%s7819_s28 + $0x168] sm:$0xff] %v3585_v24 }
 0x3ac   : > { %v3867_v15 = vpop.f32.mrf.mxu1  ;;  %v3587_v51 = vpop.f32.mrf.mxu0 }
 0x3ae   : > { %v3870_v31 = vpop.f32.mrf.mxu1  ;;  %v3590_v17 = vpop.f32.mrf.mxu0 }
 0x3af   : > { %4101 = vst [vmem:[%s7819_s28 + $0x330] sm:$0xff] %v3870_v31  ;;  %4045 = vst [vmem:[%s7819_s28 + $0x170] sm:$0xff] %v3590_v17 }
 0x3b0   : > { %v3872_v18 = vpop.f32.mrf.mxu1  ;;  %v3592_v27 = vpop.f32.mrf.mxu0 }
 0x3b2   : > { %v3875_v11 = vpop.f32.mrf.mxu1  ;;  %v3595_v3 = vpop.f32.mrf.mxu0 }
 0x3b3   : > { %4102 = vst [vmem:[%s7819_s28 + $0x338] sm:$0xff] %v3875_v11  ;;  %4046 = vst [vmem:[%s7819_s28 + $0x178] sm:$0xff] %v3595_v3 }
 0x3b4   : > { %v3877_v59 = vpop.f32.mrf.mxu1  ;;  %v3597_v48 = vpop.f32.mrf.mxu0 }
 0x3b6   : > { %v3880_v16 = vpop.f32.mrf.mxu1  ;;  %v3600_v43 = vpop.f32.mrf.mxu0 }
 0x3b7   : > { %4103 = vst [vmem:[%s7819_s28 + $0x340] sm:$0xff] %v3880_v16  ;;  %4047 = vst [vmem:[%s7819_s28 + $0x180] sm:$0xff] %v3600_v43 }
 0x3b8   : > { %v3882_v40 = vpop.f32.mrf.mxu1  ;;  %v3602_v21 = vpop.f32.mrf.mxu0 }
 0x3ba   : > { %v3885_v46 = vpop.f32.mrf.mxu1  ;;  %v3605_v30 = vpop.f32.mrf.mxu0 }
 0x3bb   : > { %4104 = vst [vmem:[%s7819_s28 + $0x348] sm:$0xff] %v3885_v46  ;;  %4048 = vst [vmem:[%s7819_s28 + $0x188] sm:$0xff] %v3605_v30 }
 0x3bc   : > { %v3887_v7 = vpop.f32.mrf.mxu1  ;;  %v3607_v22 = vpop.f32.mrf.mxu0 }
 0x3be   : > { %v3890_v33 = vpop.f32.mrf.mxu1  ;;  %v3610_v36 = vpop.f32.mrf.mxu0 }
 0x3bf   : > { %4105 = vst [vmem:[%s7819_s28 + $0x350] sm:$0xff] %v3890_v33  ;;  %4049 = vst [vmem:[%s7819_s28 + $0x190] sm:$0xff] %v3610_v36 }
 0x3c0   : > { %v3892_v19 = vpop.f32.mrf.mxu1  ;;  %v3612_v49 = vpop.f32.mrf.mxu0 }
 0x3c2   : > { %v3895_v41 = vpop.f32.mrf.mxu1  ;;  %v3615_v63 = vpop.f32.mrf.mxu0 }
 0x3c3   : > { %4106 = vst [vmem:[%s7819_s28 + $0x358] sm:$0xff] %v3895_v41  ;;  %4050 = vst [vmem:[%s7819_s28 + $0x198] sm:$0xff] %v3615_v63 }
 0x3c4   : > { %v3897_v53 = vpop.f32.mrf.mxu1  ;;  %v3617_v10 = vpop.f32.mrf.mxu0 }
 0x3c6   : > { %v3900_v13 = vpop.f32.mrf.mxu1  ;;  %v3620_v23 = vpop.f32.mrf.mxu0 }
 0x3c7   : > { %4107 = vst [vmem:[%s7819_s28 + $0x360] sm:$0xff] %v3900_v13  ;;  %4051 = vst [vmem:[%s7819_s28 + $0x1a0] sm:$0xff] %v3620_v23 }
 0x3c8   : > { %v3902_v42 = vpop.f32.mrf.mxu1  ;;  %v3622_v47 = vpop.f32.mrf.mxu0 }
 0x3ca   : > { %v3905_v38 = vpop.f32.mrf.mxu1  ;;  %v3625_v45 = vpop.f32.mrf.mxu0 }
 0x3cb   : > { %4108 = vst [vmem:[%s7819_s28 + $0x368] sm:$0xff] %v3905_v38  ;;  %4052 = vst [vmem:[%s7819_s28 + $0x1a8] sm:$0xff] %v3625_v45 }
 0x3cc   : > { %v3907_v44 = vpop.f32.mrf.mxu1  ;;  %v3627_v28 = vpop.f32.mrf.mxu0 }
 0x3ce   : > { %v3910_v1 = vpop.f32.mrf.mxu1  ;;  %v3630_v32 = vpop.f32.mrf.mxu0 }
 0x3cf   : > { %4109 = vst [vmem:[%s7819_s28 + $0x370] sm:$0xff] %v3910_v1  ;;  %4053 = vst [vmem:[%s7819_s28 + $0x1b0] sm:$0xff] %v3630_v32 }
 0x3d0   : > { %v3912_v14 = vpop.f32.mrf.mxu1  ;;  %v3632_v12 = vpop.f32.mrf.mxu0 }
 0x3d2   : > { %v3915_v2 = vpop.f32.mrf.mxu1  ;;  %v3635_v55 = vpop.f32.mrf.mxu0 }
 0x3d3   : > { %4110 = vst [vmem:[%s7819_s28 + $0x378] sm:$0xff] %v3915_v2  ;;  %4054 = vst [vmem:[%s7819_s28 + $0x1b8] sm:$0xff] %v3635_v55 }
 0x3d4   : > { %v3917_v4 = vpop.f32.mrf.mxu1  ;;  %v3637_v39 = vpop.f32.mrf.mxu0 }
 0x3d6   : > { %v3920_v8 = vpop.f32.mrf.mxu1 }
 0x3d7   : > { %4111 = vst [vmem:[%s7819_s28 + $0x380] sm:$0xff] %v3920_v8 }
 0x3d8   : > { %v3922_v25 = vpop.f32.mrf.mxu1 }
 0x3da   : > { %v3925_v58 = vpop.f32.mrf.mxu1 }
 0x3db   : > { %4112 = vst [vmem:[%s7819_s28 + $0x388] sm:$0xff] %v3925_v58 }
 0x3dc   : > { %v3927_v5 = vpop.f32.mrf.mxu1 }
 0x3de   : > { %v3930_v62 = vpop.f32.mrf.mxu1 }
 0x3df   : > { %4113 = vst [vmem:[%s7819_s28 + $0x390] sm:$0xff] %v3930_v62 }
 0x3e0   : > { %v3932_v26 = vpop.f32.mrf.mxu1 }
 0x3e2   : > { %v3935_v50 = vpop.f32.mrf.mxu1 }
 0x3e3   : > { %4114 = vst [vmem:[%s7819_s28 + $0x398] sm:$0xff] %v3935_v50 }
 0x3e4   : > { %v3937_v56 = vpop.f32.mrf.mxu1 }
 0x3e6   : > { %v3940_v6 = vpop.f32.mrf.mxu1 }
 0x3e7   : > { %4115 = vst [vmem:[%s7819_s28 + $0x3a0] sm:$0xff] %v3940_v6 }
 0x3e8   : > { %v3942_v0 = vpop.f32.mrf.mxu1 }
 0x3ea   : > { %v3945_v37 = vpop.f32.mrf.mxu1 }
 0x3eb   : > { %4116 = vst [vmem:[%s7819_s28 + $0x3a8] sm:$0xff] %v3945_v37 }
 0x3ec   : > { %v3947_v20 = vpop.f32.mrf.mxu1 }
 0x3ee   : > { %v3950_v34 = vpop.f32.mrf.mxu1 }
 0x3ef   : > { %4117 = vst [vmem:[%s7819_s28 + $0x3b0] sm:$0xff] %v3950_v34 }
 0x3f0   : > { %v3952_v35 = vpop.f32.mrf.mxu1 }
 0x3f2   : > { %v3955_v60 = vpop.f32.mrf.mxu1 }
 0x3f3   : > { %4118 = vst [vmem:[%s7819_s28 + $0x3b8] sm:$0xff] %v3955_v60 }
 0x3f4   : > { %v3957_v61 = vpop.f32.mrf.mxu1 }
 0x3f6   : > { %v3960_v9 = vpop.f32.mrf.mxu1 }
 0x3f7   : > { %4119 = vst [vmem:[%s7819_s28 + $0x3c0] sm:$0xff] %v3960_v9 }
 0x3f8   : > { %v3962_v54 = vpop.f32.mrf.mxu1 }
 0x3fa   : > { %v3965_v52 = vpop.f32.mrf.mxu1 }
 0x3fb   : > { %4120 = vst [vmem:[%s7819_s28 + $0x3c8] sm:$0xff] %v3965_v52 }
 0x3fc   : > { %v3967_v57 = vpop.f32.mrf.mxu1 }
 0x3fe   : > { %v3970_v29 = vpop.f32.mrf.mxu1 }
 0x3ff   : > { %4121 = vst [vmem:[%s7819_s28 + $0x3d0] sm:$0xff] %v3970_v29 }
 0x400   : > { %v3972_v24 = vpop.f32.mrf.mxu1 }
 0x402   : > { %v3975_v15 = vpop.f32.mrf.mxu1 }
 0x403   : > { %4122 = vst [vmem:[%s7819_s28 + $0x3d8] sm:$0xff] %v3975_v15 }
 0x404   : > { %v3977_v51 = vpop.f32.mrf.mxu1 }
 0x406   : > { %v3980_v31 = vpop.f32.mrf.mxu1 }
 0x407   : > { %4123 = vst [vmem:[%s7819_s28 + $0x3e0] sm:$0xff] %v3980_v31 }
 0x408   : > { %v3982_v17 = vpop.f32.mrf.mxu1 }
 0x40a   : > { %v3985_v18 = vpop.f32.mrf.mxu1 }
 0x40b   : > { %4124 = vst [vmem:[%s7819_s28 + $0x3e8] sm:$0xff] %v3985_v18 }
 0x40c   : > { %v3987_v27 = vpop.f32.mrf.mxu1 }
 0x40e   : > { %v3990_v11 = vpop.f32.mrf.mxu1 }
 0x40f   : > { %4125 = vst [vmem:[%s7819_s28 + $0x3f0] sm:$0xff] %v3990_v11 }
 0x410   : > { %v3992_v3 = vpop.f32.mrf.mxu1 }
 0x412   : > { %v3995_v59 = vpop.f32.mrf.mxu1 }
 0x413   : > { %4126 = vst [vmem:[%s7819_s28 + $0x3f8] sm:$0xff] %v3995_v59 }
 0x414   : > { %v3997_v48 = vpop.f32.mrf.mxu1 }
 0x415 PF: > { %s14_s15 = sadd.s32 1, %s5326_s15  }
 0x416   : > { %p11_p4 = scmp.ge.s32.totalorder %s14_s15, 4  }
 0x418   :  { %13 = sbr.rel (!%p11_p4) target bundleno = 1 (0x1), region = 74 }

</bundles_post_ra>
